<compile_context>
chip_gen: v7x
topology: tpu7x:2x2x1
jax: 0.10.0
libtpu: 0.0.40
codegen_flags: <defaults>
</compile_context>

<pallas_src>
import jax
import jax.numpy as jnp
from jax.experimental import pallas as pl
from jax.experimental.pallas import tpu as pltpu

MATMUL_DTYPE = jnp.bfloat16


def _round_up(x, m):
    return ((x + m - 1) // m) * m


# -----------------------------------------------------------------------------
# Optional single-buffering of the constant (weight) blocks.  Probed ONCE,
# outside jit; falls back to default double-buffered BlockSpecs if this jax
# build rejects pipeline_mode=pl.Buffered(1).
# -----------------------------------------------------------------------------
_WEIGHT_PIPELINE_MODE = None
_WEIGHT_PIPELINE_PROBED = False


def _resolve_weight_pipeline_mode():
    global _WEIGHT_PIPELINE_MODE, _WEIGHT_PIPELINE_PROBED
    if _WEIGHT_PIPELINE_PROBED:
        return _WEIGHT_PIPELINE_MODE
    try:
        mode = pl.Buffered(1)

        def _probe_kernel(x_ref, o_ref):
            o_ref[...] = x_ref[...] + 1.0

        probe = pl.pallas_call(
            _probe_kernel,
            out_shape=jax.ShapeDtypeStruct((8, 128), jnp.float32),
            grid=(2,),
            in_specs=[pl.BlockSpec((8, 128), lambda i: (0, 0),
                                   pipeline_mode=mode)],
            out_specs=pl.BlockSpec((8, 128), lambda i: (0, 0)),
        )
        jax.block_until_ready(probe(jnp.zeros((8, 128), jnp.float32)))
        _WEIGHT_PIPELINE_MODE = mode
    except Exception:  # unsupported on this jax build -> default buffering
        _WEIGHT_PIPELINE_MODE = None
    _WEIGHT_PIPELINE_PROBED = True
    return _WEIGHT_PIPELINE_MODE


def _const_spec(shape):
    """BlockSpec for a block that is identical for every grid step."""
    zeros = (0,) * len(shape)
    if _WEIGHT_PIPELINE_MODE is None:
        return pl.BlockSpec(shape, lambda i: zeros)
    return pl.BlockSpec(shape, lambda i: zeros,
                        pipeline_mode=_WEIGHT_PIPELINE_MODE)


# ----------------------------- fused kernel ----------------------------------
def fused_policy_kernel(x_ref, wb1_ref, b1_ref, wb2_ref, b2_ref,
                        fc1w_ref, fc1b_ref, fc2w_ref, fc2b_ref,
                        cw_ref, cb_ref,
                        value_ref, feat_ref,
                        xbuf1, xbuf2):
    # x_ref:   (H, Bb, W*Cin)         one batch block, h-major rows, bf16
    # wb1/wb2: (3, (W+2)*Cin|C, W*C)  banded conv weights (bf16)
    # b1/b2:   (1, W*C)               biases tiled over w (f32)
    # fc1w:    (H*W*C, 1024) NHWC-permuted (bf16); fc2w: (1024, 512) (bf16)
    # cw/cb:   (1, 512) / (1, 1) critic head (f32)
    # outputs: value (Bb, 1) f32, feat (Bb, 512) f32
    # xbuf1/2: ((H+2)*Bb, (W+2)*Cin|C) padded line buffers (scratch, bf16)
    H, Bb, WCin = x_ref.shape
    WpCin = wb1_ref.shape[1]
    WC = wb1_ref.shape[2]
    WpC = wb2_ref.shape[1]
    M = H * Bb
    mm_dtype = wb1_ref.dtype

    # --- zero ONLY the padding regions of the persistent line buffers --------
    # (top/bottom pad row-blocks + right pad lane columns; the data region is
    #  fully overwritten below, so no full-buffer clear is needed.)
    xbuf1[0:Bb, :] = jnp.zeros((Bb, WpCin), mm_dtype)
    xbuf1[(H + 1) * Bb:(H + 2) * Bb, :] = jnp.zeros((Bb, WpCin), mm_dtype)
    xbuf1[:, WCin:WpCin] = jnp.zeros(((H + 2) * Bb, WpCin - WCin), mm_dtype)
    xbuf2[0:Bb, :] = jnp.zeros((Bb, WpC), mm_dtype)
    xbuf2[(H + 1) * Bb:(H + 2) * Bb, :] = jnp.zeros((Bb, WpC), mm_dtype)
    xbuf2[:, WC:WpC] = jnp.zeros(((H + 2) * Bb, WpC - WC), mm_dtype)

    # ---------------- conv1 + bias + ReLU (3 banded MXU matmuls) -------------
    # Row (h*Bb + b) of the padded buffer holds sample b, board row h-1;
    # the tap-kh LHS is the contiguous slab starting at row kh*Bb.
    for h in range(H):
        xbuf1[(h + 1) * Bb:(h + 2) * Bb, 0:WCin] = x_ref[h]
    acc1 = jnp.dot(xbuf1[0:M, :], wb1_ref[0],
                   preferred_element_type=jnp.float32)
    for kh in (1, 2):
        acc1 = acc1 + jnp.dot(xbuf1[kh * Bb:kh * Bb + M, :], wb1_ref[kh],
                              preferred_element_type=jnp.float32)
    h1 = jnp.maximum(acc1 + b1_ref[...], 0.0)                  # (H*Bb, W*C)

    # ---------------- conv2 + bias + ReLU ------------------------------------
    xbuf2[Bb:Bb + M, 0:WC] = h1.astype(mm_dtype)
    acc2 = jnp.dot(xbuf2[0:M, :], wb2_ref[0],
                   preferred_element_type=jnp.float32)
    for kh in (1, 2):
        acc2 = acc2 + jnp.dot(xbuf2[kh * Bb:kh * Bb + M, :], wb2_ref[kh],
                              preferred_element_type=jnp.float32)
    h2 = jnp.maximum(acc2 + b2_ref[...], 0.0).astype(mm_dtype)  # (H*Bb, W*C)

    # ---------------- fc1 + ReLU (partial-K over the H row slabs) ------------
    # Each h-slab is a contiguous (Bb, W*C) LHS; two running accumulators break
    # the MXU-pop -> VALU-add dependency chain.
    f1_acc = [None, None]
    for h in range(H):
        part = jnp.dot(h2[h * Bb:(h + 1) * Bb, :],
                       fc1w_ref[h * WC:(h + 1) * WC, :],
                       preferred_element_type=jnp.float32)
        j = h & 1
        f1_acc[j] = part if f1_acc[j] is None else f1_acc[j] + part
    f1_sum = f1_acc[0] if f1_acc[1] is None else f1_acc[0] + f1_acc[1]
    f1 = jnp.maximum(f1_sum + fc1b_ref[...], 0.0)               # (Bb, 1024)

    # ---------------- fc2 + ReLU ----------------------------------------------
    f2 = jnp.maximum(
        jnp.dot(f1.astype(mm_dtype), fc2w_ref[...],
                preferred_element_type=jnp.float32) + fc2b_ref[...], 0.0)

    # ---------------- critic head (fused, one reduce per block) ---------------
    feat_ref[...] = f2.astype(feat_ref.dtype)                   # (Bb, 512)
    value_ref[...] = (jnp.sum(f2 * cw_ref[...], axis=1, keepdims=True)
                      + cb_ref[...]).astype(value_ref.dtype)    # (Bb, 1)


# ----------------------------- weight preparation -----------------------------
def prepare_params(params, board_size, matmul_dtype=MATMUL_DTYPE):
    """One-time weight re-layout + bf16 cast so the per-call forward does no
    weight transforms (banded conv weights, w-tiled biases, NHWC-permuted fc1,
    transposed fc2)."""
    _resolve_weight_pipeline_mode()        # probe Buffered(1) once, outside jit

    H = W = board_size
    C = params["conv1_w"].shape[0]
    D1 = params["fc1_w"].shape[0]
    Wp = W + 2

    def banded(conv_w_oihw):
        # Wb[kh] of shape ((W+2)*Cin, W*Cout) s.t.
        #   conv(h, w, co) = sum_kh padded_row(h+kh-1) @ Wb[kh][:, w*Cout+co]
        # with padded rows laid over lanes as (w_pad*Cin + ci); the horizontal
        # zero padding lives in lane blocks W, W+1 via the mod-(W+2) wrap.
        w_hwio = jnp.transpose(conv_w_oihw, (2, 3, 1, 0))        # (3,3,Cin,Cout)
        kw = jnp.arange(3)[:, None, None]
        wi = jnp.arange(W)[None, :, None]
        si = jnp.arange(Wp)[None, None, :]
        sel = (si == ((wi + kw - 1) % Wp)).astype(jnp.float32)   # (3, W, Wp)
        wb = jnp.einsum('aws,haic->hsiwc', sel, w_hwio)          # (3,Wp,Cin,W,Cout)
        return wb.reshape(3, Wp * w_hwio.shape[2], W * w_hwio.shape[3])

    # fc1: transpose to (in, out) and permute rows (c,h,w) -> (h,w,c) so the
    # kernel's h-major / (w*C+c)-lane activations multiply it directly.
    fc1_wt = params["fc1_w"].T.reshape(C, H, W, D1)
    fc1_wt = jnp.transpose(fc1_wt, (1, 2, 0, 3)).reshape(H * W * C, D1)

    return {
        "wb1": banded(params["conv1_w"]).astype(matmul_dtype),
        "b1t": jnp.tile(params["conv1_b"], W).reshape(1, W * C).astype(jnp.float32),
        "wb2": banded(params["conv2_w"]).astype(matmul_dtype),
        "b2t": jnp.tile(params["conv2_b"], W).reshape(1, W * C).astype(jnp.float32),
        "fc1_w": fc1_wt.astype(matmul_dtype),
        "fc1_b": params["fc1_b"].reshape(1, -1).astype(jnp.float32),
        "fc2_w": params["fc2_w"].T.astype(matmul_dtype),
        "fc2_b": params["fc2_b"].reshape(1, -1).astype(jnp.float32),
        "critic_w": params["critic_w"].reshape(1, -1).astype(jnp.float32),
        "critic_b": params["critic_b"].reshape(1, 1).astype(jnp.float32),
    }


# ----------------------------- forward pass -----------------------------------
def pomme_cnn_policy_smaller_forward(prepared, inputs_nchw, states, masks,
                                     block_b=128):
    """Mirrors PommeCNNPolicySmaller.forward (use_gru=False): (value, x, states)."""
    del masks  # only used when use_gru=True
    # TODO(synk): GRUCell branch (use_gru=True) not implemented; states pass through.
    B, Cin, H, W = inputs_nchw.shape
    C = prepared["b1t"].shape[1] // W
    WC = W * C
    D1 = prepared["fc1_w"].shape[1]
    D2 = prepared["fc2_w"].shape[1]
    mm_dtype = prepared["wb1"].dtype

    # Batch blocking: each grid step processes b_blk samples stacked on the
    # sublane (M) axis of every matmul.  Multiple of 16 keeps bf16 slabs aligned.
    assert block_b % 16 == 0
    b_blk = min(block_b, _round_up(B, 16))
    nb = -(-B // b_blk)
    Bp = nb * b_blk

    # Single layout HLO: NCHW -> (H, B, W*Cin) rows (h-major, batch-minor),
    # cast to the matmul dtype, pad batch up to a multiple of b_blk.
    x_rows = jnp.transpose(inputs_nchw, (2, 0, 3, 1)).reshape(H, B, W * Cin)
    x_rows = x_rows.astype(mm_dtype)
    if Bp != B:
        x_rows = jnp.pad(x_rows, ((0, 0), (0, Bp - B), (0, 0)))

    # Advisory cost estimate so XLA schedules around the fused call sensibly.
    macs = (H * W * C * 9 * Cin + H * W * C * 9 * C
            + H * W * C * D1 + D1 * D2 + D2)
    weight_bytes = sum(int(v.size) * v.dtype.itemsize for v in prepared.values())
    act_bytes = Bp * (H * W * Cin * x_rows.dtype.itemsize + (D2 + 1) * 4)
    cost = pl.CostEstimate(flops=2 * Bp * macs, transcendentals=0,
                           bytes_accessed=weight_bytes + act_bytes)

    value_p, feat_p = pl.pallas_call(
        fused_policy_kernel,
        out_shape=(jax.ShapeDtypeStruct((Bp, 1), jnp.float32),
                   jax.ShapeDtypeStruct((Bp, D2), jnp.float32)),
        grid=(nb,),
        in_specs=[
            pl.BlockSpec((H, b_blk, W * Cin), lambda i: (0, i, 0)),   # x block
            _const_spec(prepared["wb1"].shape),
            _const_spec((1, WC)),
            _const_spec(prepared["wb2"].shape),
            _const_spec((1, WC)),
            _const_spec(prepared["fc1_w"].shape),
            _const_spec((1, D1)),
            _const_spec(prepared["fc2_w"].shape),
            _const_spec((1, D2)),
            _const_spec((1, D2)),                                     # critic w
            _const_spec((1, 1)),                                      # critic b
        ],
        out_specs=(pl.BlockSpec((b_blk, 1), lambda i: (i, 0)),
                   pl.BlockSpec((b_blk, D2), lambda i: (i, 0))),
        scratch_shapes=[
            pltpu.VMEM(((H + 2) * b_blk, (W + 2) * Cin), mm_dtype),   # conv1 lines
            pltpu.VMEM(((H + 2) * b_blk, (W + 2) * C), mm_dtype),     # conv2 lines
        ],
        compiler_params=pltpu.CompilerParams(
            # Shard batch blocks across the two v7x TensorCores only when each
            # core gets real work; otherwise a single core avoids a duplicated
            # private weight DMA.
            dimension_semantics=(("parallel",) if nb >= 2 else ("arbitrary",)),
            vmem_limit_bytes=32 * 1024 * 1024),
        cost_estimate=cost,
    )(x_rows, prepared["wb1"], prepared["b1t"], prepared["wb2"], prepared["b2t"],
      prepared["fc1_w"], prepared["fc1_b"], prepared["fc2_w"], prepared["fc2_b"],
      prepared["critic_w"], prepared["critic_b"])

    return value_p[:B], feat_p[:B], states


# ----------------------------- params / reference -----------------------------
def init_params(key, num_inputs, num_channels, board_size):
    """Deterministic synthetic init (PyTorch-layout weights, zero biases)."""
    ks = jax.random.split(key, 5)

    def w(k, shape, scale):
        return scale * jax.random.normal(k, shape, dtype=jnp.float32)

    fc_in = num_channels * board_size * board_size
    return {
        "conv1_w": w(ks[0], (num_channels, num_inputs, 3, 3), 0.1),
        "conv1_b": jnp.zeros((num_channels,), jnp.float32),
        "conv2_w": w(ks[1], (num_channels, num_channels, 3, 3), 0.1),
        "conv2_b": jnp.zeros((num_channels,), jnp.float32),
        "fc1_w": w(ks[2], (1024, fc_in), 0.03),
        "fc1_b": jnp.zeros((1024,), jnp.float32),
        "fc2_w": w(ks[3], (512, 1024), 0.03),
        "fc2_b": jnp.zeros((512,), jnp.float32),
        "critic_w": w(ks[4], (1, 512), 0.03),
        "critic_b": jnp.zeros((1,), jnp.float32),
    }


def reference_forward(params, inputs_nchw, states, masks):
    del masks
    B = inputs_nchw.shape[0]
    dn = ("NCHW", "OIHW", "NCHW")
    x = jax.lax.conv_general_dilated(inputs_nchw, params["conv1_w"], (1, 1),
                                     "SAME", dimension_numbers=dn)
    x = jax.nn.relu(x + params["conv1_b"][None, :, None, None])
    x = jax.lax.conv_general_dilated(x, params["conv2_w"], (1, 1),
                                     "SAME", dimension_numbers=dn)
    x = jax.nn.relu(x + params["conv2_b"][None, :, None, None])
    x = x.reshape(B, -1)
    x = jax.nn.relu(x @ params["fc1_w"].T + params["fc1_b"])
    x = jax.nn.relu(x @ params["fc2_w"].T + params["fc2_b"])
    value = x @ params["critic_w"].T + params["critic_b"]
    return value, x, states


if __name__ == "__main__":
    num_inputs, board_size, num_channels = 4, 8, 16
    key = jax.random.PRNGKey(0)
    kx1, kx2, kp = jax.random.split(key, 3)

    params = init_params(kp, num_inputs, num_channels, board_size)
    prepared = prepare_params(params, board_size)   # one-time re-layout + bf16

    fwd = jax.jit(pomme_cnn_policy_smaller_forward, static_argnames=("block_b",))

    def check(batch, kx, **kw):
        inputs = jax.random.normal(
            kx, (batch, num_inputs, board_size, board_size), dtype=jnp.float32)
        states = jnp.zeros((batch, 1), jnp.float32)   # state_size == 1 (no GRU)
        masks = jnp.ones((batch, 1), jnp.float32)
        value, feat, out_states = fwd(prepared, inputs, states, masks, **kw)
        jax.block_until_ready((value, feat, out_states))
        ref_value, ref_feat, _ = reference_forward(params, inputs, states, masks)
        assert value.shape == (batch, 1) and feat.shape == (batch, 512)
        # bf16 MXU operands -> compare to the f32 reference at a loosened tol.
        assert jnp.allclose(value, ref_value, rtol=3e-2, atol=3e-2), (
            "value max err", float(jnp.max(jnp.abs(value - ref_value))))
        assert jnp.allclose(feat, ref_feat, rtol=3e-2, atol=3e-2), (
            "feat max err", float(jnp.max(jnp.abs(feat - ref_feat))))

    check(2, kx1)                    # single batch block (grid=(1,), arbitrary)
    check(40, kx2, block_b=16)       # multi-block grid + batch-padding path
    print("KERNEL_OK")
</pallas_src>

<mosaic_0001>
module attributes {stable_mosaic.version = 11 : i64} {
  func.func @_probe_kernel(%arg0: i32, %arg1: memref<8x128xf32, #tpu.memory_space<vmem>>, %arg2: memref<8x128xf32, #tpu.memory_space<vmem>>) attributes {dimension_semantics = [#tpu.dimension_semantics<arbitrary>], iteration_bounds = array<i64: 2>, scalar_prefetch = 0 : i64, scratch_operands = 0 : i64, tpu.core_type = #tpu.core_type<tc>, window_params = [{pipeline_mode = #tpu.pipeline_mode<synchronous>, transform_indices = @transform_0, window_bounds = array<i64: 8, 128>}, {pipeline_mode = #tpu.pipeline_mode<synchronous>, transform_indices = @transform_1, window_bounds = array<i64: 8, 128>}]} {
    %c0 = arith.constant 0 : index
    %c0_0 = arith.constant 0 : index
    %0 = vector.load %arg1[%c0, %c0_0] : memref<8x128xf32, #tpu.memory_space<vmem>>, vector<8x128xf32>
    %cst = arith.constant 1.000000e+00 : f32
    %1 = vector.broadcast %cst : f32 to vector<8x128xf32>
    %2 = arith.addf %0, %1 : vector<8x128xf32>
    %c0_1 = arith.constant 0 : index
    %c0_2 = arith.constant 0 : index
    %3 = vector.load %arg2[%c0_1, %c0_2] : memref<8x128xf32, #tpu.memory_space<vmem>>, vector<8x128xf32>
    tpu.vector_store %arg2[%c0_1, %c0_2], %2 {strides = array<i32>} : memref<8x128xf32, #tpu.memory_space<vmem>>, vector<8x128xf32>,
    return
  }
  func.func @transform_0(%arg0: i32) -> (i32, i32) {
    %c0_i32 = arith.constant 0 : i32
    %c0_i32_0 = arith.constant 0 : i32
    %c0_i32_1 = arith.constant 0 : i32
    return %c0_i32, %c0_i32_0 : i32, i32
  }
  func.func @transform_1(%arg0: i32) -> (i32, i32) {
    %c0_i32 = arith.constant 0 : i32
    %c0_i32_0 = arith.constant 0 : i32
    %c0_i32_1 = arith.constant 0 : i32
    return %c0_i32, %c0_i32_0 : i32, i32
  }
}

module attributes {stable_mosaic.version = 11 : i64} {
  func.func @fused_policy_kernel(%arg0: i32, %arg1: memref<8x16x32xbf16, #tpu.memory_space<vmem>>, %arg2: memref<3x40x128xbf16, #tpu.memory_space<vmem>>, %arg3: memref<1x128xf32, #tpu.memory_space<vmem>>, %arg4: memref<3x160x128xbf16, #tpu.memory_space<vmem>>, %arg5: memref<1x128xf32, #tpu.memory_space<vmem>>, %arg6: memref<1024x1024xbf16, #tpu.memory_space<vmem>>, %arg7: memref<1x1024xf32, #tpu.memory_space<vmem>>, %arg8: memref<1024x512xbf16, #tpu.memory_space<vmem>>, %arg9: memref<1x512xf32, #tpu.memory_space<vmem>>, %arg10: memref<1x512xf32, #tpu.memory_space<vmem>>, %arg11: memref<1x1xf32, #tpu.memory_space<vmem>>, %arg12: memref<16x1xf32, #tpu.memory_space<vmem>>, %arg13: memref<16x512xf32, #tpu.memory_space<vmem>>, %arg14: memref<160x40xbf16, #tpu.memory_space<vmem>>, %arg15: memref<160x160xbf16, #tpu.memory_space<vmem>>) attributes {dimension_semantics = [#tpu.dimension_semantics<arbitrary>], iteration_bounds = array<i64: 1>, scalar_prefetch = 0 : i64, scratch_operands = 2 : i64, tpu.core_type = #tpu.core_type<tc>, window_params = [{transform_indices = @transform_0, window_bounds = array<i64: 8, 16, 32>}, {pipeline_mode = #tpu.pipeline_mode<synchronous>, transform_indices = @transform_1, window_bounds = array<i64: 3, 40, 128>}, {pipeline_mode = #tpu.pipeline_mode<synchronous>, transform_indices = @transform_2, window_bounds = array<i64: 1, 128>}, {pipeline_mode = #tpu.pipeline_mode<synchronous>, transform_indices = @transform_3, window_bounds = array<i64: 3, 160, 128>}, {pipeline_mode = #tpu.pipeline_mode<synchronous>, transform_indices = @transform_4, window_bounds = array<i64: 1, 128>}, {pipeline_mode = #tpu.pipeline_mode<synchronous>, transform_indices = @transform_5, window_bounds = array<i64: 1024, 1024>}, {pipeline_mode = #tpu.pipeline_mode<synchronous>, transform_indices = @transform_6, window_bounds = array<i64: 1, 1024>}, {pipeline_mode = #tpu.pipeline_mode<synchronous>, transform_indices = @transform_7, window_bounds = array<i64: 1024, 512>}, {pipeline_mode = #tpu.pipeline_mode<synchronous>, transform_indices = @transform_8, window_bounds = array<i64: 1, 512>}, {pipeline_mode = #tpu.pipeline_mode<synchronous>, transform_indices = @transform_9, window_bounds = array<i64: 1, 512>}, {pipeline_mode = #tpu.pipeline_mode<synchronous>, transform_indices = @transform_10, window_bounds = array<i64: 1, 1>}, {transform_indices = @transform_11, window_bounds = array<i64: 16, 1>}, {transform_indices = @transform_12, window_bounds = array<i64: 16, 512>}]} {
    %cst = arith.constant 0.000000e+00 : bf16
    %0 = vector.broadcast %cst : bf16 to vector<16x40xbf16>
    %c0 = arith.constant 0 : index
    %c0_0 = arith.constant 0 : index
    %1 = vector.load %arg14[%c0, %c0_0] : memref<160x40xbf16, #tpu.memory_space<vmem>>, vector<16x40xbf16>
    tpu.vector_store %arg14[%c0, %c0_0], %0 {strides = array<i32>} : memref<160x40xbf16, #tpu.memory_space<vmem>>, vector<16x40xbf16>,
    %cst_1 = arith.constant 0.000000e+00 : bf16
    %2 = vector.broadcast %cst_1 : bf16 to vector<16x40xbf16>
    %c144 = arith.constant 144 : index
    %c0_2 = arith.constant 0 : index
    %3 = vector.load %arg14[%c144, %c0_2] : memref<160x40xbf16, #tpu.memory_space<vmem>>, vector<16x40xbf16>
    tpu.vector_store %arg14[%c144, %c0_2], %2 {strides = array<i32>} : memref<160x40xbf16, #tpu.memory_space<vmem>>, vector<16x40xbf16>,
    %cst_3 = arith.constant 0.000000e+00 : bf16
    %4 = vector.broadcast %cst_3 : bf16 to vector<160x8xbf16>
    %c0_4 = arith.constant 0 : index
    %c32 = arith.constant 32 : index
    %5 = vector.load %arg14[%c0_4, %c32] : memref<160x40xbf16, #tpu.memory_space<vmem>>, vector<160x8xbf16>
    tpu.vector_store %arg14[%c0_4, %c32], %4 {strides = array<i32>} : memref<160x40xbf16, #tpu.memory_space<vmem>>, vector<160x8xbf16>,
    %cst_5 = arith.constant 0.000000e+00 : bf16
    %6 = vector.broadcast %cst_5 : bf16 to vector<16x160xbf16>
    %c0_6 = arith.constant 0 : index
    %c0_7 = arith.constant 0 : index
    %7 = vector.load %arg15[%c0_6, %c0_7] : memref<160x160xbf16, #tpu.memory_space<vmem>>, vector<16x160xbf16>
    tpu.vector_store %arg15[%c0_6, %c0_7], %6 {strides = array<i32>} : memref<160x160xbf16, #tpu.memory_space<vmem>>, vector<16x160xbf16>,
    %cst_8 = arith.constant 0.000000e+00 : bf16
    %8 = vector.broadcast %cst_8 : bf16 to vector<16x160xbf16>
    %c144_9 = arith.constant 144 : index
    %c0_10 = arith.constant 0 : index
    %9 = vector.load %arg15[%c144_9, %c0_10] : memref<160x160xbf16, #tpu.memory_space<vmem>>, vector<16x160xbf16>
    tpu.vector_store %arg15[%c144_9, %c0_10], %8 {strides = array<i32>} : memref<160x160xbf16, #tpu.memory_space<vmem>>, vector<16x160xbf16>,
    %cst_11 = arith.constant 0.000000e+00 : bf16
    %10 = vector.broadcast %cst_11 : bf16 to vector<160x32xbf16>
    %c0_12 = arith.constant 0 : index
    %c128 = arith.constant 128 : index
    %11 = vector.load %arg15[%c0_12, %c128] : memref<160x160xbf16, #tpu.memory_space<vmem>>, vector<160x32xbf16>
    tpu.vector_store %arg15[%c0_12, %c128], %10 {strides = array<i32>} : memref<160x160xbf16, #tpu.memory_space<vmem>>, vector<160x32xbf16>,
    %c0_13 = arith.constant 0 : index
    %c0_14 = arith.constant 0 : index
    %c0_15 = arith.constant 0 : index
    %12 = vector.load %arg1[%c0_13, %c0_14, %c0_15] : memref<8x16x32xbf16, #tpu.memory_space<vmem>>, vector<1x16x32xbf16>
    %13 = vector.shape_cast %12 : vector<1x16x32xbf16> to vector<16x32xbf16>
    %c16 = arith.constant 16 : index
    %c0_16 = arith.constant 0 : index
    %14 = vector.load %arg14[%c16, %c0_16] : memref<160x40xbf16, #tpu.memory_space<vmem>>, vector<16x32xbf16>
    tpu.vector_store %arg14[%c16, %c0_16], %13 {strides = array<i32>} : memref<160x40xbf16, #tpu.memory_space<vmem>>, vector<16x32xbf16>,
    %c1 = arith.constant 1 : index
    %c0_17 = arith.constant 0 : index
    %c0_18 = arith.constant 0 : index
    %15 = vector.load %arg1[%c1, %c0_17, %c0_18] : memref<8x16x32xbf16, #tpu.memory_space<vmem>>, vector<1x16x32xbf16>
    %16 = vector.shape_cast %15 : vector<1x16x32xbf16> to vector<16x32xbf16>
    %c32_19 = arith.constant 32 : index
    %c0_20 = arith.constant 0 : index
    %17 = vector.load %arg14[%c32_19, %c0_20] : memref<160x40xbf16, #tpu.memory_space<vmem>>, vector<16x32xbf16>
    tpu.vector_store %arg14[%c32_19, %c0_20], %16 {strides = array<i32>} : memref<160x40xbf16, #tpu.memory_space<vmem>>, vector<16x32xbf16>,
    %c2 = arith.constant 2 : index
    %c0_21 = arith.constant 0 : index
    %c0_22 = arith.constant 0 : index
    %18 = vector.load %arg1[%c2, %c0_21, %c0_22] : memref<8x16x32xbf16, #tpu.memory_space<vmem>>, vector<1x16x32xbf16>
    %19 = vector.shape_cast %18 : vector<1x16x32xbf16> to vector<16x32xbf16>
    %c48 = arith.constant 48 : index
    %c0_23 = arith.constant 0 : index
    %20 = vector.load %arg14[%c48, %c0_23] : memref<160x40xbf16, #tpu.memory_space<vmem>>, vector<16x32xbf16>
    tpu.vector_store %arg14[%c48, %c0_23], %19 {strides = array<i32>} : memref<160x40xbf16, #tpu.memory_space<vmem>>, vector<16x32xbf16>,
    %c3 = arith.constant 3 : index
    %c0_24 = arith.constant 0 : index
    %c0_25 = arith.constant 0 : index
    %21 = vector.load %arg1[%c3, %c0_24, %c0_25] : memref<8x16x32xbf16, #tpu.memory_space<vmem>>, vector<1x16x32xbf16>
    %22 = vector.shape_cast %21 : vector<1x16x32xbf16> to vector<16x32xbf16>
    %c64 = arith.constant 64 : index
    %c0_26 = arith.constant 0 : index
    %23 = vector.load %arg14[%c64, %c0_26] : memref<160x40xbf16, #tpu.memory_space<vmem>>, vector<16x32xbf16>
    tpu.vector_store %arg14[%c64, %c0_26], %22 {strides = array<i32>} : memref<160x40xbf16, #tpu.memory_space<vmem>>, vector<16x32xbf16>,
    %c4 = arith.constant 4 : index
    %c0_27 = arith.constant 0 : index
    %c0_28 = arith.constant 0 : index
    %24 = vector.load %arg1[%c4, %c0_27, %c0_28] : memref<8x16x32xbf16, #tpu.memory_space<vmem>>, vector<1x16x32xbf16>
    %25 = vector.shape_cast %24 : vector<1x16x32xbf16> to vector<16x32xbf16>
    %c80 = arith.constant 80 : index
    %c0_29 = arith.constant 0 : index
    %26 = vector.load %arg14[%c80, %c0_29] : memref<160x40xbf16, #tpu.memory_space<vmem>>, vector<16x32xbf16>
    tpu.vector_store %arg14[%c80, %c0_29], %25 {strides = array<i32>} : memref<160x40xbf16, #tpu.memory_space<vmem>>, vector<16x32xbf16>,
    %c5 = arith.constant 5 : index
    %c0_30 = arith.constant 0 : index
    %c0_31 = arith.constant 0 : index
    %27 = vector.load %arg1[%c5, %c0_30, %c0_31] : memref<8x16x32xbf16, #tpu.memory_space<vmem>>, vector<1x16x32xbf16>
    %28 = vector.shape_cast %27 : vector<1x16x32xbf16> to vector<16x32xbf16>
    %c96 = arith.constant 96 : index
    %c0_32 = arith.constant 0 : index
    %29 = vector.load %arg14[%c96, %c0_32] : memref<160x40xbf16, #tpu.memory_space<vmem>>, vector<16x32xbf16>
    tpu.vector_store %arg14[%c96, %c0_32], %28 {strides = array<i32>} : memref<160x40xbf16, #tpu.memory_space<vmem>>, vector<16x32xbf16>,
    %c6 = arith.constant 6 : index
    %c0_33 = arith.constant 0 : index
    %c0_34 = arith.constant 0 : index
    %30 = vector.load %arg1[%c6, %c0_33, %c0_34] : memref<8x16x32xbf16, #tpu.memory_space<vmem>>, vector<1x16x32xbf16>
    %31 = vector.shape_cast %30 : vector<1x16x32xbf16> to vector<16x32xbf16>
    %c112 = arith.constant 112 : index
    %c0_35 = arith.constant 0 : index
    %32 = vector.load %arg14[%c112, %c0_35] : memref<160x40xbf16, #tpu.memory_space<vmem>>, vector<16x32xbf16>
    tpu.vector_store %arg14[%c112, %c0_35], %31 {strides = array<i32>} : memref<160x40xbf16, #tpu.memory_space<vmem>>, vector<16x32xbf16>,
    %c7 = arith.constant 7 : index
    %c0_36 = arith.constant 0 : index
    %c0_37 = arith.constant 0 : index
    %33 = vector.load %arg1[%c7, %c0_36, %c0_37] : memref<8x16x32xbf16, #tpu.memory_space<vmem>>, vector<1x16x32xbf16>
    %34 = vector.shape_cast %33 : vector<1x16x32xbf16> to vector<16x32xbf16>
    %c128_38 = arith.constant 128 : index
    %c0_39 = arith.constant 0 : index
    %35 = vector.load %arg14[%c128_38, %c0_39] : memref<160x40xbf16, #tpu.memory_space<vmem>>, vector<16x32xbf16>
    tpu.vector_store %arg14[%c128_38, %c0_39], %34 {strides = array<i32>} : memref<160x40xbf16, #tpu.memory_space<vmem>>, vector<16x32xbf16>,
    %c0_40 = arith.constant 0 : index
    %c0_41 = arith.constant 0 : index
    %36 = vector.load %arg14[%c0_40, %c0_41] : memref<160x40xbf16, #tpu.memory_space<vmem>>, vector<128x40xbf16>
    %c0_42 = arith.constant 0 : index
    %c0_43 = arith.constant 0 : index
    %c0_44 = arith.constant 0 : index
    %37 = vector.load %arg2[%c0_42, %c0_43, %c0_44] : memref<3x40x128xbf16, #tpu.memory_space<vmem>>, vector<1x40x128xbf16>
    %38 = vector.shape_cast %37 : vector<1x40x128xbf16> to vector<40x128xbf16>
    %cst_45 = arith.constant dense<0.000000e+00> : vector<128x128xf32>
    %39 = tpu.matmul %36, %38, %cst_45 {dimension_numbers = #tpu.dot_dimension_numbers<[1], [0], [0], [1], [0, 0, 1, 1], [], []>} : vector<128x40xbf16>, vector<40x128xbf16>, vector<128x128xf32> -> vector<128x128xf32>
    %c16_46 = arith.constant 16 : index
    %c0_47 = arith.constant 0 : index
    %40 = vector.load %arg14[%c16_46, %c0_47] : memref<160x40xbf16, #tpu.memory_space<vmem>>, vector<128x40xbf16>
    %c1_48 = arith.constant 1 : index
    %c0_49 = arith.constant 0 : index
    %c0_50 = arith.constant 0 : index
    %41 = vector.load %arg2[%c1_48, %c0_49, %c0_50] : memref<3x40x128xbf16, #tpu.memory_space<vmem>>, vector<1x40x128xbf16>
    %42 = vector.shape_cast %41 : vector<1x40x128xbf16> to vector<40x128xbf16>
    %cst_51 = arith.constant dense<0.000000e+00> : vector<128x128xf32>
    %43 = tpu.matmul %40, %42, %cst_51 {dimension_numbers = #tpu.dot_dimension_numbers<[1], [0], [0], [1], [0, 0, 1, 1], [], []>} : vector<128x40xbf16>, vector<40x128xbf16>, vector<128x128xf32> -> vector<128x128xf32>
    %44 = arith.addf %39, %43 : vector<128x128xf32>
    %c32_52 = arith.constant 32 : index
    %c0_53 = arith.constant 0 : index
    %45 = vector.load %arg14[%c32_52, %c0_53] : memref<160x40xbf16, #tpu.memory_space<vmem>>, vector<128x40xbf16>
    %c2_54 = arith.constant 2 : index
    %c0_55 = arith.constant 0 : index
    %c0_56 = arith.constant 0 : index
    %46 = vector.load %arg2[%c2_54, %c0_55, %c0_56] : memref<3x40x128xbf16, #tpu.memory_space<vmem>>, vector<1x40x128xbf16>
    %47 = vector.shape_cast %46 : vector<1x40x128xbf16> to vector<40x128xbf16>
    %cst_57 = arith.constant dense<0.000000e+00> : vector<128x128xf32>
    %48 = tpu.matmul %45, %47, %cst_57 {dimension_numbers = #tpu.dot_dimension_numbers<[1], [0], [0], [1], [0, 0, 1, 1], [], []>} : vector<128x40xbf16>, vector<40x128xbf16>, vector<128x128xf32> -> vector<128x128xf32>
    %49 = arith.addf %44, %48 : vector<128x128xf32>
    %c0_58 = arith.constant 0 : index
    %c0_59 = arith.constant 0 : index
    %50 = vector.load %arg3[%c0_58, %c0_59] : memref<1x128xf32, #tpu.memory_space<vmem>>, vector<1x128xf32>
    %51 = vector.broadcast %50 : vector<1x128xf32> to vector<128x128xf32>
    %52 = arith.addf %49, %51 : vector<128x128xf32>
    %cst_60 = arith.constant 0.000000e+00 : f32
    %53 = vector.broadcast %cst_60 : f32 to vector<128x128xf32>
    %54 = arith.maximumf %52, %53 : vector<128x128xf32>
    %55 = arith.truncf %54 : vector<128x128xf32> to vector<128x128xbf16>
    %c16_61 = arith.constant 16 : index
    %c0_62 = arith.constant 0 : index
    %56 = vector.load %arg15[%c16_61, %c0_62] : memref<160x160xbf16, #tpu.memory_space<vmem>>, vector<128x128xbf16>
    tpu.vector_store %arg15[%c16_61, %c0_62], %55 {strides = array<i32>} : memref<160x160xbf16, #tpu.memory_space<vmem>>, vector<128x128xbf16>,
    %c0_63 = arith.constant 0 : index
    %c0_64 = arith.constant 0 : index
    %57 = vector.load %arg15[%c0_63, %c0_64] : memref<160x160xbf16, #tpu.memory_space<vmem>>, vector<128x160xbf16>
    %c0_65 = arith.constant 0 : index
    %c0_66 = arith.constant 0 : index
    %c0_67 = arith.constant 0 : index
    %58 = vector.load %arg4[%c0_65, %c0_66, %c0_67] : memref<3x160x128xbf16, #tpu.memory_space<vmem>>, vector<1x160x128xbf16>
    %59 = vector.shape_cast %58 : vector<1x160x128xbf16> to vector<160x128xbf16>
    %cst_68 = arith.constant dense<0.000000e+00> : vector<128x128xf32>
    %60 = tpu.matmul %57, %59, %cst_68 {dimension_numbers = #tpu.dot_dimension_numbers<[1], [0], [0], [1], [0, 0, 1, 1], [], []>} : vector<128x160xbf16>, vector<160x128xbf16>, vector<128x128xf32> -> vector<128x128xf32>
    %c16_69 = arith.constant 16 : index
    %c0_70 = arith.constant 0 : index
    %61 = vector.load %arg15[%c16_69, %c0_70] : memref<160x160xbf16, #tpu.memory_space<vmem>>, vector<128x160xbf16>
    %c1_71 = arith.constant 1 : index
    %c0_72 = arith.constant 0 : index
    %c0_73 = arith.constant 0 : index
    %62 = vector.load %arg4[%c1_71, %c0_72, %c0_73] : memref<3x160x128xbf16, #tpu.memory_space<vmem>>, vector<1x160x128xbf16>
    %63 = vector.shape_cast %62 : vector<1x160x128xbf16> to vector<160x128xbf16>
    %cst_74 = arith.constant dense<0.000000e+00> : vector<128x128xf32>
    %64 = tpu.matmul %61, %63, %cst_74 {dimension_numbers = #tpu.dot_dimension_numbers<[1], [0], [0], [1], [0, 0, 1, 1], [], []>} : vector<128x160xbf16>, vector<160x128xbf16>, vector<128x128xf32> -> vector<128x128xf32>
    %65 = arith.addf %60, %64 : vector<128x128xf32>
    %c32_75 = arith.constant 32 : index
    %c0_76 = arith.constant 0 : index
    %66 = vector.load %arg15[%c32_75, %c0_76] : memref<160x160xbf16, #tpu.memory_space<vmem>>, vector<128x160xbf16>
    %c2_77 = arith.constant 2 : index
    %c0_78 = arith.constant 0 : index
    %c0_79 = arith.constant 0 : index
    %67 = vector.load %arg4[%c2_77, %c0_78, %c0_79] : memref<3x160x128xbf16, #tpu.memory_space<vmem>>, vector<1x160x128xbf16>
    %68 = vector.shape_cast %67 : vector<1x160x128xbf16> to vector<160x128xbf16>
    %cst_80 = arith.constant dense<0.000000e+00> : vector<128x128xf32>
    %69 = tpu.matmul %66, %68, %cst_80 {dimension_numbers = #tpu.dot_dimension_numbers<[1], [0], [0], [1], [0, 0, 1, 1], [], []>} : vector<128x160xbf16>, vector<160x128xbf16>, vector<128x128xf32> -> vector<128x128xf32>
    %70 = arith.addf %65, %69 : vector<128x128xf32>
    %c0_81 = arith.constant 0 : index
    %c0_82 = arith.constant 0 : index
    %71 = vector.load %arg5[%c0_81, %c0_82] : memref<1x128xf32, #tpu.memory_space<vmem>>, vector<1x128xf32>
    %72 = vector.broadcast %71 : vector<1x128xf32> to vector<128x128xf32>
    %73 = arith.addf %70, %72 : vector<128x128xf32>
    %cst_83 = arith.constant 0.000000e+00 : f32
    %74 = vector.broadcast %cst_83 : f32 to vector<128x128xf32>
    %75 = arith.maximumf %73, %74 : vector<128x128xf32>
    %76 = arith.truncf %75 : vector<128x128xf32> to vector<128x128xbf16>
    %77 = vector.extract_strided_slice %76 {offsets = [0, 0], sizes = [16, 128], strides = [1, 1]} : vector<128x128xbf16> to vector<16x128xbf16>
    %c0_84 = arith.constant 0 : index
    %c0_85 = arith.constant 0 : index
    %78 = vector.load %arg6[%c0_84, %c0_85] : memref<1024x1024xbf16, #tpu.memory_space<vmem>>, vector<128x1024xbf16>
    %cst_86 = arith.constant dense<0.000000e+00> : vector<16x1024xf32>
    %79 = tpu.matmul %77, %78, %cst_86 {dimension_numbers = #tpu.dot_dimension_numbers<[1], [0], [0], [1], [0, 0, 1, 1], [], []>} : vector<16x128xbf16>, vector<128x1024xbf16>, vector<16x1024xf32> -> vector<16x1024xf32>
    %80 = vector.extract_strided_slice %76 {offsets = [16, 0], sizes = [16, 128], strides = [1, 1]} : vector<128x128xbf16> to vector<16x128xbf16>
    %c128_87 = arith.constant 128 : index
    %c0_88 = arith.constant 0 : index
    %81 = vector.load %arg6[%c128_87, %c0_88] : memref<1024x1024xbf16, #tpu.memory_space<vmem>>, vector<128x1024xbf16>
    %cst_89 = arith.constant dense<0.000000e+00> : vector<16x1024xf32>
    %82 = tpu.matmul %80, %81, %cst_89 {dimension_numbers = #tpu.dot_dimension_numbers<[1], [0], [0], [1], [0, 0, 1, 1], [], []>} : vector<16x128xbf16>, vector<128x1024xbf16>, vector<16x1024xf32> -> vector<16x1024xf32>
    %83 = vector.extract_strided_slice %76 {offsets = [32, 0], sizes = [16, 128], strides = [1, 1]} : vector<128x128xbf16> to vector<16x128xbf16>
    %c256 = arith.constant 256 : index
    %c0_90 = arith.constant 0 : index
    %84 = vector.load %arg6[%c256, %c0_90] : memref<1024x1024xbf16, #tpu.memory_space<vmem>>, vector<128x1024xbf16>
    %cst_91 = arith.constant dense<0.000000e+00> : vector<16x1024xf32>
    %85 = tpu.matmul %83, %84, %cst_91 {dimension_numbers = #tpu.dot_dimension_numbers<[1], [0], [0], [1], [0, 0, 1, 1], [], []>} : vector<16x128xbf16>, vector<128x1024xbf16>, vector<16x1024xf32> -> vector<16x1024xf32>
    %86 = arith.addf %79, %85 : vector<16x1024xf32>
    %87 = vector.extract_strided_slice %76 {offsets = [48, 0], sizes = [16, 128], strides = [1, 1]} : vector<128x128xbf16> to vector<16x128xbf16>
    %c384 = arith.constant 384 : index
    %c0_92 = arith.constant 0 : index
    %88 = vector.load %arg6[%c384, %c0_92] : memref<1024x1024xbf16, #tpu.memory_space<vmem>>, vector<128x1024xbf16>
    %cst_93 = arith.constant dense<0.000000e+00> : vector<16x1024xf32>
    %89 = tpu.matmul %87, %88, %cst_93 {dimension_numbers = #tpu.dot_dimension_numbers<[1], [0], [0], [1], [0, 0, 1, 1], [], []>} : vector<16x128xbf16>, vector<128x1024xbf16>, vector<16x1024xf32> -> vector<16x1024xf32>
    %90 = arith.addf %82, %89 : vector<16x1024xf32>
    %91 = vector.extract_strided_slice %76 {offsets = [64, 0], sizes = [16, 128], strides = [1, 1]} : vector<128x128xbf16> to vector<16x128xbf16>
    %c512 = arith.constant 512 : index
    %c0_94 = arith.constant 0 : index
    %92 = vector.load %arg6[%c512, %c0_94] : memref<1024x1024xbf16, #tpu.memory_space<vmem>>, vector<128x1024xbf16>
    %cst_95 = arith.constant dense<0.000000e+00> : vector<16x1024xf32>
    %93 = tpu.matmul %91, %92, %cst_95 {dimension_numbers = #tpu.dot_dimension_numbers<[1], [0], [0], [1], [0, 0, 1, 1], [], []>} : vector<16x128xbf16>, vector<128x1024xbf16>, vector<16x1024xf32> -> vector<16x1024xf32>
    %94 = arith.addf %86, %93 : vector<16x1024xf32>
    %95 = vector.extract_strided_slice %76 {offsets = [80, 0], sizes = [16, 128], strides = [1, 1]} : vector<128x128xbf16> to vector<16x128xbf16>
    %c640 = arith.constant 640 : index
    %c0_96 = arith.constant 0 : index
    %96 = vector.load %arg6[%c640, %c0_96] : memref<1024x1024xbf16, #tpu.memory_space<vmem>>, vector<128x1024xbf16>
    %cst_97 = arith.constant dense<0.000000e+00> : vector<16x1024xf32>
    %97 = tpu.matmul %95, %96, %cst_97 {dimension_numbers = #tpu.dot_dimension_numbers<[1], [0], [0], [1], [0, 0, 1, 1], [], []>} : vector<16x128xbf16>, vector<128x1024xbf16>, vector<16x1024xf32> -> vector<16x1024xf32>
    %98 = arith.addf %90, %97 : vector<16x1024xf32>
    %99 = vector.extract_strided_slice %76 {offsets = [96, 0], sizes = [16, 128], strides = [1, 1]} : vector<128x128xbf16> to vector<16x128xbf16>
    %c768 = arith.constant 768 : index
    %c0_98 = arith.constant 0 : index
    %100 = vector.load %arg6[%c768, %c0_98] : memref<1024x1024xbf16, #tpu.memory_space<vmem>>, vector<128x1024xbf16>
    %cst_99 = arith.constant dense<0.000000e+00> : vector<16x1024xf32>
    %101 = tpu.matmul %99, %100, %cst_99 {dimension_numbers = #tpu.dot_dimension_numbers<[1], [0], [0], [1], [0, 0, 1, 1], [], []>} : vector<16x128xbf16>, vector<128x1024xbf16>, vector<16x1024xf32> -> vector<16x1024xf32>
    %102 = arith.addf %94, %101 : vector<16x1024xf32>
    %103 = vector.extract_strided_slice %76 {offsets = [112, 0], sizes = [16, 128], strides = [1, 1]} : vector<128x128xbf16> to vector<16x128xbf16>
    %c896 = arith.constant 896 : index
    %c0_100 = arith.constant 0 : index
    %104 = vector.load %arg6[%c896, %c0_100] : memref<1024x1024xbf16, #tpu.memory_space<vmem>>, vector<128x1024xbf16>
    %cst_101 = arith.constant dense<0.000000e+00> : vector<16x1024xf32>
    %105 = tpu.matmul %103, %104, %cst_101 {dimension_numbers = #tpu.dot_dimension_numbers<[1], [0], [0], [1], [0, 0, 1, 1], [], []>} : vector<16x128xbf16>, vector<128x1024xbf16>, vector<16x1024xf32> -> vector<16x1024xf32>
    %106 = arith.addf %98, %105 : vector<16x1024xf32>
    %107 = arith.addf %102, %106 : vector<16x1024xf32>
    %c0_102 = arith.constant 0 : index
    %c0_103 = arith.constant 0 : index
    %108 = vector.load %arg7[%c0_102, %c0_103] : memref<1x1024xf32, #tpu.memory_space<vmem>>, vector<1x1024xf32>
    %109 = vector.broadcast %108 : vector<1x1024xf32> to vector<16x1024xf32>
    %110 = arith.addf %107, %109 : vector<16x1024xf32>
    %cst_104 = arith.constant 0.000000e+00 : f32
    %111 = vector.broadcast %cst_104 : f32 to vector<16x1024xf32>
    %112 = arith.maximumf %110, %111 : vector<16x1024xf32>
    %113 = arith.truncf %112 : vector<16x1024xf32> to vector<16x1024xbf16>
    %c0_105 = arith.constant 0 : index
    %c0_106 = arith.constant 0 : index
    %114 = vector.load %arg8[%c0_105, %c0_106] : memref<1024x512xbf16, #tpu.memory_space<vmem>>, vector<1024x512xbf16>
    %cst_107 = arith.constant dense<0.000000e+00> : vector<16x512xf32>
    %115 = tpu.matmul %113, %114, %cst_107 {dimension_numbers = #tpu.dot_dimension_numbers<[1], [0], [0], [1], [0, 0, 1, 1], [], []>} : vector<16x1024xbf16>, vector<1024x512xbf16>, vector<16x512xf32> -> vector<16x512xf32>
    %c0_108 = arith.constant 0 : index
    %c0_109 = arith.constant 0 : index
    %116 = vector.load %arg9[%c0_108, %c0_109] : memref<1x512xf32, #tpu.memory_space<vmem>>, vector<1x512xf32>
    %117 = vector.broadcast %116 : vector<1x512xf32> to vector<16x512xf32>
    %118 = arith.addf %115, %117 : vector<16x512xf32>
    %cst_110 = arith.constant 0.000000e+00 : f32
    %119 = vector.broadcast %cst_110 : f32 to vector<16x512xf32>
    %120 = arith.maximumf %118, %119 : vector<16x512xf32>
    %c0_111 = arith.constant 0 : index
    %c0_112 = arith.constant 0 : index
    %121 = vector.load %arg13[%c0_111, %c0_112] : memref<16x512xf32, #tpu.memory_space<vmem>>, vector<16x512xf32>
    tpu.vector_store %arg13[%c0_111, %c0_112], %120 {strides = array<i32>} : memref<16x512xf32, #tpu.memory_space<vmem>>, vector<16x512xf32>,
    %c0_113 = arith.constant 0 : index
    %c0_114 = arith.constant 0 : index
    %122 = vector.load %arg10[%c0_113, %c0_114] : memref<1x512xf32, #tpu.memory_space<vmem>>, vector<1x512xf32>
    %123 = vector.broadcast %122 : vector<1x512xf32> to vector<16x512xf32>
    %124 = arith.mulf %120, %123 : vector<16x512xf32>
    %cst_115 = arith.constant dense<0.000000e+00> : vector<16xf32>
    %125 = vector.multi_reduction <add>, %124, %cst_115 [1] : vector<16x512xf32> to vector<16xf32>
    %126 = vector.shape_cast %125 : vector<16xf32> to vector<16x1xf32>
    %c0_116 = arith.constant 0 : index
    %c0_117 = arith.constant 0 : index
    %127 = vector.load %arg11[%c0_116, %c0_117] : memref<1x1xf32, #tpu.memory_space<vmem>>, vector<1x1xf32>
    %128 = vector.broadcast %127 : vector<1x1xf32> to vector<16x1xf32>
    %129 = arith.addf %126, %128 : vector<16x1xf32>
    %c0_118 = arith.constant 0 : index
    %c0_119 = arith.constant 0 : index
    %130 = vector.load %arg12[%c0_118, %c0_119] : memref<16x1xf32, #tpu.memory_space<vmem>>, vector<16x1xf32>
    tpu.vector_store %arg12[%c0_118, %c0_119], %129 {strides = array<i32>} : memref<16x1xf32, #tpu.memory_space<vmem>>, vector<16x1xf32>,
    return
  }
  func.func @transform_0(%arg0: i32) -> (i32, i32, i32) {
    %c0_i32 = arith.constant 0 : i32
    %c0_i32_0 = arith.constant 0 : i32
    %c0_i32_1 = arith.constant 0 : i32
    return %c0_i32, %arg0, %c0_i32_0 : i32, i32, i32
  }
  func.func @transform_1(%arg0: i32) -> (i32, i32, i32) {
    %c0_i32 = arith.constant 0 : i32
    %c0_i32_0 = arith.constant 0 : i32
    %c0_i32_1 = arith.constant 0 : i32
    %c0_i32_2 = arith.constant 0 : i32
    return %c0_i32, %c0_i32_0, %c0_i32_1 : i32, i32, i32
  }
  func.func @transform_2(%arg0: i32) -> (i32, i32) {
    %c0_i32 = arith.constant 0 : i32
    %c0_i32_0 = arith.constant 0 : i32
    %c0_i32_1 = arith.constant 0 : i32
    return %c0_i32, %c0_i32_0 : i32, i32
  }
  func.func @transform_3(%arg0: i32) -> (i32, i32, i32) {
    %c0_i32 = arith.constant 0 : i32
    %c0_i32_0 = arith.constant 0 : i32
    %c0_i32_1 = arith.constant 0 : i32
    %c0_i32_2 = arith.constant 0 : i32
    return %c0_i32, %c0_i32_0, %c0_i32_1 : i32, i32, i32
  }
  func.func @transform_4(%arg0: i32) -> (i32, i32) {
    %c0_i32 = arith.constant 0 : i32
    %c0_i32_0 = arith.constant 0 : i32
    %c0_i32_1 = arith.constant 0 : i32
    return %c0_i32, %c0_i32_0 : i32, i32
  }
  func.func @transform_5(%arg0: i32) -> (i32, i32) {
    %c0_i32 = arith.constant 0 : i32
    %c0_i32_0 = arith.constant 0 : i32
    %c0_i32_1 = arith.constant 0 : i32
    return %c0_i32, %c0_i32_0 : i32, i32
  }
  func.func @transform_6(%arg0: i32) -> (i32, i32) {
    %c0_i32 = arith.constant 0 : i32
    %c0_i32_0 = arith.constant 0 : i32
    %c0_i32_1 = arith.constant 0 : i32
    return %c0_i32, %c0_i32_0 : i32, i32
  }
  func.func @transform_7(%arg0: i32) -> (i32, i32) {
    %c0_i32 = arith.constant 0 : i32
    %c0_i32_0 = arith.constant 0 : i32
    %c0_i32_1 = arith.constant 0 : i32
    return %c0_i32, %c0_i32_0 : i32, i32
  }
  func.func @transform_8(%arg0: i32) -> (i32, i32) {
    %c0_i32 = arith.constant 0 : i32
    %c0_i32_0 = arith.constant 0 : i32
    %c0_i32_1 = arith.constant 0 : i32
    return %c0_i32, %c0_i32_0 : i32, i32
  }
  func.func @transform_9(%arg0: i32) -> (i32, i32) {
    %c0_i32 = arith.constant 0 : i32
    %c0_i32_0 = arith.constant 0 : i32
    %c0_i32_1 = arith.constant 0 : i32
    return %c0_i32, %c0_i32_0 : i32, i32
  }
  func.func @transform_10(%arg0: i32) -> (i32, i32) {
    %c0_i32 = arith.constant 0 : i32
    %c0_i32_0 = arith.constant 0 : i32
    %c0_i32_1 = arith.constant 0 : i32
    return %c0_i32, %c0_i32_0 : i32, i32
  }
  func.func @transform_11(%arg0: i32) -> (i32, i32) {
    %c0_i32 = arith.constant 0 : i32
    %c0_i32_0 = arith.constant 0 : i32
    return %arg0, %c0_i32 : i32, i32
  }
  func.func @transform_12(%arg0: i32) -> (i32, i32) {
    %c0_i32 = arith.constant 0 : i32
    %c0_i32_0 = arith.constant 0 : i32
    return %arg0, %c0_i32 : i32, i32
  }
}

</mosaic_0001>

<bundles_post_ra>
// kernel: tpu_custom_call.1
= control target key start
LH: loop header
LB: loop body
LE: loop exit
PB: predicated region body
PF: predicated region fallthrough
CT: control target
= control target key end

     0   :  { %6 = vsyncpa [#allocation3], 0  ;;  %s341_s0 = inlined_call_operand.hbm [shape: f32[8,128], index: 0, kind: input, shape index: {}]   ;;  %s342_s1 = inlined_call_operand.hbm [shape: f32[8,128], index: 1, kind: output, shape index: {}]  }
   0x1   :  { %7 = vsyncpa [#allocation4], 0  ;;  %s262_s6 = smov 0  }
   0x2 LB: > { %s145_s7 = sadd.s32 4294967295, %s248_s6   ;;  %p146_p0 = scmp.ge.s32.totalorder %s248_s6, 1  ;;  %s248_s6 = sphi %s262_s6, %s13_s6  }
   0x3   : > { %p60_p1 = scmp.lt.s32.totalorder %s248_s6, 3  ;;  %p276_p3 = scmp.eq.s32.totalorder %s145_s7, 0 }
   0x4   : > { %s250_s10 = smov [#allocation2]   ;;  %s180_s15 = scalar_lea.hbm %s341_s0, 128 }
   0x5   : > { %p270_p2 = pnand %p146_p0, %p60_p1  ;;  %s73_s11 = sshll.u32 %s250_s10, 4  ;;  %s74_s11 = int_to_ptr.vmem [resolvable:$true] %s73_s11 }
   0x6   : > { %s347_s9 = scalar_select %p276_p3, 1, 0 }
   0x7   : > { %s346_s8 = scalar_select %p270_p2, 1, 0 }
   0x8   : > { %p162_p4 = pneg %p270_p2  ;;  %p181_p6 = scmp.ne.s32.totalorder %s341_s0, %s180_s15 }
   0x9   : > { %p187_p10 = scmp.lt.u32.totalorder %s180_s15, %s341_s0 }
   0xa   : > { %p284_p5 = pnand %p276_p3, %p162_p4 }
   0xc   : > { %p182_p7 = pneg %p284_p5 }
   0xe   : > { %p183_p8 = pnand %p182_p7, %p181_p6 }
  0x10   : > { %p184_p9 = pneg %p183_p8 }
  0x12   : > { %p189_p11 = pnand %p187_p10, %p184_p9 }
  0x14   : > { %192 = shalt.err (!%p189_p11)
}
  0x15   : > { %s193_s20 = scalar_lea.vmem %s74_s11, 128  ;;  %p201_p1 = scmp.lt.s32.totalorder %s74_s11, %s74_s11 }
  0x16   : > { %p194_p12 = scmp.ne.s32.totalorder %s74_s11, %s193_s20  ;;  %p202_p4 = scmp.lt.s32.totalorder %s193_s20, %s193_s20 }
  0x18   : > { %p196_p13 = pnand %p194_p12, %p182_p7  ;;  %p203_p3 = por %p202_p4, %p201_p1 }
  0x1a   : > { %p197_p0 = pneg %p196_p13 }
  0x1c   : > { %p204_p2 = pnand %p203_p3, %p197_p0 }
  0x1e   : > { %207 = shalt.err (!%p204_p2)
}
  0x1f   : > { %165 = dma.hbm_to_vmem [thread:$0]  (!%p284_p5), %s341_s0, 128, %s74_s11, [#allocation3]  }
  0x20   : > { %p349_p6 = scmp.ne.s32.totalorder %s346_s8, 0 }
  0x21   : > { %p350_p8 = scmp.ne.s32.totalorder (!%p349_p6), %s347_s9, 0 }
  0x22   : > { %86 = sbr.rel (%p349_p6) target bundleno = 67 (0x43), region = 24 }
  0x29   : > { %239 = dma.done.wait (%p350_p8), [#allocation3], 128  }
  0x2a   : > { %241 = vsyncadd (%p350_p8), [#allocation3], 4294967168  ;;  %s251_s23 = smov [#allocation5]   ;;  %v96_v0 = vld [vmem:[#allocation2] sm:$0xff]  ;;  %p312_p2 = scmp.eq.s32.totalorder %s145_s7, 1 }
  0x2b   : > { %s106_s24 = sshll.u32 %s251_s23, 4  ;;  %v97_v1 = vadd.f32 1.0, %v96_v0  ;;  %s107_s24 = int_to_ptr.vmem [resolvable:$true] %s106_s24 }
  0x2c   : > { %s208_s26 = scalar_lea.vmem %s107_s24, 128  ;;  %p215_p9 = scmp.lt.s32.totalorder %s107_s24, %s107_s24 }
  0x2d   : > { %98 = vst [vmem:[#allocation5] sm:$0xff] %v97_v1  ;;  %p209_p3 = scmp.ne.s32.totalorder %s107_s24, %s208_s26  ;;  %p216_p10 = scmp.lt.s32.totalorder %s208_s26, %s208_s26 }
  0x2f   : > { %p210_p5 = pnand %p209_p3, %p312_p2  ;;  %p217_p11 = por %p216_p10, %p215_p9 }
  0x31   : > { %p211_p7 = pneg %p210_p5 }
  0x33   : > { %p218_p12 = pnand %p217_p11, %p211_p7 }
  0x35   : > { %221 = shalt.err (!%p218_p12)
}
  0x36   : > { %s222_s29 = scalar_lea.hbm %s342_s1, 128 }
  0x37   : > { %p223_p13 = scmp.ne.s32.totalorder %s342_s1, %s222_s29  ;;  %p228_p4 = scmp.lt.u32.totalorder %s222_s29, %s342_s1 }
  0x39   : > { %p224_p0 = pnand %p223_p13, %p312_p2 }
  0x3b   : > { %p225_p1 = pneg %p224_p0 }
  0x3d   : > { %p230_p6 = pnand %p228_p4, %p225_p1 }
  0x3f   : > { %233 = shalt.err (!%p230_p6)
}
  0x40   : > { %159 = dma.vmem_to_hbm [thread:$0]  (%p312_p2), %s107_s24, 128, %s342_s1, [#allocation4]  }
  0x41   : > { %243 = dma.done.wait (%p312_p2), [#allocation4], 128  }
  0x42   : > { %245 = vsyncadd (%p312_p2), [#allocation4], 4294967168 }
  0x43 PF: > { %s13_s6 = sadd.s32 1, %s248_s6  }
  0x44   : > { %p10_p8 = scmp.ge.s32.totalorder %s13_s6, 4  }
  0x46   :  { %12 = sbr.rel (!%p10_p8) target bundleno = 2 (0x2), region = 53 }
  0x4d   :  { %119 = vsyncpa [#allocation3], 1 }
  0x4e   :  { %121 = vsyncpa [#allocation3 + $0x1], 1 }
  0x4f   :  { %122 = vsyncpa [#allocation4], 1 }
  0x50   :  { %124 = vsyncpa [#allocation4 + $0x1], 1 }

// kernel: pomme_cnn_policy_smaller_forward.1
= control target key start
LH: loop header
LB: loop body
LE: loop exit
PB: predicated region body
PF: predicated region fallthrough
CT: control target
= control target key end

     0   :  { %s10601_s0 = inlined_call_operand.vmem [shape: bf16[8,16,32], index: 0, kind: input, shape index: {}]   ;;  %s10602_s1 = inlined_call_operand.hbm [shape: bf16[3,40,128], index: 1, kind: input, shape index: {}]   ;;  %s10603_s2 = inlined_call_operand.hbm [shape: f32[1,128], index: 2, kind: input, shape index: {}]   ;;  %s10604_s3 = inlined_call_operand.hbm [shape: bf16[3,160,128], index: 3, kind: input, shape index: {}]   ;;  %s10605_s4 = inlined_call_operand.hbm [shape: f32[1,128], index: 4, kind: input, shape index: {}]   ;;  %s10606_s5 = inlined_call_operand.hbm [shape: bf16[1024,1024], index: 5, kind: input, shape index: {}]   ;;  %s10607_s6 = inlined_call_operand.hbm [shape: f32[1,1024], index: 6, kind: input, shape index: {}]   ;;  %s10608_s7 = inlined_call_operand.hbm [shape: bf16[1024,512], index: 7, kind: input, shape index: {}]   ;;  %s10609_s8 = inlined_call_operand.hbm [shape: f32[1,512], index: 8, kind: input, shape index: {}]   ;;  %s10610_s9 = inlined_call_operand.hbm [shape: f32[1,512], index: 9, kind: input, shape index: {}]   ;;  %s10611_s10 = inlined_call_operand.<no memory space> [shape: f32[1,1], index: 10, kind: input, shape index: {}]   ;;  %s10612_s11 = inlined_call_operand.vmem [shape: f32[16,1], index: 11, kind: output, shape index: {0}]   ;;  %s10613_s12 = inlined_call_operand.vmem [shape: f32[16,512], index: 12, kind: output, shape index: {1}]  }
   0x1   :  { %v18_v0 = vstv %s10611_s10 }
   0x2   :  { %19 = vst [vmem:[#allocation4] sm:$0x1] %v18_v0 }
   0x3   :  { %20 = vsyncpa [#allocation6], 0 }
   0x4   :  { %21 = vsyncpa [#allocation8], 0 }
   0x5   :  { %22 = vsyncpa [#allocation11], 0 }
   0x6   :  { %23 = vsyncpa [#allocation14], 0 }
   0x7   :  { %24 = vsyncpa [#allocation17], 0  ;;  %s9856_s23 = smov [#allocation7]   ;;  %s9857_s25 = smov [#allocation10]  }
   0x8   :  { %s45_s24 = sshll.u32 %s9856_s23, 4  ;;  %s67_s26 = sshll.u32 %s9857_s25, 4  ;;  %s46_s24 = int_to_ptr.vmem [resolvable:$true] %s45_s24  ;;  %s68_s26 = int_to_ptr.vmem [resolvable:$true] %s67_s26 }
   0x9   :  { %s9648_s29 = scalar_lea.hbm %s10603_s2, 16 }
   0xa   :  { %p9649_p0 = scmp.ne.s32.totalorder %s10603_s2, %s9648_s29  ;;  %p9652_p1 = scmp.lt.u32.totalorder %s9648_s29, %s10603_s2 }
   0xc   :  { %p9654_p2 = pnand %p9652_p1, %p9649_p0 }
   0xe   :  { %9657 = shalt.err (!%p9654_p2)
}
   0xf   :  { %s9658_s15 = scalar_lea.vmem %s46_s24, 16  ;;  %s9662_s16 = scalar_lea.vmem %s46_s24, 32 }
  0x10   :  { %p9659_p3 = scmp.ne.s32.totalorder %s46_s24, %s9658_s15  ;;  %p9663_p4 = scmp.lt.s32.totalorder %s46_s24, %s46_s24 }
  0x11   :  { %p9664_p5 = scmp.lt.s32.totalorder %s9662_s16, %s9658_s15 }
  0x13   :  { %p9665_p6 = por %p9664_p5, %p9663_p4 }
  0x15   :  { %p9666_p7 = pnand %p9665_p6, %p9659_p3 }
  0x17   :  { %9669 = shalt.err (!%p9666_p7)
}
  0x18   :  { %48 = dma.hbm_to_vmem [thread:$0]  %s10603_s2, 16, %s46_s24, [#allocation8]  }
  0x19   :  { %s9670_s21 = scalar_lea.hbm %s10605_s4, 16 }
  0x1a   :  { %p9671_p8 = scmp.ne.s32.totalorder %s10605_s4, %s9670_s21  ;;  %p9674_p9 = scmp.lt.u32.totalorder %s9670_s21, %s10605_s4 }
  0x1c   :  { %p9676_p10 = pnand %p9674_p9, %p9671_p8 }
  0x1e   :  { %9679 = shalt.err (!%p9676_p10)
}
  0x1f   :  { %s9680_s28 = scalar_lea.vmem %s68_s26, 16  ;;  %s9684_s29 = scalar_lea.vmem %s68_s26, 32 }
  0x20   :  { %p9681_p11 = scmp.ne.s32.totalorder %s68_s26, %s9680_s28  ;;  %p9685_p12 = scmp.lt.s32.totalorder %s68_s26, %s68_s26 }
  0x21   :  { %p9686_p13 = scmp.lt.s32.totalorder %s9684_s29, %s9680_s28 }
  0x23   :  { %p9687_p0 = por %p9686_p13, %p9685_p12 }
  0x25   :  { %p9688_p1 = pnand %p9687_p0, %p9681_p11 }
  0x27   :  { %9691 = shalt.err (!%p9688_p1)
}
  0x28   :  { %70 = dma.hbm_to_vmem [thread:$0]  %s10605_s4, 16, %s68_s26, [#allocation11]  }
  0x29   :  { %s9858_s30 = smov [#allocation13]   ;;  %s9859_s10 = smov [#allocation16]  }
  0x2a   :  { %s89_s13 = sshll.u32 %s9858_s30, 4  ;;  %s111_s14 = sshll.u32 %s9859_s10, 4  ;;  %s90_s13 = int_to_ptr.vmem [resolvable:$true] %s89_s13  ;;  %s112_s14 = int_to_ptr.vmem [resolvable:$true] %s111_s14 }
  0x2b   :  { %s9692_s17 = scalar_lea.hbm %s10607_s6, 128 }
  0x2c   :  { %p9693_p2 = scmp.ne.s32.totalorder %s10607_s6, %s9692_s17  ;;  %p9696_p3 = scmp.lt.u32.totalorder %s9692_s17, %s10607_s6 }
  0x2e   :  { %p9698_p4 = pnand %p9696_p3, %p9693_p2 }
  0x30   :  { %9701 = shalt.err (!%p9698_p4)
}
  0x31   :  { %s9702_s4 = scalar_lea.vmem %s90_s13, 128  ;;  %p9707_p6 = scmp.lt.s32.totalorder %s90_s13, %s90_s13 }
  0x32   :  { %p9703_p5 = scmp.ne.s32.totalorder %s90_s13, %s9702_s4  ;;  %p9708_p7 = scmp.lt.s32.totalorder %s9702_s4, %s9702_s4 }
  0x34   :  { %p9709_p8 = por %p9708_p7, %p9707_p6 }
  0x36   :  { %p9710_p9 = pnand %p9709_p8, %p9703_p5 }
  0x38   :  { %9713 = shalt.err (!%p9710_p9)
}
  0x39   :  { %92 = dma.hbm_to_vmem [thread:$0]  %s10607_s6, 128, %s90_s13, [#allocation14]  }
  0x3a   :  { %s9714_s27 = scalar_lea.hbm %s10609_s8, 64 }
  0x3b   :  { %p9715_p10 = scmp.ne.s32.totalorder %s10609_s8, %s9714_s27  ;;  %p9718_p11 = scmp.lt.u32.totalorder %s9714_s27, %s10609_s8 }
  0x3d   :  { %p9720_p12 = pnand %p9718_p11, %p9715_p10 }
  0x3f   :  { %9723 = shalt.err (!%p9720_p12)
}
  0x40   :  { %s9724_s30 = scalar_lea.vmem %s112_s14, 64  ;;  %p9729_p0 = scmp.lt.s32.totalorder %s112_s14, %s112_s14 }
  0x41   :  { %p9725_p13 = scmp.ne.s32.totalorder %s112_s14, %s9724_s30  ;;  %p9730_p1 = scmp.lt.s32.totalorder %s9724_s30, %s9724_s30 }
  0x43   :  { %p9731_p2 = por %p9730_p1, %p9729_p0 }
  0x45   :  { %p9732_p3 = pnand %p9731_p2, %p9725_p13 }
  0x47   :  { %9735 = shalt.err (!%p9732_p3)
}
  0x48   :  { %114 = dma.hbm_to_vmem [thread:$0]  %s10609_s8, 64, %s112_s14, [#allocation17]  }
  0x49   :  { %s9860_s10 = smov [#allocation5]   ;;  %s9736_s18 = scalar_lea.hbm %s10602_s1, 960 }
  0x4a   :  { %s32_s15 = sshll.u32 %s9860_s10, 4  ;;  %p9737_p4 = scmp.ne.s32.totalorder %s10602_s1, %s9736_s18  ;;  %s33_s15 = int_to_ptr.vmem [resolvable:$true] %s32_s15 }
  0x4b   :  { %p9740_p5 = scmp.lt.u32.totalorder %s9736_s18, %s10602_s1 }
  0x4d   :  { %p9742_p6 = pnand %p9740_p5, %p9737_p4 }
  0x4f   :  { %9745 = shalt.err (!%p9742_p6)
}
  0x50   :  { %s9746_s26 = scalar_lea.vmem %s33_s15, 960  ;;  %p9751_p8 = scmp.lt.s32.totalorder %s33_s15, %s33_s15 }
  0x51   :  { %p9747_p7 = scmp.ne.s32.totalorder %s33_s15, %s9746_s26  ;;  %p9752_p9 = scmp.lt.s32.totalorder %s9746_s26, %s9746_s26 }
  0x53   :  { %p9753_p10 = por %p9752_p9, %p9751_p8 }
  0x55   :  { %p9754_p11 = pnand %p9753_p10, %p9747_p7 }
  0x57   :  { %9757 = shalt.err (!%p9754_p11)
}
  0x58   :  { %s9861_s8 = smov 64   ;;  %s9862_s14 = smov 4  }
  0x59   :  { %38 = dma.hbm_to_vmem [thread:$0]  %s10602_s1, 960, %s33_s15, [#allocation6], %s9861_s8, %s9861_s8, %s9862_s14  }
  0x5a   :  { %s9863_s25 = smov [#allocation9]   ;;  %s9864_s28 = smov [#allocation12]  }
  0x5b   :  { %s54_s27 = sshll.u32 %s9863_s25, 4  ;;  %s76_s29 = sshll.u32 %s9864_s28, 4  ;;  %s55_s27 = int_to_ptr.vmem [resolvable:$true] %s54_s27  ;;  %s77_s29 = int_to_ptr.vmem [resolvable:$true] %s76_s29 }
  0x5c   :  { %s9758_s30 = scalar_lea.hbm %s10604_s3, 3840 }
  0x5d   :  { %p9759_p12 = scmp.ne.s32.totalorder %s10604_s3, %s9758_s30  ;;  %p9762_p13 = scmp.lt.u32.totalorder %s9758_s30, %s10604_s3 }
  0x5f   :  { %p9764_p0 = pnand %p9762_p13, %p9759_p12 }
  0x61   :  { %9767 = shalt.err (!%p9764_p0)
}
  0x62   :  { %s9768_s1 = scalar_lea.vmem %s55_s27, 3840  ;;  %p9773_p2 = scmp.lt.s32.totalorder %s55_s27, %s55_s27 }
  0x63   :  { %p9769_p1 = scmp.ne.s32.totalorder %s55_s27, %s9768_s1  ;;  %p9774_p3 = scmp.lt.s32.totalorder %s9768_s1, %s9768_s1 }
  0x65   :  { %p9775_p4 = por %p9774_p3, %p9773_p2 }
  0x67   :  { %p9776_p5 = pnand %p9775_p4, %p9769_p1 }
  0x69   :  { %9779 = shalt.err (!%p9776_p5)
}
  0x6a   :  { %60 = dma.hbm_to_vmem [thread:$0]  %s10604_s3, 3840, %s55_s27, [#allocation8], %s9861_s8, %s9861_s8, %s9862_s14  }
  0x6b   :  { %s9780_s20 = scalar_lea.hbm %s10606_s5, 65536 }
  0x6c   :  { %p9781_p6 = scmp.ne.s32.totalorder %s10606_s5, %s9780_s20  ;;  %p9784_p7 = scmp.lt.u32.totalorder %s9780_s20, %s10606_s5 }
  0x6e   :  { %p9786_p8 = pnand %p9784_p7, %p9781_p6 }
  0x70   :  { %9789 = shalt.err (!%p9786_p8)
}
  0x71   :  { %s9790_s23 = scalar_lea.vmem %s77_s29, 65536  ;;  %p9795_p10 = scmp.lt.s32.totalorder %s77_s29, %s77_s29 }
  0x72   :  { %p9791_p9 = scmp.ne.s32.totalorder %s77_s29, %s9790_s23  ;;  %p9796_p11 = scmp.lt.s32.totalorder %s9790_s23, %s9790_s23 }
  0x74   :  { %p9797_p12 = por %p9796_p11, %p9795_p10 }
  0x76   :  { %p9798_p13 = pnand %p9797_p12, %p9791_p9 }
  0x78   :  { %9801 = shalt.err (!%p9798_p13)
}
  0x79   :  { %s9865_s3 = smov 512   ;;  %s9866_s8 = smov 32  }
  0x7a   :  { %82 = dma.hbm_to_vmem [thread:$0]  %s10606_s5, 65536, %s77_s29, [#allocation11], %s9865_s3, %s9865_s3, %s9866_s8  }
  0x7b   :  { %s9867_s27 = smov [#allocation15]   ;;  %s9802_s30 = scalar_lea.hbm %s10608_s7, 32768 }
  0x7c   :  { %s98_s28 = sshll.u32 %s9867_s27, 4  ;;  %p9803_p0 = scmp.ne.s32.totalorder %s10608_s7, %s9802_s30  ;;  %s99_s28 = int_to_ptr.vmem [resolvable:$true] %s98_s28 }
  0x7d   :  { %p9806_p1 = scmp.lt.u32.totalorder %s9802_s30, %s10608_s7 }
  0x7f   :  { %p9808_p2 = pnand %p9806_p1, %p9803_p0 }
  0x81   :  { %9811 = shalt.err (!%p9808_p2)
}
  0x82   :  { %s9812_s1 = scalar_lea.vmem %s99_s28, 32768  ;;  %p9817_p4 = scmp.lt.s32.totalorder %s99_s28, %s99_s28 }
  0x83   :  { %p9813_p3 = scmp.ne.s32.totalorder %s99_s28, %s9812_s1  ;;  %p9818_p5 = scmp.lt.s32.totalorder %s9812_s1, %s9812_s1 }
  0x85   :  { %p9819_p6 = por %p9818_p5, %p9817_p4 }
  0x87   :  { %p9820_p7 = pnand %p9819_p6, %p9813_p3 }
  0x89   :  { %9823 = shalt.err (!%p9820_p7)
}
  0x8a   :  { %s9868_s5 = smov 256   ;;  %s9869_s29 = smov 16  }
  0x8b   :  { %104 = dma.hbm_to_vmem [thread:$0]  %s10608_s7, 32768, %s99_s28, [#allocation14], %s9868_s5, %s9868_s5, %s9869_s29  }
  0x8c   :  { %s9870_s18 = smov [#allocation18]   ;;  %s9824_s4 = scalar_lea.hbm %s10610_s9, 64 }
  0x8d   :  { %s121_s19 = sshll.u32 %s9870_s18, 4  ;;  %p9825_p8 = scmp.ne.s32.totalorder %s10610_s9, %s9824_s4  ;;  %s122_s19 = int_to_ptr.vmem [resolvable:$true] %s121_s19 }
  0x8e   :  { %p9828_p9 = scmp.lt.u32.totalorder %s9824_s4, %s10610_s9 }
  0x90   :  { %p9830_p10 = pnand %p9828_p9, %p9825_p8 }
  0x92   :  { %9833 = shalt.err (!%p9830_p10)
}
  0x93   :  { %s9834_s8 = scalar_lea.vmem %s122_s19, 64  ;;  %p9839_p12 = scmp.lt.s32.totalorder %s122_s19, %s122_s19 }
  0x94   :  { %p9835_p11 = scmp.ne.s32.totalorder %s122_s19, %s9834_s8  ;;  %p9840_p13 = scmp.lt.s32.totalorder %s9834_s8, %s9834_s8 }
  0x96   :  { %p9841_p0 = por %p9840_p13, %p9839_p12 }
  0x98   :  { %p9842_p1 = pnand %p9841_p0, %p9835_p11 }
  0x9a   :  { %9845 = shalt.err (!%p9842_p1)
}
  0x9b   :  { %124 = dma.hbm_to_vmem [thread:$0]  %s10610_s9, 64, %s122_s19, [#allocation17]  }
  0x9c   :  { %9846 = dma.done.wait [#allocation6], 960  }
  0x9d   :  { %9847 = vsyncadd [#allocation6], 4294966336 }
  0x9e   :  { %9848 = dma.done.wait [#allocation8], 3856  }
  0x9f   :  { %9849 = vsyncadd [#allocation8], 4294963440 }
  0xa0   :  { %9850 = dma.done.wait [#allocation11], 65552  }
  0xa1   :  { %9851 = vsyncadd [#allocation11], 4294901744 }
  0xa2   :  { %9852 = dma.done.wait [#allocation14], 32896  }
  0xa3   :  { %9853 = vsyncadd [#allocation14], 4294934400 }
  0xa4   :  { %9854 = dma.done.wait [#allocation17], 128  }
  0xa5   :  { %9855 = vsyncadd [#allocation17], 4294967168  ;;  %vm155_vm0 = vcmask 326656   ;;  %vm158_vm1 = vcmask 326912   ;;  %v9871_v1 = vmov 0   ;;  %vm170_vm2 = vcmask 261120  }
  0xa6   :  { %160 = vst.msk [vmem:[#allocation2 + $0x8] sm:$0xff] %vm158_vm1, %v9871_v1  ;;  %161 = vst.msk [vmem:[#allocation2 + $0x10] sm:$0xff] %vm158_vm1, %v9871_v1  ;;  %908 = vmatprep.subr.bf16.mxu1 %v9871_v1  ;;  %v9213_v2 = vld [vmem:[#allocation5 + $0x14] sm:$0xff]   ;;  %v9214_v3 = vld [vmem:[#allocation5 + $0x1c] sm:$0xff]   ;;  %vm322_vm3 = vcmask 1043456   ;;  %vm8023_vm4 = vcmask 7168  }
  0xa7   :  { %156 = vst.msk [vmem:[#allocation2] sm:$0xff] %vm155_vm0, %v9871_v1  ;;  %157 = vst.msk [vmem:[#allocation2 + $0x48] sm:$0xff] %vm155_vm0, %v9871_v1  ;;  %8952 = vmatprep.subr.bf16.mxu0 %v9213_v2  ;;  %v9215_v4 = vld [vmem:[#allocation5 + $0x24] ss:$0 sps:$4 sm:$0xff]   ;;  %v9216_v5 = vld [vmem:[%s10601_s0] sm:$0xff]  }
  0xa8   :  { %162 = vst.msk [vmem:[#allocation2 + $0x18] sm:$0xff] %vm158_vm1, %v9871_v1  ;;  %163 = vst.msk [vmem:[#allocation2 + $0x20] sm:$0xff] %vm158_vm1, %v9871_v1  ;;  %8953 = vmatpush3.bf16.msra.mxu0 %v9213_v2  ;;  %v9217_v6 = vld [vmem:[%s10601_s0 + $0x8] sm:$0xff]   ;;  %v9219_v7 = vld [vmem:[%s10601_s0 + $0x10] sm:$0xff]   ;;  %v324_v9 = vsel %vm322_vm3, %v9215_v4, 0 }
  0xa9   :  { %164 = vst.msk [vmem:[#allocation2 + $0x28] sm:$0xff] %vm158_vm1, %v9871_v1  ;;  %165 = vst.msk [vmem:[#allocation2 + $0x30] sm:$0xff] %vm158_vm1, %v9871_v1  ;;  %8954 = vmatprep.subr.bf16.mxu0 %v9214_v3  ;;  %v9220_v8 = vld [vmem:[%s10601_s0 + $0x18] sm:$0xff]   ;;  %v9222_v11 = vld [vmem:[%s10601_s0 + $0x20] sm:$0xff]  }
  0xaa   :  { %166 = vst.msk [vmem:[#allocation2 + $0x38] sm:$0xff] %vm158_vm1, %v9871_v1  ;;  %167 = vst.msk [vmem:[#allocation2 + $0x40] sm:$0xff] %vm158_vm1, %v9871_v1  ;;  %v9218_v10 = vld [vmem:[#allocation5] sm:$0xff]   ;;  %v9223_v12 = vld [vmem:[%s10601_s0 + $0x28] sm:$0xff]  }
  0xab   :  { %169 = vst [vmem:[#allocation3] sm:$0xff] %v9871_v1  ;;  %171 = vst.msk [vmem:[#allocation3 + $0x8] sm:$0xff] %vm170_vm2, %v9871_v1  ;;  %v9221_v13 = vld [vmem:[#allocation5 + $0x8] sm:$0xff]   ;;  %v9225_v15 = vld [vmem:[%s10601_s0 + $0x30] sm:$0xff]  }
  0xac   :  { %173 = vst.msk [vmem:[#allocation3 + $0x98] sm:$0xff] %vm170_vm2, %v9871_v1  ;;  %175 = vst.msk [vmem:[#allocation3 + $0x18] sm:$0xff] %vm170_vm2, %v9871_v1  ;;  %8955 = vmatpush3.bf16.msra.mxu0 %v9214_v3  ;;  %v9226_v17 = vld [vmem:[%s10601_s0 + $0x38] sm:$0xff]   ;;  %v9224_v19 = vld [vmem:[#allocation5 + $0x10] ss:$0 sps:$4 sm:$0xff]  }
  0xad   :  { %176 = vst.msk [vmem:[#allocation3 + $0x28] sm:$0xff] %vm170_vm2, %v9871_v1  ;;  %177 = vst.msk [vmem:[#allocation3 + $0x38] sm:$0xff] %vm170_vm2, %v9871_v1  ;;  %9194 = vmatprep.subr.msk.bf16.mxu0 %vm322_vm3, %v9215_v4  ;;  %v9227_v20 = vld [vmem:[#allocation5 + $0x28] sm:$0xff]   ;;  %v442_v23 = vsel %vm322_vm3, %v9224_v19, 0  ;;  %v9233_v25 = vld [vmem:[#allocation9 + $0x58] sm:$0xff]  }
  0xae   :  { %178 = vst.msk [vmem:[#allocation3 + $0x48] sm:$0xff] %vm170_vm2, %v9871_v1  ;;  %179 = vst.msk [vmem:[#allocation3 + $0x58] sm:$0xff] %vm170_vm2, %v9871_v1  ;;  %v9231_v24 = vld [vmem:[#allocation9 + $0x50] sm:$0xff]   ;;  %v9235_v26 = vld [vmem:[#allocation9 + $0x60] sm:$0xff]  }
  0xaf   :  { %180 = vst.msk [vmem:[#allocation3 + $0x68] sm:$0xff] %vm170_vm2, %v9871_v1  ;;  %181 = vst.msk [vmem:[#allocation3 + $0x78] sm:$0xff] %vm170_vm2, %v9871_v1  ;;  %909 = vmatpush1.bf16.msra.mxu1 %v9231_v24  ;;  %v9237_v29 = vld [vmem:[#allocation9 + $0x68] sm:$0xff]   ;;  %v9239_v30 = vld [vmem:[#allocation9 + $0x70] sm:$0xff]  }
  0xb0   :  { %182 = vst.msk [vmem:[#allocation3 + $0x88] sm:$0xff] %vm170_vm2, %v9871_v1  ;;  %174 = vst.msk [vmem:[#allocation3 + $0x8] sm:$0xff] %vm170_vm2, %v9871_v1  ;;  %8957 = vmatpush3.bf16.msra.mxu0 %v324_v9  ;;  %910 = vmatprep.subr.bf16.mxu1 %v9871_v1  ;;  %v9241_v33 = vld [vmem:[#allocation9 + $0x78] sm:$0xff]   ;;  %v9230_v37 = vld [vmem:[#allocation9 + $0xa0] sm:$0xff]  }
  0xb1   :  { %159 = vst.msk [vmem:[#allocation2] sm:$0xff] %vm158_vm1, %v9871_v1  ;;  %168 = vst.msk [vmem:[#allocation2 + $0x48] sm:$0xff] %vm158_vm1, %v9871_v1  ;;  %8974 = vmatprep.subr.bf16.mxu0 %v9218_v10  ;;  %v9228_v34 = vld [vmem:[#allocation5 + $0x30] sm:$0xff]   ;;  %v9229_v35 = vld [vmem:[#allocation5 + $0x38] ss:$0 sps:$4 sm:$0xff]  }
  0xb2   :  { %183 = vst.msk [vmem:[#allocation3 + $0x98] sm:$0xff] %vm170_vm2, %v9871_v1  ;;  %192 = vst.msk [vmem:[#allocation2 + $0x8] sm:$0xff] %vm170_vm2, %v9216_v5  ;;  %v595_v36 = vsel %vm322_vm3, %v9229_v35, 0  ;;  %v9232_v38 = vld [vmem:[#allocation9 + $0xa8] sm:$0xff]   ;;  %v9234_v39 = vld [vmem:[#allocation9 + $0xb0] sm:$0xff]  }
  0xb3   :  { %202 = vst.msk [vmem:[#allocation2 + $0x10] sm:$0xff] %vm170_vm2, %v9217_v6  ;;  %212 = vst.msk [vmem:[#allocation2 + $0x18] sm:$0xff] %vm170_vm2, %v9219_v7  ;;  %911 = vmatpush1.bf16.msra.mxu1 %v9233_v25  ;;  %v9236_v40 = vld [vmem:[#allocation9 + $0xb8] sm:$0xff]   ;;  %v9238_v41 = vld [vmem:[#allocation9 + $0xc0] sm:$0xff]  }
  0xb4   :  { %222 = vst.msk [vmem:[#allocation2 + $0x20] sm:$0xff] %vm170_vm2, %v9220_v8  ;;  %232 = vst.msk [vmem:[#allocation2 + $0x28] sm:$0xff] %vm170_vm2, %v9222_v11  ;;  %912 = vmatprep.subr.bf16.mxu1 %v9871_v1  ;;  %v9240_v42 = vld [vmem:[#allocation9 + $0xc8] sm:$0xff]   ;;  %v9242_v44 = vld [vmem:[#allocation9 + $0xd0] sm:$0xff]  }
  0xb5   :  { %242 = vst.msk [vmem:[#allocation2 + $0x30] sm:$0xff] %vm170_vm2, %v9223_v12  ;;  %252 = vst.msk [vmem:[#allocation2 + $0x38] sm:$0xff] %vm170_vm2, %v9225_v15  ;;  %v9243_v45 = vld [vmem:[#allocation9 + $0x80] sm:$0xff]   ;;  %v9244_v46 = vld [vmem:[#allocation9 + $0xd8] sm:$0xff]  }
  0xb6   :  { %262 = vst.msk [vmem:[#allocation2 + $0x40] sm:$0xff] %vm170_vm2, %v9226_v17  ;;  %v9245_v47 = vld [vmem:[#allocation9 + $0x88] sm:$0xff]   ;;  %v9246_v48 = vld [vmem:[#allocation9 + $0xe0] sm:$0xff]   ;;  %v9247_v49 = vld [vmem:[#allocation9 + $0x90] sm:$0xff]  }
  0xb7   :  { %913 = vmatpush1.bf16.msra.mxu1 %v9235_v26  ;;  %v9248_v50 = vld [vmem:[#allocation9 + $0xe8] sm:$0xff]   ;;  %v9249_v51 = vld [vmem:[#allocation9 + $0x98] sm:$0xff]   ;;  %v9250_v4 = vld [vmem:[#allocation9] sm:$0xff]  }
  0xb8   :  { %914 = vmatprep.subr.bf16.mxu1 %v9871_v1  ;;  %v263_v32 = vld [vmem:[#allocation2] sm:$0xff]  ;;  %v548_v43 = vld [vmem:[#allocation2 + $0x48] sm:$0xff]  ;;  %v10179_v52 = vld [vmem:[#allocation3 + $0x28] sm:$0xff] }
  0xb9   :  { %v264_v14 = vld [vmem:[#allocation2 + $0x8] sm:$0xff] }
  0xba   :  { %8958 = vmatprep.mubr.msk.bf16.mxu0 %vm155_vm0, %v264_v14  ;;  %v265_v16 = vld [vmem:[#allocation2 + $0x10] sm:$0xff]  ;;  %v266_v18 = vld [vmem:[#allocation2 + $0x18] sm:$0xff]  ;;  %v10183_v53 = vld [vmem:[#allocation3 + $0x18] sm:$0xff] }
  0xbb   :  { %8959 = vmatmul.mubr.msk.bf16.vlgmr.msra.gmra.mrb[0].mxu0 %vm155_vm0, %v265_v16  ;;  %v267_v21 = vld [vmem:[#allocation2 + $0x20] sm:$0xff]  ;;  %v268_v22 = vld [vmem:[#allocation2 + $0x28] sm:$0xff]  ;;  %915 = vmatpush1.bf16.msra.mxu1 %v9237_v29 }
  0xbc   :  { %8975 = vmatpush3.bf16.msra.mxu0 %v9218_v10  ;;  %8962 = vmatprep.mubr.msk.bf16.mxu0 %vm155_vm0, %v266_v18  ;;  %v269_v27 = vld [vmem:[#allocation2 + $0x30] sm:$0xff]  ;;  %v270_v28 = vld [vmem:[#allocation2 + $0x38] sm:$0xff]  ;;  %v10188_v54 = vld [vmem:[#allocation7] ss:$0 sm:$0xff] }
  0xbd   :  { %8976 = vmatprep.subr.bf16.mxu0 %v9221_v13  ;;  %v276_v31 = vld [vmem:[#allocation2 + $0x40] sm:$0xff]  ;;  %916 = vmatprep.subr.bf16.mxu1 %v9871_v1  ;;  %v10196_v5 = vld [vmem:[#allocation3 + $0x38] sm:$0xff] }
  0xbe   :  { %8105 = vmatprep.mubr.msk.bf16.mxu1 %vm170_vm2, %v10183_v53 }
  0xbf   :  { %917 = vmatpush1.bf16.msra.mxu1 %v9239_v30 }
  0xc0   :  { %8977 = vmatpush3.bf16.msra.mxu0 %v9221_v13  ;;  %918 = vmatprep.subr.bf16.mxu1 %v9871_v1 }
  0xc1   :  { %9195 = vmatprep.subr.msk.bf16.mxu0 %vm322_vm3, %v9224_v19 }
  0xc3   :  { %8963 = vmatmul.mubr.msk.bf16.gmra.mrb[4].mxu0 %vm155_vm0, %v267_v21  ;;  %919 = vmatpush1.bf16.msra.mxu1 %v9241_v33 }
  0xc4   :  { %8966 = vmatprep.mubr.msk.bf16.mxu0 %vm155_vm0, %v268_v22  ;;  %8979 = vmatpush3.bf16.msra.mxu0 %v442_v23 }
  0xc5   :  { %8996 = vmatprep.subr.bf16.mxu0 %v9227_v20  ;;  %920 = vmatprep.subr.bf16.mxu1 %v9871_v1 }
  0xc7   :  { %921 = vmatpush1.bf16.msra.mxu1 %v9243_v45 }
  0xc8   :  { %922 = vmatprep.subr.bf16.mxu1 %v9871_v1 }
  0xcb   :  { %8967 = vmatmul.mubr.msk.bf16.gmra.mrb[8].mxu0 %vm155_vm0, %v269_v27  ;;  %923 = vmatpush1.bf16.msra.mxu1 %v9245_v47 }
  0xcc   :  { %8970 = vmatprep.mubr.msk.bf16.mxu0 %vm155_vm0, %v270_v28  ;;  %924 = vmatprep.subr.bf16.mxu1 %v9871_v1 }
  0xcf   :  { %925 = vmatpush1.bf16.msra.mxu1 %v9247_v49 }
  0xd0   :  { %926 = vmatprep.subr.bf16.mxu1 %v9871_v1 }
  0xd3   :  { %8971 = vmatmul.mubr.msk.bf16.gmra.mrb[12].mxu0 %vm155_vm0, %v276_v31  ;;  %927 = vmatpush1.bf16.msra.mxu1 %v9249_v51 }
  0xd4   :  { %8980 = vmatprep.mubr.msk.bf16.mxu0 %vm155_vm0, %v263_v32  ;;  %1068 = vmatprep.subr.bf16.mxu1 %v9871_v1  ;;  %v9253_v32 = vld [vmem:[#allocation9 + $0x18] sm:$0xff]  }
  0xdb   :  { %8981 = vmatmul.mubr.msk.bf16.vlgmr.msra.gmra.mrb[0].mxu0 %vm155_vm0, %v264_v14  ;;  %v9251_v14 = vld [vmem:[#allocation9 + $0x8] sm:$0xff]  }
  0xdc   :  { %8997 = vmatpush3.bf16.msra.mxu0 %v9227_v20  ;;  %8984 = vmatprep.mubr.msk.bf16.mxu0 %vm155_vm0, %v265_v16 }
  0xdd   :  { %8998 = vmatprep.subr.bf16.mxu0 %v9228_v34 }
  0xe0   :  { %8999 = vmatpush3.bf16.msra.mxu0 %v9228_v34 }
  0xe1   :  { %9196 = vmatprep.subr.msk.bf16.mxu0 %vm322_vm3, %v9229_v35 }
  0xe3   :  { %8985 = vmatmul.mubr.msk.bf16.gmra.mrb[4].mxu0 %vm155_vm0, %v266_v18 }
  0xe4   :  { %8988 = vmatprep.mubr.msk.bf16.mxu0 %vm155_vm0, %v267_v21  ;;  %9001 = vmatpush3.bf16.msra.mxu0 %v595_v36 }
  0xe5   :  { %1286 = vmatprep.subr.bf16.mxu0 %v9871_v1 }
  0xeb   :  { %8989 = vmatmul.mubr.msk.bf16.gmra.mrb[8].mxu0 %vm155_vm0, %v268_v22 }
  0xec   :  { %8992 = vmatprep.mubr.msk.bf16.mxu0 %vm155_vm0, %v269_v27 }
  0xf3   :  { %8993 = vmatmul.mubr.msk.bf16.gmra.mrb[12].mxu0 %vm155_vm0, %v270_v28 }
  0xf4   :  { %9002 = vmatprep.mubr.msk.bf16.mxu0 %vm155_vm0, %v265_v16  ;;  %v10210_v16 = vld [vmem:[#allocation3] sm:$0xff] }
  0xfb   :  { %9003 = vmatmul.mubr.msk.bf16.vlgmr.msra.gmra.mrb[0].mxu0 %vm155_vm0, %v266_v18 }
  0xfc   :  { %9006 = vmatprep.mubr.msk.bf16.mxu0 %vm155_vm0, %v267_v21  ;;  %1287 = vmatpush1.bf16.msra.mxu0 %v9230_v37 }
  0xfd   :  { %1288 = vmatprep.subr.bf16.mxu0 %v9871_v1 }
 0x100   :  { %1289 = vmatpush1.bf16.msra.mxu0 %v9232_v38 }
 0x101   :  { %1290 = vmatprep.subr.bf16.mxu0 %v9871_v1 }
 0x103   :  { %9007 = vmatmul.mubr.msk.bf16.gmra.mrb[4].mxu0 %vm155_vm0, %v268_v22  ;;  %v9252_v22 = vld [vmem:[#allocation9 + $0x10] sm:$0xff]  }
 0x104   :  { %9010 = vmatprep.mubr.msk.bf16.mxu0 %vm155_vm0, %v269_v27  ;;  %1291 = vmatpush1.bf16.msra.mxu0 %v9234_v39  ;;  %v10219_v27 = vld [vmem:[#allocation3 + $0x48] sm:$0xff] }
 0x105   :  { %1292 = vmatprep.subr.bf16.mxu0 %v9871_v1 }
 0x108   :  { %1293 = vmatpush1.bf16.msra.mxu0 %v9236_v40 }
 0x109   :  { %1294 = vmatprep.subr.bf16.mxu0 %v9871_v1 }
 0x10b   :  { %9011 = vmatmul.mubr.msk.bf16.gmra.mrb[8].mxu0 %vm155_vm0, %v270_v28 }
 0x10c   :  { %9014 = vmatprep.mubr.msk.bf16.mxu0 %vm155_vm0, %v276_v31  ;;  %1295 = vmatpush1.bf16.msra.mxu0 %v9238_v41  ;;  %v10235_v41 = vld [vmem:[#allocation3 + $0x58] sm:$0xff] }
 0x10d   :  { %1296 = vmatprep.subr.bf16.mxu0 %v9871_v1 }
 0x110   :  { %1297 = vmatpush1.bf16.msra.mxu0 %v9240_v42  ;;  %v9254_v42 = vld [vmem:[#allocation9 + $0x20] sm:$0xff]  }
 0x111   :  { %1298 = vmatprep.subr.bf16.mxu0 %v9871_v1 }
 0x113   :  { %9015 = vmatmul.mubr.msk.bf16.gmra.mrb[12].mxu0 %vm155_vm0, %v548_v43 }
 0x114   :  { %1299 = vmatpush1.bf16.msra.mxu0 %v9242_v44  ;;  %8141 = vmatprep.mubr.msk.bf16.mxu0 %vm170_vm2, %v10179_v52 }
 0x115   :  { %1300 = vmatprep.subr.bf16.mxu0 %v9871_v1 }
 0x118   :  { %1301 = vmatpush1.bf16.msra.mxu0 %v9244_v46 }
 0x119   :  { %1302 = vmatprep.subr.bf16.mxu0 %v9871_v1 }
 0x11c   :  { %1303 = vmatpush1.bf16.msra.mxu0 %v9246_v48 }
 0x11d   :  { %1304 = vmatprep.subr.bf16.mxu0 %v9871_v1 }
 0x120   :  { %1305 = vmatpush1.bf16.msra.mxu0 %v9248_v50  ;;  %v9255_v50 = vld [vmem:[#allocation9 + $0x28] sm:$0xff]  }
 0x1ce   :  { %v9004_v55 = vpop.f32.mrb[0].mxu0 }
 0x1cf   :  { %v719_v56 = vadd.f32 %v9004_v55, %v10188_v54  ;;  %v631_v57 = vpop.f32.mrb[1].mxu0 }
 0x1d0   :  { %v717_v58 = vadd.f32 %v10188_v54, %v631_v57  ;;  %v9005_v59 = vpop.f32.mrb[2].mxu0 }
 0x1d1   :  { %v720_v60 = vadd.f32 %v9005_v59, %v10188_v54  ;;  %v634_v61 = vpop.f32.mrb[3].mxu0  ;;  %v735_v63 = vmax.f32 %v719_v56, 0.0 }
 0x1d2   :  { %v718_v62 = vadd.f32 %v10188_v54, %v634_v61  ;;  %v733_v1 = vmax.f32 %v717_v58, 0.0  ;;  %v9256_v61 = vld [vmem:[#allocation9 + $0x30] sm:$0xff]  }
 0x1d3   :  { %v736_v0 = vmax.f32 %v720_v60, 0.0  ;;  %v1174_v60 = vld [vmem:[#allocation3 + $0x68] sm:$0xff] }
 0x1d4   :  { %v734_v2 = vmax.f32 %v718_v62, 0.0  ;;  %v1176_v62 = vld [vmem:[#allocation3 + $0x78] sm:$0xff] }
 0x1d5   :  { %v10194_v3 = vpack.c.bf16 %v736_v0, %v735_v63  ;;  %v9258_v63 = vld [vmem:[#allocation9 + $0x40] sm:$0xff]   ;;  %v9259_v0 = vld [vmem:[#allocation9 + $0x48] sm:$0xff]  }
 0x1d6   :  { %v10198_v6 = vpack.c.bf16 %v734_v2, %v733_v1  ;;  %v9008_v7 = vpop.f32.mrb[4].mxu0  ;;  %v1178_v1 = vld [vmem:[#allocation3 + $0x88] sm:$0xff]  ;;  %v1180_v2 = vld [vmem:[#allocation3 + $0x98] sm:$0xff] }
 0x1d7   :  { %v723_v8 = vadd.f32 %v9008_v7, %v10188_v54  ;;  %v647_v9 = vpop.f32.mrb[5].mxu0  ;;  %1319 = vmatmul.mubr.bf16.vlgmr.msra.gmra.mrb[16].mxu0 %v10194_v3  ;;  %v1586_v7 = vld [vmem:[#allocation12 + $0x460] sm:$0xff] }
 0x1d8   :  { %v721_v10 = vadd.f32 %v10188_v54, %v647_v9  ;;  %v9009_v11 = vpop.f32.mrb[6].mxu0  ;;  %941 = vmatmul.mubr.bf16.vlgmr.msra.gmra.mrb[0].mxu1 %v10198_v6  ;;  %8142 = vmatprep.mubr.msk.bf16.mxu0 %vm170_vm2, %v10196_v5 }
 0x1d9   :  { %v724_v12 = vadd.f32 %v9009_v11, %v10188_v54  ;;  %v650_v13 = vpop.f32.mrb[7].mxu0  ;;  %1069 = vmatpush1.bf16.msra.mxu1 %v9250_v4  ;;  %8106 = vmatprep.mubr.msk.bf16.mxu1 %vm170_vm2, %v10179_v52  ;;  %v739_v17 = vmax.f32 %v723_v8, 0.0  ;;  %v766_v4 = vld [vmem:[#allocation3 + $0x8] sm:$0xff]  ;;  %v1594_v11 = vld [vmem:[#allocation12 + $0x4a0] sm:$0xff] }
 0x1da   :  { %v722_v15 = vadd.f32 %v10188_v54, %v650_v13  ;;  %1070 = vmatprep.subr.bf16.mxu1 %v10210_v16  ;;  %v737_v19 = vmax.f32 %v721_v10, 0.0  ;;  %v1590_v10 = vld [vmem:[#allocation12 + $0x480] sm:$0xff] }
 0x1db   :  { %v740_v18 = vmax.f32 %v724_v12, 0.0  ;;  %v8166_v12 = vcombine.low %v1590_v10, %v1594_v11  ;;  %v8167_v13 = vcombine.high %v1590_v10, %v1594_v11 }
 0x1dc   :  { %v738_v20 = vmax.f32 %v722_v15, 0.0  ;;  %v1602_v15 = vld [vmem:[#allocation12 + $0x4e0] sm:$0xff] }
 0x1dd   :  { %v10213_v21 = vpack.c.bf16 %v740_v18, %v739_v17  ;;  %1071 = vmatpush1.bf16.msra.mxu1 %v9251_v14  ;;  %v1598_v14 = vld [vmem:[#allocation12 + $0x4c0] sm:$0xff] }
 0x1de   :  { %v10215_v23 = vpack.c.bf16 %v738_v20, %v737_v19  ;;  %v9012_v24 = vpop.f32.mrb[8].mxu0  ;;  %1072 = vmatprep.subr.bf16.mxu1 %v10210_v16  ;;  %v8174_v17 = vcombine.low %v1598_v14, %v1602_v15  ;;  %v8175_v18 = vcombine.high %v1598_v14, %v1602_v15  ;;  %v1575_v19 = vld [vmem:[#allocation12 + $0x408] sm:$0xff] }
 0x1df   :  { %v727_v25 = vadd.f32 %v9012_v24, %v10188_v54  ;;  %v663_v26 = vpop.f32.mrb[9].mxu0  ;;  %v1579_v20 = vld [vmem:[#allocation12 + $0x428] sm:$0xff]  ;;  %v1610_v24 = vld [vmem:[#allocation12 + $0x520] sm:$0xff] }
 0x1e0   :  { %v725_v28 = vadd.f32 %v10188_v54, %v663_v26  ;;  %v9013_v29 = vpop.f32.mrb[10].mxu0  ;;  %949 = vmatmul.mubr.bf16.gmra.mrb[4].mxu1 %v10194_v3  ;;  %1327 = vmatmul.mubr.bf16.gmra.mrb[20].mxu0 %v10215_v23 }
 0x1e1   :  { %v728_v30 = vadd.f32 %v9013_v29, %v10188_v54  ;;  %v666_v31 = vpop.f32.mrb[11].mxu0  ;;  %1073 = vmatpush1.bf16.msra.mxu1 %v9252_v22  ;;  %8107 = vmatprep.mubr.msk.bf16.mxu1 %vm170_vm2, %v10196_v5  ;;  %v743_v34 = vmax.f32 %v727_v25, 0.0  ;;  %v8152_v22 = vcombine.low %v1575_v19, %v1579_v20 }
 0x1e2   :  { %v726_v33 = vadd.f32 %v10188_v54, %v666_v31  ;;  %8143 = vmatprep.mubr.msk.bf16.mxu0 %vm170_vm2, %v10219_v27  ;;  %1074 = vmatprep.subr.bf16.mxu1 %v10210_v16  ;;  %v741_v36 = vmax.f32 %v725_v28, 0.0  ;;  %v1587_v28 = vld [vmem:[#allocation12 + $0x468] sm:$0xff] }
 0x1e3   :  { %v744_v35 = vmax.f32 %v728_v30, 0.0  ;;  %v1591_v31 = vld [vmem:[#allocation12 + $0x488] sm:$0xff] }
 0x1e4   :  { %v742_v37 = vmax.f32 %v726_v33, 0.0 }
 0x1e5   :  { %v10231_v38 = vpack.c.bf16 %v744_v35, %v743_v34  ;;  %1075 = vmatpush1.bf16.msra.mxu1 %v9253_v32  ;;  %v1595_v32 = vld [vmem:[#allocation12 + $0x4a8] sm:$0xff] }
 0x1e6   :  { %v10233_v39 = vpack.c.bf16 %v742_v37, %v741_v36  ;;  %v9016_v40 = vpop.f32.mrb[12].mxu0  ;;  %1076 = vmatprep.subr.bf16.mxu1 %v10210_v16  ;;  %v8169_v33 = vcombine.high %v1591_v31, %v1595_v32  ;;  %v8168_v34 = vcombine.low %v1591_v31, %v1595_v32  ;;  %v1599_v35 = vld [vmem:[#allocation12 + $0x4c8] sm:$0xff] }
 0x1e7   :  { %v731_v43 = vadd.f32 %v9016_v40, %v10188_v54  ;;  %v679_v44 = vpop.f32.mrb[13].mxu0  ;;  %v1603_v36 = vld [vmem:[#allocation12 + $0x4e8] sm:$0xff] }
 0x1e8   :  { %v729_v45 = vadd.f32 %v10188_v54, %v679_v44  ;;  %v9017_v46 = vpop.f32.mrb[14].mxu0  ;;  %957 = vmatmul.mubr.bf16.gmra.mrb[8].mxu1 %v10215_v23  ;;  %1335 = vmatmul.mubr.bf16.gmra.mrb[24].mxu0 %v10213_v21  ;;  %v8177_v37 = vcombine.high %v1599_v35, %v1603_v36  ;;  %v1611_v40 = vld [vmem:[#allocation12 + $0x528] sm:$0xff] }
 0x1e9   :  { %v732_v47 = vadd.f32 %v9017_v46, %v10188_v54  ;;  %v682_v48 = vpop.f32.mrb[15].mxu0  ;;  %8108 = vmatprep.mubr.msk.bf16.mxu1 %vm170_vm2, %v10219_v27  ;;  %8144 = vmatprep.mubr.msk.bf16.mxu0 %vm170_vm2, %v10235_v41  ;;  %v747_v51 = vmax.f32 %v731_v43, 0.0  ;;  %v1618_v43 = vld [vmem:[#allocation12 + $0x560] sm:$0xff] }
 0x1ea   :  { %v730_v49 = vadd.f32 %v10188_v54, %v682_v48  ;;  %1077 = vmatpush1.bf16.msra.mxu1 %v9254_v42  ;;  %v745_v56 = vmax.f32 %v729_v45, 0.0  ;;  %v9257_v54 = vld [vmem:[#allocation9 + $0x38] sm:$0xff]  }
 0x1eb   :  { %v748_v55 = vmax.f32 %v732_v47, 0.0  ;;  %1078 = vmatprep.subr.bf16.mxu1 %v10210_v16  ;;  %v1614_v42 = vld [vmem:[#allocation12 + $0x540] sm:$0xff]  ;;  %v1615_v47 = vld [vmem:[#allocation12 + $0x548] sm:$0xff] }
 0x1ec   :  { %v746_v57 = vmax.f32 %v730_v49, 0.0  ;;  %v8190_v45 = vcombine.low %v1614_v42, %v1618_v43  ;;  %v8191_v46 = vcombine.high %v1614_v42, %v1618_v43  ;;  %v1619_v48 = vld [vmem:[#allocation12 + $0x568] sm:$0xff] }
 0x1ed   :  { %v756_v58 = vpack.c.bf16 %v748_v55, %v747_v51  ;;  %v8193_v49 = vcombine.high %v1615_v47, %v1619_v48  ;;  %v1622_v51 = vld [vmem:[#allocation12 + $0x580] sm:$0xff] }
 0x1ee   :  { %v10249_v59 = vpack.c.bf16 %v746_v57, %v745_v56  ;;  %1079 = vmatpush1.bf16.msra.mxu1 %v9255_v50  ;;  %v8192_v50 = vcombine.low %v1615_v47, %v1619_v48  ;;  %v1626_v55 = vld [vmem:[#allocation12 + $0x5a0] sm:$0xff]  ;;  %v1623_v56 = vld [vmem:[#allocation12 + $0x588] sm:$0xff] }
 0x1ef   :  { %1080 = vmatprep.subr.bf16.mxu1 %v10210_v16  ;;  %v8199_v57 = vcombine.high %v1622_v51, %v1626_v55 }
 0x1f0   :  { %965 = vmatmul.mubr.bf16.gmra.mrb[12].mxu1 %v10213_v21  ;;  %1343 = vmatmul.mubr.bf16.gmra.mrb[28].mxu0 %v10233_v39 }
 0x1f1   :  { %8109 = vmatprep.mubr.msk.bf16.mxu1 %vm170_vm2, %v10235_v41  ;;  %8145 = vmatprep.mubr.msk.bf16.mxu0 %vm170_vm2, %v1174_v60 }
 0x1f2   :  { %1081 = vmatpush1.bf16.msra.mxu1 %v9256_v61 }
 0x1f3   :  { %1082 = vmatprep.subr.bf16.mxu1 %v10210_v16 }
 0x1f6   :  { %1083 = vmatpush1.bf16.msra.mxu1 %v9257_v54  ;;  %v1630_v54 = vld [vmem:[#allocation12 + $0x5c0] sm:$0xff] }
 0x1f7   :  { %1084 = vmatprep.subr.bf16.mxu1 %v10210_v16 }
 0x1f8   :  { %973 = vmatmul.mubr.bf16.gmra.mrb[16].mxu1 %v10233_v39  ;;  %1351 = vmatmul.mubr.bf16.gmra.mrb[32].mxu0 %v10231_v38 }
 0x1f9   :  { %8110 = vmatprep.mubr.msk.bf16.mxu1 %vm170_vm2, %v1174_v60  ;;  %8146 = vmatprep.mubr.msk.bf16.mxu0 %vm170_vm2, %v1176_v62 }
 0x1fa   :  { %1085 = vmatpush1.bf16.msra.mxu1 %v9258_v63  ;;  %v1631_v63 = vld [vmem:[#allocation12 + $0x5c8] sm:$0xff] }
 0x1fb   :  { %1086 = vmatprep.subr.bf16.mxu1 %v10210_v16 }
 0x1fe   :  { %1087 = vmatpush1.bf16.msra.mxu1 %v9259_v0 }
 0x200   :  { %981 = vmatmul.mubr.bf16.gmra.mrb[20].mxu1 %v10231_v38  ;;  %1359 = vmatmul.mubr.bf16.gmra.mrb[36].mxu0 %v10249_v59 }
 0x201   :  { %8111 = vmatprep.mubr.msk.bf16.mxu1 %vm170_vm2, %v1176_v62  ;;  %8147 = vmatprep.mubr.msk.bf16.mxu0 %vm170_vm2, %v1178_v1 }
 0x208   :  { %989 = vmatmul.mubr.bf16.gmra.mrb[24].mxu1 %v10249_v59  ;;  %1367 = vmatmul.mubr.bf16.gmra.mrb[40].mxu0 %v756_v58 }
 0x209   :  { %8112 = vmatprep.mubr.msk.bf16.mxu1 %vm170_vm2, %v1178_v1  ;;  %8148 = vmatprep.mubr.msk.bf16.mxu0 %vm170_vm2, %v1180_v2  ;;  %v1635_v1 = vld [vmem:[#allocation12 + $0x5e8] sm:$0xff] }
 0x210   :  { %997 = vmatmul.mubr.bf16.gmra.mrb[28].mxu1 %v756_v58  ;;  %1375 = vmatmul.mubr.bf16.gmra.mrb[44].mxu0 %v10210_v16  ;;  %v1627_v58 = vld [vmem:[#allocation12 + $0x5a8] sm:$0xff] }
 0x211   :  { %8123 = vmatprep.mubr.msk.bf16.mxu1 %vm170_vm2, %v766_v4  ;;  %2033 = vmatprep.mubr.bf16.mxu0 %v10210_v16  ;;  %v8201_v61 = vcombine.high %v1623_v56, %v1627_v58  ;;  %v8208_v4 = vcombine.low %v1631_v63, %v1635_v1 }
 0x218   :  { %1101 = vmatmul.mubr.bf16.vlgmr.msra.gmra.mrb[32].mxu1 %v10210_v16 }
 0x219   :  { %8124 = vmatprep.mubr.msk.bf16.mxu1 %vm170_vm2, %v10183_v53  ;;  %v1578_v53 = vld [vmem:[#allocation12 + $0x420] sm:$0xff] }
 0x220   :  { %1109 = vmatmul.mubr.bf16.gmra.mrb[36].mxu1 %v10198_v6 }
 0x221   :  { %8125 = vmatprep.mubr.msk.bf16.mxu1 %vm170_vm2, %v10179_v52  ;;  %v1574_v52 = vld [vmem:[#allocation12 + $0x400] sm:$0xff] }
 0x222   :  { %v8151_v6 = vcombine.high %v1574_v52, %v1578_v53 }
 0x224   :  { %1958 = vmatprep.subr.bf16.mxu1 %v8151_v6  ;;  %v10299_v6 = vld [vmem:[#allocation12 + $0x418] sm:$0xff] }
 0x228   :  { %1117 = vmatmul.mubr.bf16.gmra.mrb[40].mxu1 %v10194_v3  ;;  %v8150_v3 = vcombine.low %v1574_v52, %v1578_v53  ;;  %v8209_v52 = vcombine.high %v1631_v63, %v1635_v1  ;;  %v10295_v53 = vld [vmem:[#allocation12 + $0x410] sm:$0xff] }
 0x229   :  { %8126 = vmatprep.mubr.msk.bf16.mxu1 %vm170_vm2, %v10196_v5  ;;  %v1582_v5 = vld [vmem:[#allocation12 + $0x440] sm:$0xff] }
 0x22a   :  { %1959 = vmatpush1.bf16.msra.mxu1 %v8150_v3  ;;  %v8158_v8 = vcombine.low %v1582_v5, %v1586_v7  ;;  %v8159_v9 = vcombine.high %v1582_v5, %v1586_v7  ;;  %v10297_v3 = vld [vmem:[#allocation12 + $0x430] sm:$0xff]  ;;  %v10303_v7 = vld [vmem:[#allocation12 + $0x438] sm:$0xff] }
 0x22b   :  { %v8155_v5 = vcombine.high %v10295_v53, %v10297_v3  ;;  %v8157_v10 = vcombine.high %v10299_v6, %v10303_v7 }
 0x22c   :  { %1960 = vmatprep.subr.bf16.mxu1 %v8159_v9  ;;  %v8156_v9 = vcombine.low %v10299_v6, %v10303_v7 }
 0x22e   :  { %1961 = vmatpush1.bf16.msra.mxu1 %v8158_v8  ;;  %v8154_v8 = vcombine.low %v10295_v53, %v10297_v3 }
 0x22f   :  { %1962 = vmatprep.subr.bf16.mxu1 %v8167_v13 }
 0x230   :  { %1125 = vmatmul.mubr.bf16.gmra.mrb[44].mxu1 %v10215_v23  ;;  %v1606_v23 = vld [vmem:[#allocation12 + $0x500] sm:$0xff] }
 0x231   :  { %8127 = vmatprep.mubr.msk.bf16.mxu1 %vm170_vm2, %v10219_v27  ;;  %v8182_v25 = vcombine.low %v1606_v23, %v1610_v24  ;;  %v8183_v26 = vcombine.high %v1606_v23, %v1610_v24  ;;  %v1583_v27 = vld [vmem:[#allocation12 + $0x448] sm:$0xff] }
 0x232   :  { %1963 = vmatpush1.bf16.msra.mxu1 %v8166_v12  ;;  %v8161_v29 = vcombine.high %v1583_v27, %v1587_v28  ;;  %v8160_v30 = vcombine.low %v1583_v27, %v1587_v28 }
 0x233   :  { %1964 = vmatprep.subr.bf16.mxu1 %v8175_v18 }
 0x236   :  { %1965 = vmatpush1.bf16.msra.mxu1 %v8174_v17 }
 0x237   :  { %1966 = vmatprep.subr.bf16.mxu1 %v8183_v26 }
 0x238   :  { %1133 = vmatmul.mubr.bf16.gmra.mrb[48].mxu1 %v10213_v21  ;;  %v8153_v21 = vcombine.high %v1575_v19, %v1579_v20 }
 0x239   :  { %8128 = vmatprep.mubr.msk.bf16.mxu1 %vm170_vm2, %v10235_v41 }
 0x23a   :  { %2001 = vmatprep.subr.bf16.mxu0 %v8153_v21  ;;  %1967 = vmatpush1.bf16.msra.mxu1 %v8182_v25 }
 0x23b   :  { %2002 = vmatpush1.bf16.msra.mxu0 %v8152_v22  ;;  %1968 = vmatprep.subr.bf16.mxu1 %v8191_v46 }
 0x23c   :  { %2003 = vmatprep.subr.bf16.mxu0 %v8161_v29 }
 0x23e   :  { %1969 = vmatpush1.bf16.msra.mxu1 %v8190_v45 }
 0x23f   :  { %2004 = vmatpush1.bf16.msra.mxu0 %v8160_v30  ;;  %1970 = vmatprep.subr.bf16.mxu1 %v8199_v57 }
 0x240   :  { %1141 = vmatmul.mubr.bf16.gmra.mrb[52].mxu1 %v10233_v39  ;;  %2005 = vmatprep.subr.bf16.mxu0 %v8169_v33  ;;  %v1607_v39 = vld [vmem:[#allocation12 + $0x508] sm:$0xff] }
 0x241   :  { %8129 = vmatprep.mubr.msk.bf16.mxu1 %vm170_vm2, %v1174_v60  ;;  %v8185_v41 = vcombine.high %v1607_v39, %v1611_v40  ;;  %v8184_v44 = vcombine.low %v1607_v39, %v1611_v40  ;;  %v8200_v60 = vcombine.low %v1623_v56, %v1627_v58 }
 0x243   :  { %2006 = vmatpush1.bf16.msra.mxu0 %v8168_v34 }
 0x244   :  { %2007 = vmatprep.subr.bf16.mxu0 %v8177_v37 }
 0x248   :  { %1149 = vmatmul.mubr.bf16.gmra.mrb[56].mxu1 %v10231_v38  ;;  %v8176_v38 = vcombine.low %v1599_v35, %v1603_v36 }
 0x249   :  { %8130 = vmatprep.mubr.msk.bf16.mxu1 %vm170_vm2, %v1176_v62  ;;  %v1634_v62 = vld [vmem:[#allocation12 + $0x5e0] sm:$0xff] }
 0x24a   :  { %2008 = vmatpush1.bf16.msra.mxu0 %v8176_v38  ;;  %v8207_v0 = vcombine.high %v1630_v54, %v1634_v62  ;;  %v8206_v2 = vcombine.low %v1630_v54, %v1634_v62 }
 0x24b   :  { %2009 = vmatprep.subr.bf16.mxu0 %v8185_v41 }
 0x24e   :  { %2010 = vmatpush1.bf16.msra.mxu0 %v8184_v44 }
 0x24f   :  { %2011 = vmatprep.subr.bf16.mxu0 %v8193_v49 }
 0x250   :  { %1157 = vmatmul.mubr.bf16.gmra.mrb[60].mxu1 %v10249_v59  ;;  %v8198_v59 = vcombine.low %v1622_v51, %v1626_v55 }
 0x251   :  { %1990 = vmatprep.mubr.bf16.mxu1 %v10210_v16 }
 0x252   :  { %2012 = vmatpush1.bf16.msra.mxu0 %v8192_v50  ;;  %1971 = vmatpush1.bf16.msra.mxu1 %v8198_v59 }
 0x253   :  { %2013 = vmatprep.subr.bf16.mxu0 %v8201_v61  ;;  %1972 = vmatprep.subr.bf16.mxu1 %v8207_v0 }
 0x256   :  { %2014 = vmatpush1.bf16.msra.mxu0 %v8200_v60  ;;  %1973 = vmatpush1.bf16.msra.mxu1 %v8206_v2 }
 0x257   :  { %2015 = vmatprep.subr.bf16.mxu0 %v8209_v52  ;;  %2044 = vmatprep.subr.bf16.mxu1 %v8155_v5 }
 0x25a   :  { %2016 = vmatpush1.bf16.msra.mxu0 %v8208_v4 }
 0x25b   :  { %2087 = vmatprep.subr.bf16.mxu0 %v8157_v10 }
 0x2aa   :  { %v10311_v11 = vpop.f32.mrb[16].mxu0 }
 0x2ab   :  { %v10313_v12 = vpop.f32.mrb[0].mxu1  ;;  %v1322_v13 = vpop.f32.mrb[17].mxu0 }
 0x2ac   :  { %v944_v14 = vpop.f32.mrb[1].mxu1  ;;  %v10315_v15 = vpop.f32.mrb[18].mxu0 }
 0x2ad   :  { %v10317_v17 = vpop.f32.mrb[2].mxu1  ;;  %v1325_v18 = vpop.f32.mrb[19].mxu0 }
 0x2ae   :  { %v947_v19 = vpop.f32.mrb[3].mxu1 }
 0x2b3   :  { %v10319_v20 = vpop.f32.mrb[4].mxu1  ;;  %v10321_v21 = vpop.f32.mrb[20].mxu0 }
 0x2b4   :  { %v952_v22 = vpop.f32.mrb[5].mxu1  ;;  %v1330_v23 = vpop.f32.mrb[21].mxu0 }
 0x2b5   :  { %v10323_v24 = vpop.f32.mrb[6].mxu1  ;;  %v10325_v25 = vpop.f32.mrb[22].mxu0 }
 0x2b6   :  { %v955_v26 = vpop.f32.mrb[7].mxu1  ;;  %v1333_v27 = vpop.f32.mrb[23].mxu0 }
 0x2bb   :  { %v10327_v28 = vpop.f32.mrb[8].mxu1  ;;  %v10329_v29 = vpop.f32.mrb[24].mxu0 }
 0x2bc   :  { %v960_v30 = vpop.f32.mrb[9].mxu1  ;;  %v1338_v31 = vpop.f32.mrb[25].mxu0 }
 0x2bd   :  { %v10331_v32 = vpop.f32.mrb[10].mxu1  ;;  %v10333_v33 = vpop.f32.mrb[26].mxu0 }
 0x2be   :  { %v963_v34 = vpop.f32.mrb[11].mxu1  ;;  %v1341_v35 = vpop.f32.mrb[27].mxu0 }
 0x2bf   :  { %v10376_v34 = vld [vmem:[#allocation10] ss:$0 sm:$0xff] }
 0x2c3   :  { %v10335_v36 = vpop.f32.mrb[12].mxu1  ;;  %v10337_v37 = vpop.f32.mrb[28].mxu0 }
 0x2c4   :  { %v968_v38 = vpop.f32.mrb[13].mxu1  ;;  %v1346_v39 = vpop.f32.mrb[29].mxu0 }
 0x2c5   :  { %v10339_v40 = vpop.f32.mrb[14].mxu1  ;;  %v10341_v41 = vpop.f32.mrb[30].mxu0 }
 0x2c6   :  { %v971_v42 = vpop.f32.mrb[15].mxu1  ;;  %v1349_v43 = vpop.f32.mrb[31].mxu0 }
 0x2cb   :  { %v10343_v44 = vpop.f32.mrb[16].mxu1  ;;  %v10345_v45 = vpop.f32.mrb[32].mxu0 }
 0x2cc   :  { %v976_v46 = vpop.f32.mrb[17].mxu1  ;;  %v1354_v47 = vpop.f32.mrb[33].mxu0 }
 0x2cd   :  { %v10347_v48 = vpop.f32.mrb[18].mxu1  ;;  %v10349_v49 = vpop.f32.mrb[34].mxu0 }
 0x2ce   :  { %v979_v50 = vpop.f32.mrb[19].mxu1  ;;  %v1357_v51 = vpop.f32.mrb[35].mxu0 }
 0x2d3   :  { %v10351_v55 = vpop.f32.mrb[20].mxu1  ;;  %v10353_v56 = vpop.f32.mrb[36].mxu0 }
 0x2d4   :  { %v984_v57 = vpop.f32.mrb[21].mxu1  ;;  %v1362_v58 = vpop.f32.mrb[37].mxu0 }
 0x2d5   :  { %v10355_v59 = vpop.f32.mrb[22].mxu1  ;;  %v10357_v60 = vpop.f32.mrb[38].mxu0 }
 0x2d6   :  { %v987_v61 = vpop.f32.mrb[23].mxu1  ;;  %v1365_v54 = vpop.f32.mrb[39].mxu0 }
 0x2db   :  { %v10359_v62 = vpop.f32.mrb[24].mxu1  ;;  %v10361_v63 = vpop.f32.mrb[40].mxu0 }
 0x2dc   :  { %v992_v0 = vpop.f32.mrb[25].mxu1  ;;  %v1370_v1 = vpop.f32.mrb[41].mxu0 }
 0x2dd   :  { %v10363_v2 = vpop.f32.mrb[26].mxu1  ;;  %v10365_v4 = vpop.f32.mrb[42].mxu0 }
 0x2de   :  { %v995_v52 = vpop.f32.mrb[27].mxu1  ;;  %v1373_v5 = vpop.f32.mrb[43].mxu0 }
 0x2e3   :  { %v10367_v10 = vpop.f32.mrb[28].mxu1  ;;  %v10369_v13 = vpop.f32.mrb[44].mxu0 }
 0x2e4   :  { %v1000_v14 = vpop.f32.mrb[29].mxu1  ;;  %v1378_v18 = vpop.f32.mrb[45].mxu0 }
 0x2e5   :  { %v10371_v19 = vpop.f32.mrb[30].mxu1  ;;  %v10373_v22 = vpop.f32.mrb[46].mxu0 }
 0x2e6   :  { %v1003_v23 = vpop.f32.mrb[31].mxu1  ;;  %v1381_v26 = vpop.f32.mrb[47].mxu0 }
 0x2eb   :  { %v1102_v27 = vpop.f32.mrb[32].mxu1 }
 0x2ec   :  { %v1103_v30 = vadd.f32 %v1102_v27, %v10313_v12  ;;  %v1104_v31 = vpop.f32.mrb[33].mxu1 }
 0x2ed   :  { %v1105_v35 = vpop.f32.mrb[34].mxu1 }
 0x2ee   :  { %v1383_v38 = vadd.f32 %v10311_v11, %v1103_v30  ;;  %v1106_v39 = vadd.f32 %v1105_v35, %v10317_v17  ;;  %v1107_v42 = vpop.f32.mrb[35].mxu1 }
 0x2f0   :  { %v1406_v43 = vadd.f32 %v10376_v34, %v1383_v38  ;;  %v1384_v46 = vadd.f32 %v10315_v15, %v1106_v39  ;;  %v1584_v38 = vld [vmem:[#allocation12 + $0x450] sm:$0xff] }
 0x2f1   :  { %v1588_v39 = vld [vmem:[#allocation12 + $0x470] sm:$0xff] }
 0x2f2   :  { %v1407_v47 = vadd.f32 %v10376_v34, %v1384_v46  ;;  %v1422_v51 = vmax.f32 %v1406_v43, 0.0  ;;  %v1585_v43 = vld [vmem:[#allocation12 + $0x458] sm:$0xff] }
 0x2f3   :  { %v1110_v50 = vpop.f32.mrb[36].mxu1 }
 0x2f4   :  { %v1423_v57 = vmax.f32 %v1407_v47, 0.0  ;;  %v1111_v12 = vadd.f32 %v1110_v50, %v10319_v20  ;;  %v1112_v58 = vpop.f32.mrb[37].mxu1 }
 0x2f5   :  { %v1113_v61 = vpop.f32.mrb[38].mxu1 }
 0x2f6   :  { %v10384_v54 = vpack.c.bf16 %v1423_v57, %v1422_v51  ;;  %v1385_v11 = vadd.f32 %v10321_v21, %v1111_v12  ;;  %v1114_v17 = vadd.f32 %v1113_v61, %v10323_v24  ;;  %v1115_v0 = vpop.f32.mrb[39].mxu1  ;;  %v8163_v57 = vcombine.high %v1584_v38, %v1588_v39 }
 0x2f7   :  { %v1593_v0 = vld [vmem:[#allocation12 + $0x498] sm:$0xff] }
 0x2f8   :  { %v1408_v1 = vadd.f32 %v10376_v34, %v1385_v11  ;;  %v1386_v15 = vadd.f32 %v10325_v25, %v1114_v17  ;;  %v1592_v11 = vld [vmem:[#allocation12 + $0x490] sm:$0xff] }
 0x2f9   :  { %v1596_v17 = vld [vmem:[#allocation12 + $0x4b0] sm:$0xff] }
 0x2fa   :  { %v1409_v52 = vadd.f32 %v10376_v34, %v1386_v15  ;;  %v1424_v14 = vmax.f32 %v1408_v1, 0.0  ;;  %v1597_v1 = vld [vmem:[#allocation12 + $0x4b8] sm:$0xff] }
 0x2fb   :  { %v1118_v5 = vpop.f32.mrb[40].mxu1 }
 0x2fc   :  { %v1425_v18 = vmax.f32 %v1409_v52, 0.0  ;;  %v1119_v20 = vadd.f32 %v1118_v5, %v10327_v28  ;;  %v1120_v23 = vpop.f32.mrb[41].mxu1  ;;  %v1589_v28 = vld [vmem:[#allocation12 + $0x478] sm:$0xff] }
 0x2fd   :  { %v1121_v26 = vpop.f32.mrb[42].mxu1  ;;  %v8165_v61 = vcombine.high %v1585_v43, %v1589_v28  ;;  %v1605_v23 = vld [vmem:[#allocation12 + $0x4f8] sm:$0xff] }
 0x2fe   :  { %v10392_v27 = vpack.c.bf16 %v1425_v18, %v1424_v14  ;;  %v1387_v21 = vadd.f32 %v10329_v29, %v1119_v20  ;;  %v1122_v24 = vadd.f32 %v1121_v26, %v10331_v32  ;;  %v1123_v30 = vpop.f32.mrb[43].mxu1  ;;  %v8173_v14 = vcombine.high %v1593_v0, %v1597_v1  ;;  %v1604_v18 = vld [vmem:[#allocation12 + $0x4f0] sm:$0xff]  ;;  %v1601_v20 = vld [vmem:[#allocation12 + $0x4d8] sm:$0xff] }
 0x2ff   :  { %v8181_v30 = vcombine.high %v1601_v20, %v1605_v23 }
 0x300   :  { %v1410_v31 = vadd.f32 %v10376_v34, %v1387_v21  ;;  %v1388_v25 = vadd.f32 %v10333_v33, %v1122_v24  ;;  %v8172_v21 = vcombine.low %v1593_v0, %v1597_v1 }
 0x302   :  { %v1411_v35 = vadd.f32 %v10376_v34, %v1388_v25  ;;  %v1426_v46 = vmax.f32 %v1410_v31, 0.0 }
 0x303   :  { %v1126_v42 = vpop.f32.mrb[44].mxu1 }
 0x304   :  { %v1427_v47 = vmax.f32 %v1411_v35, 0.0  ;;  %v1127_v50 = vadd.f32 %v1126_v42, %v10335_v36  ;;  %v1128_v51 = vpop.f32.mrb[45].mxu1  ;;  %v8162_v36 = vcombine.low %v1584_v38, %v1588_v39  ;;  %v1612_v39 = vld [vmem:[#allocation12 + $0x530] sm:$0xff]  ;;  %v1613_v42 = vld [vmem:[#allocation12 + $0x538] sm:$0xff] }
 0x305   :  { %v1129_v29 = vpop.f32.mrb[46].mxu1 }
 0x306   :  { %v10400_v32 = vpack.c.bf16 %v1427_v47, %v1426_v46  ;;  %v1389_v12 = vadd.f32 %v10337_v37, %v1127_v50  ;;  %v1130_v33 = vadd.f32 %v1129_v29, %v10339_v40  ;;  %v1131_v58 = vpop.f32.mrb[47].mxu1  ;;  %v8164_v37 = vcombine.low %v1585_v43, %v1589_v28  ;;  %v1600_v40 = vld [vmem:[#allocation12 + $0x4d0] sm:$0xff] }
 0x307   :  { %v8179_v24 = vcombine.high %v1600_v40, %v1604_v18  ;;  %v8178_v46 = vcombine.low %v1600_v40, %v1604_v18  ;;  %v8180_v47 = vcombine.low %v1601_v20, %v1605_v23  ;;  %v1616_v50 = vld [vmem:[#allocation12 + $0x550] sm:$0xff]  ;;  %v1629_v18 = vld [vmem:[#allocation12 + $0x5b8] sm:$0xff] }
 0x308   :  { %v1412_v15 = vadd.f32 %v10376_v34, %v1389_v12  ;;  %v1390_v52 = vadd.f32 %v10341_v41, %v1130_v33  ;;  %1991 = vmatmul.mubr.bf16.vlgmr.msra.gmra.mrb[64].mxu1 %v10400_v32  ;;  %2034 = vmatmul.mubr.bf16.vlgmr.msra.gmra.mrb[48].mxu0 %v10400_v32  ;;  %v8171_v41 = vcombine.high %v1592_v11, %v1596_v17  ;;  %v1620_v29 = vld [vmem:[#allocation12 + $0x570] sm:$0xff]  ;;  %v1621_v12 = vld [vmem:[#allocation12 + $0x578] sm:$0xff] }
 0x309   :  { %2045 = vmatpush1.bf16.msra.mxu1 %v8154_v8  ;;  %2088 = vmatpush1.bf16.msra.mxu0 %v8156_v9  ;;  %v8170_v8 = vcombine.low %v1592_v11, %v1596_v17 }
 0x30a   :  { %v1413_v5 = vadd.f32 %v10376_v34, %v1390_v52  ;;  %2046 = vmatprep.subr.bf16.mxu1 %v8163_v57  ;;  %2089 = vmatprep.subr.bf16.mxu0 %v8165_v61  ;;  %v1428_v53 = vmax.f32 %v1412_v15, 0.0  ;;  %v1617_v57 = vld [vmem:[#allocation12 + $0x558] sm:$0xff]  ;;  %v8195_v15 = vcombine.high %v1616_v50, %v1620_v29 }
 0x30b   :  { %v1134_v26 = vpop.f32.mrb[48].mxu1  ;;  %2076 = vmatprep.mubr.bf16.mxu1 %v10210_v16  ;;  %2119 = vmatprep.mubr.bf16.mxu0 %v10210_v16  ;;  %v1608_v16 = vld [vmem:[#allocation12 + $0x510] sm:$0xff]  ;;  %v8197_v52 = vcombine.high %v1617_v57, %v1621_v12 }
 0x30c   :  { %v1429_v3 = vmax.f32 %v1413_v5, 0.0  ;;  %v1135_v6 = vadd.f32 %v1134_v26, %v10343_v44  ;;  %v1136_v7 = vpop.f32.mrb[49].mxu1  ;;  %v1609_v44 = vld [vmem:[#allocation12 + $0x518] sm:$0xff]  ;;  %v8186_v17 = vcombine.low %v1608_v16, %v1612_v39  ;;  %v8194_v26 = vcombine.low %v1616_v50, %v1620_v29  ;;  %v1450_v50 = vld [vmem:[#allocation12 + $0x20] sm:$0xff] }
 0x30d   :  { %2047 = vmatpush1.bf16.msra.mxu1 %v8162_v36  ;;  %2090 = vmatpush1.bf16.msra.mxu0 %v8164_v37  ;;  %v1137_v9 = vpop.f32.mrb[50].mxu1  ;;  %v8189_v51 = vcombine.high %v1609_v44, %v1613_v42  ;;  %v8188_v1 = vcombine.low %v1609_v44, %v1613_v42  ;;  %v1636_v7 = vld [vmem:[#allocation12 + $0x5f0] sm:$0xff] }
 0x30e   :  { %v10418_v31 = vpack.c.bf16 %v1429_v3, %v1428_v53  ;;  %v1391_v25 = vadd.f32 %v10345_v45, %v1135_v6  ;;  %v1138_v35 = vadd.f32 %v1137_v9, %v10347_v48  ;;  %v1139_v38 = vpop.f32.mrb[51].mxu1  ;;  %2048 = vmatprep.subr.bf16.mxu1 %v8171_v41  ;;  %2091 = vmatprep.subr.bf16.mxu0 %v8173_v14  ;;  %v1624_v41 = vld [vmem:[#allocation12 + $0x590] sm:$0xff]  ;;  %v1637_v9 = vld [vmem:[#allocation12 + $0x5f8] sm:$0xff] }
 0x30f   :  { %v8187_v48 = vcombine.high %v1608_v16, %v1612_v39  ;;  %v1628_v14 = vld [vmem:[#allocation12 + $0x5b0] sm:$0xff]  ;;  %v8196_v53 = vcombine.low %v1617_v57, %v1621_v12  ;;  %v1454_v12 = vld [vmem:[#allocation12 + $0x40] sm:$0xff] }
 0x310   :  { %v1414_v43 = vadd.f32 %v10376_v34, %v1391_v25  ;;  %v1392_v28 = vadd.f32 %v10349_v49, %v1138_v35  ;;  %v1632_v3 = vld [vmem:[#allocation12 + $0x5d0] sm:$0xff]  ;;  %v8202_v35 = vcombine.low %v1624_v41, %v1628_v14 }
 0x311   :  { %2049 = vmatpush1.bf16.msra.mxu1 %v8170_v8  ;;  %2092 = vmatpush1.bf16.msra.mxu0 %v8172_v21  ;;  %v1633_v8 = vld [vmem:[#allocation12 + $0x5d8] sm:$0xff]  ;;  %v8211_v39 = vcombine.high %v1632_v3, %v1636_v7  ;;  %v8210_v29 = vcombine.low %v1632_v3, %v1636_v7  ;;  %v1470_v7 = vld [vmem:[#allocation12 + $0xc0] sm:$0xff] }
 0x312   :  { %v1415_v45 = vadd.f32 %v10376_v34, %v1392_v28  ;;  %2050 = vmatprep.subr.bf16.mxu1 %v8179_v24  ;;  %2093 = vmatprep.subr.bf16.mxu0 %v8181_v30  ;;  %v1430_v58 = vmax.f32 %v1414_v43, 0.0  ;;  %v8213_v44 = vcombine.high %v1633_v8, %v1637_v9  ;;  %v8212_v57 = vcombine.low %v1633_v8, %v1637_v9  ;;  %v1474_v8 = vld [vmem:[#allocation12 + $0xe0] sm:$0xff]  ;;  %v1471_v9 = vld [vmem:[#allocation12 + $0xc8] sm:$0xff] }
 0x313   :  { %v1142_v33 = vpop.f32.mrb[52].mxu1 }
 0x314   :  { %v1431_v61 = vmax.f32 %v1415_v45, 0.0  ;;  %v1143_v11 = vadd.f32 %v1142_v33, %v10351_v55  ;;  %v1144_v49 = vpop.f32.mrb[53].mxu1  ;;  %v1625_v55 = vld [vmem:[#allocation12 + $0x598] sm:$0xff]  ;;  %v1451_v45 = vld [vmem:[#allocation12 + $0x28] sm:$0xff] }
 0x315   :  { %2051 = vmatpush1.bf16.msra.mxu1 %v8178_v46  ;;  %2094 = vmatpush1.bf16.msra.mxu0 %v8180_v47  ;;  %v1145_v0 = vpop.f32.mrb[54].mxu1  ;;  %v8205_v6 = vcombine.high %v1625_v55, %v1629_v18  ;;  %v8204_v16 = vcombine.low %v1625_v55, %v1629_v18  ;;  %v1446_v47 = vld [vmem:[#allocation12] sm:$0xff] }
 0x316   :  { %v10426_v36 = vpack.c.bf16 %v1431_v61, %v1430_v58  ;;  %v1393_v37 = vadd.f32 %v10353_v56, %v1143_v11  ;;  %v1146_v40 = vadd.f32 %v1145_v0, %v10355_v59  ;;  %v1147_v5 = vpop.f32.mrb[55].mxu1  ;;  %2052 = vmatprep.subr.bf16.mxu1 %v8187_v48  ;;  %2095 = vmatprep.subr.bf16.mxu0 %v8189_v51  ;;  %v1458_v58 = vld [vmem:[#allocation12 + $0x60] sm:$0xff]  ;;  %v1455_v61 = vld [vmem:[#allocation12 + $0x48] sm:$0xff] }
 0x317   :  { %v8203_v59 = vcombine.high %v1624_v41, %v1628_v14  ;;  %v1459_v11 = vld [vmem:[#allocation12 + $0x68] sm:$0xff] }
 0x318   :  { %v1416_v20 = vadd.f32 %v10376_v34, %v1393_v37  ;;  %v1394_v23 = vadd.f32 %v10357_v60, %v1146_v40  ;;  %v8223_v40 = vcombine.high %v1454_v12, %v1458_v58  ;;  %v8225_v5 = vcombine.high %v1455_v61, %v1459_v11 }
 0x319   :  { %2053 = vmatpush1.bf16.msra.mxu1 %v8186_v17  ;;  %2096 = vmatpush1.bf16.msra.mxu0 %v8188_v1 }
 0x31a   :  { %v1417_v56 = vadd.f32 %v10376_v34, %v1394_v23  ;;  %2054 = vmatprep.subr.bf16.mxu1 %v8195_v15  ;;  %2097 = vmatprep.subr.bf16.mxu0 %v8197_v52  ;;  %v1432_v24 = vmax.f32 %v1416_v20, 0.0  ;;  %v8214_v15 = vcombine.low %v1446_v47, %v1450_v50  ;;  %v1462_v20 = vld [vmem:[#allocation12 + $0x80] sm:$0xff] }
 0x31b   :  { %v1150_v21 = vpop.f32.mrb[56].mxu1  ;;  %v1466_v23 = vld [vmem:[#allocation12 + $0xa0] sm:$0xff] }
 0x31c   :  { %v1433_v30 = vmax.f32 %v1417_v56, 0.0  ;;  %v1151_v25 = vadd.f32 %v1150_v21, %v10359_v62  ;;  %v1152_v60 = vpop.f32.mrb[57].mxu1  ;;  %v1447_v62 = vld [vmem:[#allocation12 + $0x8] sm:$0xff]  ;;  %v8224_v56 = vcombine.low %v1455_v61, %v1459_v11 }
 0x31d   :  { %2055 = vmatpush1.bf16.msra.mxu1 %v8194_v26  ;;  %2098 = vmatpush1.bf16.msra.mxu0 %v8196_v53  ;;  %v1153_v38 = vpop.f32.mrb[58].mxu1  ;;  %v8217_v33 = vcombine.high %v1447_v62, %v1451_v45  ;;  %v8216_v37 = vcombine.low %v1447_v62, %v1451_v45  ;;  %v1467_v26 = vld [vmem:[#allocation12 + $0xa8] sm:$0xff]  ;;  %v8239_v60 = vcombine.high %v1470_v7, %v1474_v8  ;;  %v1490_v62 = vld [vmem:[#allocation12 + $0x160] sm:$0xff] }
 0x31e   :  { %v10434_v42 = vpack.c.bf16 %v1433_v30, %v1432_v24  ;;  %v1395_v43 = vadd.f32 %v10361_v63, %v1151_v25  ;;  %v1154_v28 = vadd.f32 %v1153_v38, %v10363_v2  ;;  %v1155_v46 = vpop.f32.mrb[59].mxu1  ;;  %2056 = vmatprep.subr.bf16.mxu1 %v8203_v59  ;;  %2099 = vmatprep.subr.bf16.mxu0 %v8205_v6  ;;  %v1475_v21 = vld [vmem:[#allocation12 + $0xe8] sm:$0xff]  ;;  %v1478_v38 = vld [vmem:[#allocation12 + $0x100] sm:$0xff] }
 0x31f   :  { %v8215_v2 = vcombine.high %v1446_v47, %v1450_v50  ;;  %v8231_v59 = vcombine.high %v1462_v20, %v1466_v23  ;;  %v10451_v24 = vld [vmem:[#allocation3] sm:$0xff]  ;;  %v8230_v30 = vcombine.low %v1462_v20, %v1466_v23  ;;  %v1486_v50 = vld [vmem:[#allocation12 + $0x140] sm:$0xff]  ;;  %v1453_v20 = vld [vmem:[#allocation12 + $0x38] sm:$0xff] }
 0x320   :  { %v1418_v48 = vadd.f32 %v10376_v34, %v1395_v43  ;;  %v1396_v51 = vadd.f32 %v10365_v4, %v1154_v28  ;;  %v8238_v43 = vcombine.low %v1470_v7, %v1474_v8  ;;  %v8240_v28 = vcombine.low %v1471_v9, %v1475_v21  ;;  %v1487_v45 = vld [vmem:[#allocation12 + $0x148] sm:$0xff] }
 0x321   :  { %2057 = vmatpush1.bf16.msra.mxu1 %v8202_v35  ;;  %2100 = vmatpush1.bf16.msra.mxu0 %v8204_v16  ;;  %v8241_v35 = vcombine.high %v1471_v9, %v1475_v21  ;;  %v1482_v16 = vld [vmem:[#allocation12 + $0x120] sm:$0xff]  ;;  %v8254_v61 = vcombine.low %v1486_v50, %v1490_v62  ;;  %v1464_v9 = vld [vmem:[#allocation12 + $0x90] sm:$0xff] }
 0x322   :  { %v1419_v63 = vadd.f32 %v10376_v34, %v1396_v51  ;;  %2058 = vmatprep.subr.bf16.mxu1 %v8211_v39  ;;  %2101 = vmatprep.subr.bf16.mxu0 %v8213_v44  ;;  %v1434_v17 = vmax.f32 %v1418_v48, 0.0  ;;  %v1479_v39 = vld [vmem:[#allocation12 + $0x108] sm:$0xff]  ;;  %v8247_v46 = vcombine.high %v1478_v38, %v1482_v16  ;;  %v8246_v51 = vcombine.low %v1478_v38, %v1482_v16  ;;  %v1468_v21 = vld [vmem:[#allocation12 + $0xb0] sm:$0xff] }
 0x323   :  { %v1158_v49 = vpop.f32.mrb[60].mxu1  ;;  %v1483_v44 = vld [vmem:[#allocation12 + $0x128] sm:$0xff]  ;;  %v1472_v38 = vld [vmem:[#allocation12 + $0xd0] sm:$0xff] }
 0x324   :  { %v1435_v0 = vmax.f32 %v1419_v63, 0.0  ;;  %v1159_v1 = vadd.f32 %v1158_v49, %v10367_v10  ;;  %v1160_v4 = vpop.f32.mrb[61].mxu1  ;;  %v1463_v10 = vld [vmem:[#allocation12 + $0x88] sm:$0xff]  ;;  %v8249_v47 = vcombine.high %v1479_v39, %v1483_v44  ;;  %v1494_v63 = vld [vmem:[#allocation12 + $0x180] sm:$0xff]  ;;  %v1476_v16 = vld [vmem:[#allocation12 + $0xf0] sm:$0xff] }
 0x325   :  { %2059 = vmatpush1.bf16.msra.mxu1 %v8210_v29  ;;  %2102 = vmatpush1.bf16.msra.mxu0 %v8212_v57  ;;  %v1161_v52 = vpop.f32.mrb[62].mxu1  ;;  %v8233_v6 = vcombine.high %v1463_v10, %v1467_v26  ;;  %v1491_v48 = vld [vmem:[#allocation12 + $0x168] sm:$0xff]  ;;  %v8248_v29 = vcombine.low %v1479_v39, %v1483_v44  ;;  %v8255_v57 = vcombine.high %v1486_v50, %v1490_v62  ;;  %v1473_v39 = vld [vmem:[#allocation12 + $0xd8] sm:$0xff]  ;;  %v1480_v50 = vld [vmem:[#allocation12 + $0x110] sm:$0xff] }
 0x326   :  { %v10442_v41 = vpack.c.bf16 %v1435_v0, %v1434_v17  ;;  %v1162_v14 = vadd.f32 %v1161_v52, %v10371_v19  ;;  %v1397_v55 = vadd.f32 %v10369_v13, %v1159_v1  ;;  %v1163_v18 = vpop.f32.mrb[63].mxu1  ;;  %2450 = vmatprep.subr.bf16.mxu1 %v8215_v2  ;;  %2493 = vmatprep.subr.bf16.mxu0 %v8217_v33  ;;  %v1498_v2 = vld [vmem:[#allocation12 + $0x1a0] sm:$0xff]  ;;  %v1495_v33 = vld [vmem:[#allocation12 + $0x188] sm:$0xff]  ;;  %v1477_v44 = vld [vmem:[#allocation12 + $0xf8] sm:$0xff] }
 0x327   :  { %v8222_v19 = vcombine.low %v1454_v12, %v1458_v58  ;;  %v8257_v12 = vcombine.high %v1487_v45, %v1491_v48  ;;  %v1499_v58 = vld [vmem:[#allocation12 + $0x1a8] sm:$0xff]  ;;  %v8256_v11 = vcombine.low %v1487_v45, %v1491_v48  ;;  %v8263_v49 = vcombine.high %v1494_v63, %v1498_v2  ;;  %v1502_v0 = vld [vmem:[#allocation12 + $0x1c0] sm:$0xff]  ;;  %v1449_v18 = vld [vmem:[#allocation12 + $0x18] sm:$0xff] }
 0x328   :  { %v1420_v53 = vadd.f32 %v10376_v34, %v1397_v55  ;;  %v1398_v3 = vadd.f32 %v10373_v22, %v1162_v14  ;;  %2077 = vmatmul.mubr.bf16.vlgmr.msra.gmra.mrb[68].mxu1 %v10400_v32  ;;  %2120 = vmatmul.mubr.bf16.vlgmr.msra.gmra.mrb[52].mxu0 %v10400_v32  ;;  %v8265_v17 = vcombine.high %v1495_v33, %v1499_v58  ;;  %v1506_v1 = vld [vmem:[#allocation12 + $0x1e0] sm:$0xff]  ;;  %v1503_v4 = vld [vmem:[#allocation12 + $0x1c8] sm:$0xff]  ;;  %v1448_v14 = vld [vmem:[#allocation12 + $0x10] sm:$0xff] }
 0x329   :  { %2451 = vmatpush1.bf16.msra.mxu1 %v8214_v15  ;;  %2494 = vmatpush1.bf16.msra.mxu0 %v8216_v37  ;;  %v1507_v15 = vld [vmem:[#allocation12 + $0x1e8] sm:$0xff]  ;;  %v8262_v52 = vcombine.low %v1494_v63, %v1498_v2  ;;  %v8264_v37 = vcombine.low %v1495_v33, %v1499_v58  ;;  %v1452_v55 = vld [vmem:[#allocation12 + $0x30] sm:$0xff]  ;;  %v8270_v23 = vcombine.low %v1502_v0, %v1506_v1  ;;  %v1481_v45 = vld [vmem:[#allocation12 + $0x118] sm:$0xff] }
 0x32a   :  { %v1421_v13 = vadd.f32 %v10376_v34, %v1398_v3  ;;  %2452 = vmatprep.subr.bf16.mxu1 %v8223_v40  ;;  %2495 = vmatprep.subr.bf16.mxu0 %v8225_v5  ;;  %v1436_v22 = vmax.f32 %v1420_v53, 0.0  ;;  %v8232_v34 = vcombine.low %v1463_v10, %v1467_v26  ;;  %v8271_v40 = vcombine.high %v1502_v0, %v1506_v1  ;;  %v1456_v3 = vld [vmem:[#allocation12 + $0x50] sm:$0xff]  ;;  %v1485_v48 = vld [vmem:[#allocation12 + $0x138] sm:$0xff] }
 0x32b   :  { %2482 = vmatprep.mubr.bf16.mxu1 %v10451_v24  ;;  %2525 = vmatprep.mubr.bf16.mxu0 %v10451_v24  ;;  %v8273_v5 = vcombine.high %v1503_v4, %v1507_v15  ;;  %v8272_v10 = vcombine.low %v1503_v4, %v1507_v15  ;;  %v8219_v26 = vcombine.high %v1448_v14, %v1452_v55  ;;  %v1484_v62 = vld [vmem:[#allocation12 + $0x130] sm:$0xff]  ;;  %v1489_v33 = vld [vmem:[#allocation12 + $0x158] sm:$0xff] }
 0x32c   :  { %v1437_v32 = vmax.f32 %v1421_v13, 0.0  ;;  %v8221_v53 = vcombine.high %v1449_v18, %v1453_v20  ;;  %v1461_v13 = vld [vmem:[#allocation12 + $0x78] sm:$0xff]  ;;  %v1488_v63 = vld [vmem:[#allocation12 + $0x150] sm:$0xff] }
 0x32d   :  { %2453 = vmatpush1.bf16.msra.mxu1 %v8222_v19  ;;  %2496 = vmatpush1.bf16.msra.mxu0 %v8224_v56  ;;  %v1460_v19 = vld [vmem:[#allocation12 + $0x70] sm:$0xff]  ;;  %v1457_v56 = vld [vmem:[#allocation12 + $0x58] sm:$0xff] }
 0x32e   :  { %v10455_v25 = vpack.c.bf16 %v1437_v32, %v1436_v22  ;;  %2454 = vmatprep.subr.bf16.mxu1 %v8231_v59  ;;  %2497 = vmatprep.subr.bf16.mxu0 %v8233_v6  ;;  %v8218_v59 = vcombine.low %v1448_v14, %v1452_v55  ;;  %v8220_v6 = vcombine.low %v1449_v18, %v1453_v20  ;;  %v1465_v22 = vld [vmem:[#allocation12 + $0x98] sm:$0xff]  ;;  %v1492_v2 = vld [vmem:[#allocation12 + $0x170] sm:$0xff] }
 0x32f   :  { %v8227_v7 = vcombine.high %v1456_v3, %v1460_v19  ;;  %v8229_v8 = vcombine.high %v1457_v56, %v1461_v13  ;;  %v1469_v32 = vld [vmem:[#allocation12 + $0xb8] sm:$0xff]  ;;  %v1496_v0 = vld [vmem:[#allocation12 + $0x190] sm:$0xff] }
 0x330   :  { %v1493_v58 = vld [vmem:[#allocation12 + $0x178] sm:$0xff]  ;;  %v1500_v1 = vld [vmem:[#allocation12 + $0x1b0] sm:$0xff] }
 0x331   :  { %2455 = vmatpush1.bf16.msra.mxu1 %v8230_v30  ;;  %2498 = vmatpush1.bf16.msra.mxu0 %v8232_v34  ;;  %v8226_v30 = vcombine.low %v1456_v3, %v1460_v19  ;;  %v8228_v34 = vcombine.low %v1457_v56, %v1461_v13  ;;  %v1497_v4 = vld [vmem:[#allocation12 + $0x198] sm:$0xff]  ;;  %v1504_v14 = vld [vmem:[#allocation12 + $0x1d0] sm:$0xff]  ;;  %v2622_v3 = vld [vmem:[#allocation12 + $0x600] sm:$0xff] }
 0x332   :  { %2456 = vmatprep.subr.bf16.mxu1 %v8239_v60  ;;  %2499 = vmatprep.subr.bf16.mxu0 %v8241_v35  ;;  %v8235_v60 = vcombine.high %v1464_v9, %v1468_v21  ;;  %v8237_v35 = vcombine.high %v1465_v22, %v1469_v32  ;;  %v1501_v15 = vld [vmem:[#allocation12 + $0x1b8] sm:$0xff]  ;;  %v1508_v55 = vld [vmem:[#allocation12 + $0x1f0] sm:$0xff]  ;;  %v2626_v19 = vld [vmem:[#allocation12 + $0x620] sm:$0xff] }
 0x333   :  { %v1505_v18 = vld [vmem:[#allocation12 + $0x1d8] sm:$0xff]  ;;  %v2623_v56 = vld [vmem:[#allocation12 + $0x608] sm:$0xff] }
 0x334   :  { %v1509_v20 = vld [vmem:[#allocation12 + $0x1f8] sm:$0xff]  ;;  %v2627_v13 = vld [vmem:[#allocation12 + $0x628] sm:$0xff] }
 0x335   :  { %2457 = vmatpush1.bf16.msra.mxu1 %v8238_v43  ;;  %2500 = vmatpush1.bf16.msra.mxu0 %v8240_v28  ;;  %v8234_v43 = vcombine.low %v1464_v9, %v1468_v21  ;;  %v8236_v28 = vcombine.low %v1465_v22, %v1469_v32  ;;  %v2630_v9 = vld [vmem:[#allocation12 + $0x640] sm:$0xff]  ;;  %v2631_v22 = vld [vmem:[#allocation12 + $0x648] sm:$0xff] }
 0x336   :  { %2458 = vmatprep.subr.bf16.mxu1 %v8247_v46  ;;  %2501 = vmatprep.subr.bf16.mxu0 %v8249_v47  ;;  %v8243_v46 = vcombine.high %v1472_v38, %v1476_v16  ;;  %v8245_v47 = vcombine.high %v1473_v39, %v1477_v44  ;;  %v2634_v21 = vld [vmem:[#allocation12 + $0x660] sm:$0xff]  ;;  %v2635_v32 = vld [vmem:[#allocation12 + $0x668] sm:$0xff] }
 0x339   :  { %2459 = vmatpush1.bf16.msra.mxu1 %v8246_v51  ;;  %2502 = vmatpush1.bf16.msra.mxu0 %v8248_v29  ;;  %v8242_v51 = vcombine.low %v1472_v38, %v1476_v16  ;;  %v8244_v29 = vcombine.low %v1473_v39, %v1477_v44  ;;  %v2638_v38 = vld [vmem:[#allocation12 + $0x680] sm:$0xff]  ;;  %v2639_v39 = vld [vmem:[#allocation12 + $0x688] sm:$0xff] }
 0x33a   :  { %2460 = vmatprep.subr.bf16.mxu1 %v8255_v57  ;;  %2503 = vmatprep.subr.bf16.mxu0 %v8257_v12  ;;  %v8251_v57 = vcombine.high %v1480_v50, %v1484_v62  ;;  %v8253_v12 = vcombine.high %v1481_v45, %v1485_v48  ;;  %v2642_v16 = vld [vmem:[#allocation12 + $0x6a0] sm:$0xff]  ;;  %v2643_v44 = vld [vmem:[#allocation12 + $0x6a8] sm:$0xff] }
 0x33d   :  { %2461 = vmatpush1.bf16.msra.mxu1 %v8254_v61  ;;  %2504 = vmatpush1.bf16.msra.mxu0 %v8256_v11  ;;  %v8250_v61 = vcombine.low %v1480_v50, %v1484_v62  ;;  %v8252_v11 = vcombine.low %v1481_v45, %v1485_v48  ;;  %v2646_v50 = vld [vmem:[#allocation12 + $0x6c0] sm:$0xff]  ;;  %v2647_v45 = vld [vmem:[#allocation12 + $0x6c8] sm:$0xff] }
 0x33e   :  { %2462 = vmatprep.subr.bf16.mxu1 %v8263_v49  ;;  %2505 = vmatprep.subr.bf16.mxu0 %v8265_v17  ;;  %v8259_v49 = vcombine.high %v1488_v63, %v1492_v2  ;;  %v8261_v17 = vcombine.high %v1489_v33, %v1493_v58  ;;  %v2650_v62 = vld [vmem:[#allocation12 + $0x6e0] sm:$0xff]  ;;  %v2651_v48 = vld [vmem:[#allocation12 + $0x6e8] sm:$0xff] }
 0x341   :  { %2463 = vmatpush1.bf16.msra.mxu1 %v8262_v52  ;;  %2506 = vmatpush1.bf16.msra.mxu0 %v8264_v37  ;;  %v8258_v52 = vcombine.low %v1488_v63, %v1492_v2  ;;  %v8260_v37 = vcombine.low %v1489_v33, %v1493_v58  ;;  %v2658_v63 = vld [vmem:[#allocation12 + $0x720] sm:$0xff]  ;;  %v2655_v2 = vld [vmem:[#allocation12 + $0x708] sm:$0xff]  ;;  %v8302_v58 = vcombine.low %v2646_v50, %v2650_v62 }
 0x342   :  { %2464 = vmatprep.subr.bf16.mxu1 %v8271_v40  ;;  %2507 = vmatprep.subr.bf16.mxu0 %v8273_v5  ;;  %v8267_v40 = vcombine.high %v1496_v0, %v1500_v1  ;;  %v8269_v5 = vcombine.high %v1497_v4, %v1501_v15  ;;  %v2659_v33 = vld [vmem:[#allocation12 + $0x728] sm:$0xff] }
 0x345   :  { %2465 = vmatpush1.bf16.msra.mxu1 %v8270_v23  ;;  %2508 = vmatpush1.bf16.msra.mxu0 %v8272_v10  ;;  %v8266_v23 = vcombine.low %v1496_v0, %v1500_v1  ;;  %v8268_v10 = vcombine.low %v1497_v4, %v1501_v15  ;;  %v2666_v0 = vld [vmem:[#allocation12 + $0x760] sm:$0xff]  ;;  %v2663_v1 = vld [vmem:[#allocation12 + $0x748] sm:$0xff] }
 0x346   :  { %2536 = vmatprep.subr.bf16.mxu1 %v8219_v26  ;;  %2579 = vmatprep.subr.bf16.mxu0 %v8221_v53  ;;  %v8275_v26 = vcombine.high %v1504_v14, %v1508_v55  ;;  %v8277_v53 = vcombine.high %v1505_v18, %v1509_v20  ;;  %v2667_v4 = vld [vmem:[#allocation12 + $0x768] sm:$0xff] }
 0x348   :  { %2483 = vmatmul.mubr.bf16.vlgmr.msra.gmra.mrb[64].mxu1 %v10384_v54  ;;  %2526 = vmatmul.mubr.bf16.vlgmr.msra.gmra.mrb[48].mxu0 %v10384_v54 }
 0x349   :  { %2537 = vmatpush1.bf16.msra.mxu1 %v8218_v59  ;;  %2580 = vmatpush1.bf16.msra.mxu0 %v8220_v6  ;;  %v8274_v59 = vcombine.low %v1504_v14, %v1508_v55  ;;  %v8276_v6 = vcombine.low %v1505_v18, %v1509_v20  ;;  %v2674_v14 = vld [vmem:[#allocation12 + $0x7a0] sm:$0xff]  ;;  %v2671_v55 = vld [vmem:[#allocation12 + $0x788] sm:$0xff] }
 0x34a   :  { %2538 = vmatprep.subr.bf16.mxu1 %v8227_v7  ;;  %2581 = vmatprep.subr.bf16.mxu0 %v8229_v8  ;;  %v8279_v7 = vcombine.high %v2622_v3, %v2626_v19  ;;  %v8281_v8 = vcombine.high %v2623_v56, %v2627_v13  ;;  %v2675_v18 = vld [vmem:[#allocation12 + $0x7a8] sm:$0xff] }
 0x34b   :  { %2568 = vmatprep.mubr.bf16.mxu1 %v10451_v24  ;;  %2611 = vmatprep.mubr.bf16.mxu0 %v10451_v24 }
 0x34d   :  { %2539 = vmatpush1.bf16.msra.mxu1 %v8226_v30  ;;  %2582 = vmatpush1.bf16.msra.mxu0 %v8228_v34  ;;  %v8278_v30 = vcombine.low %v2622_v3, %v2626_v19  ;;  %v8280_v34 = vcombine.low %v2623_v56, %v2627_v13  ;;  %v2682_v3 = vld [vmem:[#allocation12 + $0x7e0] sm:$0xff]  ;;  %v2679_v19 = vld [vmem:[#allocation12 + $0x7c8] sm:$0xff] }
 0x34e   :  { %2540 = vmatprep.subr.bf16.mxu1 %v8235_v60  ;;  %2583 = vmatprep.subr.bf16.mxu0 %v8237_v35  ;;  %v8287_v60 = vcombine.high %v2630_v9, %v2634_v21  ;;  %v8289_v35 = vcombine.high %v2631_v22, %v2635_v32  ;;  %v2683_v56 = vld [vmem:[#allocation12 + $0x7e8] sm:$0xff] }
 0x351   :  { %2541 = vmatpush1.bf16.msra.mxu1 %v8234_v43  ;;  %2584 = vmatpush1.bf16.msra.mxu0 %v8236_v28  ;;  %v8286_v43 = vcombine.low %v2630_v9, %v2634_v21  ;;  %v8288_v28 = vcombine.low %v2631_v22, %v2635_v32  ;;  %v2628_v9 = vld [vmem:[#allocation12 + $0x630] sm:$0xff]  ;;  %v2625_v21 = vld [vmem:[#allocation12 + $0x618] sm:$0xff] }
 0x352   :  { %2542 = vmatprep.subr.bf16.mxu1 %v8243_v46  ;;  %2585 = vmatprep.subr.bf16.mxu0 %v8245_v47  ;;  %v8295_v46 = vcombine.high %v2638_v38, %v2642_v16  ;;  %v8297_v47 = vcombine.high %v2639_v39, %v2643_v44  ;;  %v2629_v22 = vld [vmem:[#allocation12 + $0x638] sm:$0xff] }
 0x355   :  { %2543 = vmatpush1.bf16.msra.mxu1 %v8242_v51  ;;  %2586 = vmatpush1.bf16.msra.mxu0 %v8244_v29  ;;  %v8294_v51 = vcombine.low %v2638_v38, %v2642_v16  ;;  %v8303_v29 = vcombine.high %v2646_v50, %v2650_v62  ;;  %v2636_v38 = vld [vmem:[#allocation12 + $0x670] sm:$0xff]  ;;  %v2633_v16 = vld [vmem:[#allocation12 + $0x658] sm:$0xff] }
 0x356   :  { %2544 = vmatprep.subr.bf16.mxu1 %v8251_v57  ;;  %2587 = vmatprep.subr.bf16.mxu0 %v8253_v12  ;;  %v8305_v57 = vcombine.high %v2647_v45, %v2651_v48  ;;  %v2654_v12 = vld [vmem:[#allocation12 + $0x700] sm:$0xff]  ;;  %v2644_v50 = vld [vmem:[#allocation12 + $0x6b0] sm:$0xff]  ;;  %v2641_v62 = vld [vmem:[#allocation12 + $0x698] sm:$0xff] }
 0x357   :  { %v8310_v15 = vcombine.low %v2654_v12, %v2658_v63 }
 0x359   :  { %2545 = vmatpush1.bf16.msra.mxu1 %v8250_v61  ;;  %2588 = vmatpush1.bf16.msra.mxu0 %v8252_v11  ;;  %v8304_v61 = vcombine.low %v2647_v45, %v2651_v48  ;;  %v8311_v11 = vcombine.high %v2654_v12, %v2658_v63  ;;  %v2645_v45 = vld [vmem:[#allocation12 + $0x6b8] sm:$0xff]  ;;  %v2652_v12 = vld [vmem:[#allocation12 + $0x6f0] sm:$0xff] }
 0x35a   :  { %2546 = vmatprep.subr.bf16.mxu1 %v8259_v49  ;;  %2589 = vmatprep.subr.bf16.mxu0 %v8261_v17  ;;  %v8313_v49 = vcombine.high %v2655_v2, %v2659_v33  ;;  %v2662_v17 = vld [vmem:[#allocation12 + $0x740] sm:$0xff]  ;;  %v2649_v63 = vld [vmem:[#allocation12 + $0x6d8] sm:$0xff] }
 0x35b   :  { %v8318_v20 = vcombine.low %v2662_v17, %v2666_v0 }
 0x35d   :  { %2547 = vmatpush1.bf16.msra.mxu1 %v8258_v52  ;;  %2590 = vmatpush1.bf16.msra.mxu0 %v8260_v37  ;;  %v8312_v52 = vcombine.low %v2655_v2, %v2659_v33  ;;  %v8319_v37 = vcombine.high %v2662_v17, %v2666_v0  ;;  %v2653_v2 = vld [vmem:[#allocation12 + $0x6f8] sm:$0xff]  ;;  %v2660_v17 = vld [vmem:[#allocation12 + $0x730] sm:$0xff] }
 0x35e   :  { %2548 = vmatprep.subr.bf16.mxu1 %v8267_v40  ;;  %2591 = vmatprep.subr.bf16.mxu0 %v8269_v5  ;;  %v8321_v40 = vcombine.high %v2663_v1, %v2667_v4  ;;  %v2670_v5 = vld [vmem:[#allocation12 + $0x780] sm:$0xff]  ;;  %v2657_v0 = vld [vmem:[#allocation12 + $0x718] sm:$0xff] }
 0x35f   :  { %v8326_v13 = vcombine.low %v2670_v5, %v2674_v14 }
 0x361   :  { %2549 = vmatpush1.bf16.msra.mxu1 %v8266_v23  ;;  %2592 = vmatpush1.bf16.msra.mxu0 %v8268_v10  ;;  %v8320_v23 = vcombine.low %v2663_v1, %v2667_v4  ;;  %v8327_v10 = vcombine.high %v2670_v5, %v2674_v14  ;;  %v2661_v1 = vld [vmem:[#allocation12 + $0x738] sm:$0xff]  ;;  %v2668_v5 = vld [vmem:[#allocation12 + $0x770] sm:$0xff] }
 0x362   :  { %2550 = vmatprep.subr.bf16.mxu1 %v8275_v26  ;;  %2593 = vmatprep.subr.bf16.mxu0 %v8277_v53  ;;  %v8329_v26 = vcombine.high %v2671_v55, %v2675_v18  ;;  %v2678_v53 = vld [vmem:[#allocation12 + $0x7c0] sm:$0xff]  ;;  %v2665_v14 = vld [vmem:[#allocation12 + $0x758] sm:$0xff] }
 0x363   :  { %v8334_v32 = vcombine.low %v2678_v53, %v2682_v3 }
 0x365   :  { %2551 = vmatpush1.bf16.msra.mxu1 %v8274_v59  ;;  %2594 = vmatpush1.bf16.msra.mxu0 %v8276_v6  ;;  %v8328_v59 = vcombine.low %v2671_v55, %v2675_v18  ;;  %v8335_v6 = vcombine.high %v2678_v53, %v2682_v3  ;;  %v2669_v55 = vld [vmem:[#allocation12 + $0x778] sm:$0xff]  ;;  %v2676_v53 = vld [vmem:[#allocation12 + $0x7b0] sm:$0xff] }
 0x366   :  { %3006 = vmatprep.subr.bf16.mxu1 %v8279_v7  ;;  %3049 = vmatprep.subr.bf16.mxu0 %v8281_v8  ;;  %v8337_v7 = vcombine.high %v2679_v19, %v2683_v56  ;;  %v2624_v8 = vld [vmem:[#allocation12 + $0x610] sm:$0xff]  ;;  %v2673_v3 = vld [vmem:[#allocation12 + $0x798] sm:$0xff] }
 0x368   :  { %2569 = vmatmul.mubr.bf16.vlgmr.msra.gmra.mrb[68].mxu1 %v10384_v54  ;;  %2612 = vmatmul.mubr.bf16.vlgmr.msra.gmra.mrb[52].mxu0 %v10384_v54  ;;  %v8296_v54 = vcombine.low %v2639_v39, %v2643_v44  ;;  %v2637_v39 = vld [vmem:[#allocation12 + $0x678] sm:$0xff]  ;;  %v8282_v44 = vcombine.low %v2624_v8, %v2628_v9 }
 0x369   :  { %3007 = vmatpush1.bf16.msra.mxu1 %v8278_v30  ;;  %3050 = vmatpush1.bf16.msra.mxu0 %v8280_v34  ;;  %v8336_v30 = vcombine.low %v2679_v19, %v2683_v56  ;;  %v8283_v34 = vcombine.high %v2624_v8, %v2628_v9  ;;  %v2677_v19 = vld [vmem:[#allocation12 + $0x7b8] sm:$0xff]  ;;  %v2684_v8 = vld [vmem:[#allocation12 + $0x7f0] sm:$0xff] }
 0x36a   :  { %3008 = vmatprep.subr.bf16.mxu1 %v8287_v60  ;;  %3051 = vmatprep.subr.bf16.mxu0 %v8289_v35  ;;  %v8285_v60 = vcombine.high %v2625_v21, %v2629_v22  ;;  %v2632_v35 = vld [vmem:[#allocation12 + $0x650] sm:$0xff]  ;;  %v2681_v9 = vld [vmem:[#allocation12 + $0x7d8] sm:$0xff] }
 0x36b   :  { %3038 = vmatprep.mubr.bf16.mxu1 %v10451_v24  ;;  %3081 = vmatprep.mubr.bf16.mxu0 %v10451_v24  ;;  %v8290_v48 = vcombine.low %v2632_v35, %v2636_v38 }
 0x36d   :  { %3009 = vmatpush1.bf16.msra.mxu1 %v8286_v43  ;;  %3052 = vmatpush1.bf16.msra.mxu0 %v8288_v28  ;;  %v8284_v43 = vcombine.low %v2625_v21, %v2629_v22  ;;  %v8291_v28 = vcombine.high %v2632_v35, %v2636_v38  ;;  %v2685_v21 = vld [vmem:[#allocation12 + $0x7f8] sm:$0xff]  ;;  %v1514_v35 = vld [vmem:[#allocation12 + $0x220] sm:$0xff]  ;;  %v1511_v38 = vld [vmem:[#allocation12 + $0x208] sm:$0xff] }
 0x36e   :  { %3010 = vmatprep.subr.bf16.mxu1 %v8295_v46  ;;  %3053 = vmatprep.subr.bf16.mxu0 %v8297_v47  ;;  %v8293_v46 = vcombine.high %v2633_v16, %v2637_v39  ;;  %v2640_v47 = vld [vmem:[#allocation12 + $0x690] sm:$0xff] }
 0x36f   :  { %v8298_v33 = vcombine.low %v2640_v47, %v2644_v50 }
 0x371   :  { %3011 = vmatpush1.bf16.msra.mxu1 %v8294_v51  ;;  %3054 = vmatpush1.bf16.msra.mxu0 %v8296_v54  ;;  %v8292_v51 = vcombine.low %v2633_v16, %v2637_v39  ;;  %v8299_v54 = vcombine.high %v2640_v47, %v2644_v50  ;;  %v1515_v16 = vld [vmem:[#allocation12 + $0x228] sm:$0xff]  ;;  %v1522_v47 = vld [vmem:[#allocation12 + $0x260] sm:$0xff] }
 0x372   :  { %3012 = vmatprep.subr.bf16.mxu1 %v8303_v29  ;;  %3055 = vmatprep.subr.bf16.mxu0 %v8305_v57  ;;  %v8301_v29 = vcombine.high %v2641_v62, %v2645_v45  ;;  %v2648_v57 = vld [vmem:[#allocation12 + $0x6d0] sm:$0xff]  ;;  %v1519_v50 = vld [vmem:[#allocation12 + $0x248] sm:$0xff] }
 0x373   :  { %v8306_v4 = vcombine.low %v2648_v57, %v2652_v12 }
 0x375   :  { %3013 = vmatpush1.bf16.msra.mxu1 %v8302_v58  ;;  %3056 = vmatpush1.bf16.msra.mxu0 %v8304_v61  ;;  %v8300_v58 = vcombine.low %v2641_v62, %v2645_v45  ;;  %v8307_v61 = vcombine.high %v2648_v57, %v2652_v12  ;;  %v1523_v62 = vld [vmem:[#allocation12 + $0x268] sm:$0xff]  ;;  %v1530_v57 = vld [vmem:[#allocation12 + $0x2a0] sm:$0xff] }
 0x376   :  { %3014 = vmatprep.subr.bf16.mxu1 %v8311_v11  ;;  %3057 = vmatprep.subr.bf16.mxu0 %v8313_v49  ;;  %v8309_v11 = vcombine.high %v2649_v63, %v2653_v2  ;;  %v2656_v49 = vld [vmem:[#allocation12 + $0x710] sm:$0xff]  ;;  %v1527_v12 = vld [vmem:[#allocation12 + $0x288] sm:$0xff] }
 0x377   :  { %v8314_v18 = vcombine.low %v2656_v49, %v2660_v17 }
 0x379   :  { %3015 = vmatpush1.bf16.msra.mxu1 %v8310_v15  ;;  %3058 = vmatpush1.bf16.msra.mxu0 %v8312_v52  ;;  %v8308_v15 = vcombine.low %v2649_v63, %v2653_v2  ;;  %v8315_v52 = vcombine.high %v2656_v49, %v2660_v17  ;;  %v1531_v63 = vld [vmem:[#allocation12 + $0x2a8] sm:$0xff]  ;;  %v1538_v49 = vld [vmem:[#allocation12 + $0x2e0] sm:$0xff] }
 0x37a   :  { %3016 = vmatprep.subr.bf16.mxu1 %v8319_v37  ;;  %3059 = vmatprep.subr.bf16.mxu0 %v8321_v40  ;;  %v8317_v37 = vcombine.high %v2657_v0, %v2661_v1  ;;  %v2664_v40 = vld [vmem:[#allocation12 + $0x750] sm:$0xff]  ;;  %v1535_v17 = vld [vmem:[#allocation12 + $0x2c8] sm:$0xff] }
 0x37b   :  { %v8322_v56 = vcombine.low %v2664_v40, %v2668_v5 }
 0x37d   :  { %3017 = vmatpush1.bf16.msra.mxu1 %v8318_v20  ;;  %3060 = vmatpush1.bf16.msra.mxu0 %v8320_v23  ;;  %v8316_v20 = vcombine.low %v2657_v0, %v2661_v1  ;;  %v8323_v23 = vcombine.high %v2664_v40, %v2668_v5  ;;  %v1539_v0 = vld [vmem:[#allocation12 + $0x2e8] sm:$0xff] }
 0x37e   :  { %3018 = vmatprep.subr.bf16.mxu1 %v8327_v10  ;;  %3061 = vmatprep.subr.bf16.mxu0 %v8329_v26  ;;  %v8325_v10 = vcombine.high %v2665_v14, %v2669_v55  ;;  %v2672_v26 = vld [vmem:[#allocation12 + $0x790] sm:$0xff]  ;;  %v1543_v40 = vld [vmem:[#allocation12 + $0x308] sm:$0xff] }
 0x37f   :  { %v8330_v22 = vcombine.low %v2672_v26, %v2676_v53  ;;  %v1547_v5 = vld [vmem:[#allocation12 + $0x328] sm:$0xff] }
 0x381   :  { %3019 = vmatpush1.bf16.msra.mxu1 %v8326_v13  ;;  %3062 = vmatpush1.bf16.msra.mxu0 %v8328_v59  ;;  %v8324_v13 = vcombine.low %v2665_v14, %v2669_v55  ;;  %v8331_v59 = vcombine.high %v2672_v26, %v2676_v53  ;;  %v8368_v55 = vcombine.low %v1535_v17, %v1539_v0  ;;  %v1551_v26 = vld [vmem:[#allocation12 + $0x348] sm:$0xff] }
 0x382   :  { %3020 = vmatprep.subr.bf16.mxu1 %v8335_v6  ;;  %3063 = vmatprep.subr.bf16.mxu0 %v8337_v7  ;;  %v8333_v6 = vcombine.high %v2673_v3, %v2677_v19  ;;  %v2680_v7 = vld [vmem:[#allocation12 + $0x7d0] sm:$0xff]  ;;  %v1555_v53 = vld [vmem:[#allocation12 + $0x368] sm:$0xff] }
 0x383   :  { %v8338_v39 = vcombine.low %v2680_v7, %v2684_v8 }
 0x385   :  { %3021 = vmatpush1.bf16.msra.mxu1 %v8334_v32  ;;  %3064 = vmatpush1.bf16.msra.mxu0 %v8336_v30  ;;  %v8332_v32 = vcombine.low %v2673_v3, %v2677_v19  ;;  %v8339_v30 = vcombine.high %v2680_v7, %v2684_v8  ;;  %v8376_v19 = vcombine.low %v1543_v40, %v1547_v5  ;;  %v1559_v7 = vld [vmem:[#allocation12 + $0x388] sm:$0xff] }
 0x386   :  { %3092 = vmatprep.subr.bf16.mxu1 %v8283_v34  ;;  %3135 = vmatprep.subr.bf16.mxu0 %v8285_v60  ;;  %v8341_v34 = vcombine.high %v2681_v9, %v2685_v21  ;;  %v1510_v60 = vld [vmem:[#allocation12 + $0x200] sm:$0xff]  ;;  %v1563_v8 = vld [vmem:[#allocation12 + $0x3a8] sm:$0xff] }
 0x387   :  { %v8342_v45 = vcombine.low %v1510_v60, %v1514_v35 }
 0x388   :  { %3039 = vmatmul.mubr.bf16.vlgmr.msra.gmra.mrb[64].mxu1 %v10418_v31  ;;  %3082 = vmatmul.mubr.bf16.vlgmr.msra.gmra.mrb[48].mxu0 %v10418_v31 }
 0x389   :  { %3093 = vmatpush1.bf16.msra.mxu1 %v8282_v44  ;;  %3136 = vmatpush1.bf16.msra.mxu0 %v8284_v43  ;;  %v8340_v44 = vcombine.low %v2681_v9, %v2685_v21  ;;  %v8343_v43 = vcombine.high %v1510_v60, %v1514_v35  ;;  %v8384_v21 = vcombine.low %v1551_v26, %v1555_v53  ;;  %v1567_v60 = vld [vmem:[#allocation12 + $0x3c8] sm:$0xff] }
 0x38a   :  { %3094 = vmatprep.subr.bf16.mxu1 %v8291_v28  ;;  %3137 = vmatprep.subr.bf16.mxu0 %v8293_v46  ;;  %v8345_v28 = vcombine.high %v1511_v38, %v1515_v16  ;;  %v1518_v46 = vld [vmem:[#allocation12 + $0x240] sm:$0xff]  ;;  %v1571_v35 = vld [vmem:[#allocation12 + $0x3e8] sm:$0xff] }
 0x38b   :  { %3124 = vmatprep.mubr.bf16.mxu1 %v10451_v24  ;;  %3167 = vmatprep.mubr.bf16.mxu0 %v10451_v24  ;;  %v8350_v2 = vcombine.low %v1518_v46, %v1522_v47 }
 0x38d   :  { %3095 = vmatpush1.bf16.msra.mxu1 %v8290_v48  ;;  %3138 = vmatpush1.bf16.msra.mxu0 %v8292_v51  ;;  %v8344_v48 = vcombine.low %v1511_v38, %v1515_v16  ;;  %v8351_v51 = vcombine.high %v1518_v46, %v1522_v47  ;;  %v8392_v16 = vcombine.low %v1559_v7, %v1563_v8  ;;  %v1513_v46 = vld [vmem:[#allocation12 + $0x218] sm:$0xff] }
 0x38e   :  { %3096 = vmatprep.subr.bf16.mxu1 %v8299_v54  ;;  %3139 = vmatprep.subr.bf16.mxu0 %v8301_v29  ;;  %v8353_v54 = vcombine.high %v1519_v50, %v1523_v62  ;;  %v1526_v29 = vld [vmem:[#allocation12 + $0x280] sm:$0xff]  ;;  %v1517_v47 = vld [vmem:[#allocation12 + $0x238] sm:$0xff] }
 0x38f   :  { %v8358_v1 = vcombine.low %v1526_v29, %v1530_v57 }
 0x391   :  { %3097 = vmatpush1.bf16.msra.mxu1 %v8298_v33  ;;  %3140 = vmatpush1.bf16.msra.mxu0 %v8300_v58  ;;  %v8352_v33 = vcombine.low %v1519_v50, %v1523_v62  ;;  %v8359_v58 = vcombine.high %v1526_v29, %v1530_v57  ;;  %v8400_v62 = vcombine.low %v1567_v60, %v1571_v35  ;;  %v1521_v29 = vld [vmem:[#allocation12 + $0x258] sm:$0xff] }
 0x392   :  { %3098 = vmatprep.subr.bf16.mxu1 %v8307_v61  ;;  %3141 = vmatprep.subr.bf16.mxu0 %v8309_v11  ;;  %v8361_v61 = vcombine.high %v1527_v12, %v1531_v63  ;;  %v1534_v11 = vld [vmem:[#allocation12 + $0x2c0] sm:$0xff]  ;;  %v1525_v57 = vld [vmem:[#allocation12 + $0x278] sm:$0xff] }
 0x393   :  { %v8366_v14 = vcombine.low %v1534_v11, %v1538_v49 }
 0x395   :  { %3099 = vmatpush1.bf16.msra.mxu1 %v8306_v4  ;;  %3142 = vmatpush1.bf16.msra.mxu0 %v8308_v15  ;;  %v8367_v4 = vcombine.high %v1534_v11, %v1538_v49  ;;  %v8369_v15 = vcombine.high %v1535_v17, %v1539_v0  ;;  %v1529_v11 = vld [vmem:[#allocation12 + $0x298] sm:$0xff]  ;;  %v8356_v0 = vcombine.low %v1521_v29, %v1525_v57 }
 0x396   :  { %3100 = vmatprep.subr.bf16.mxu1 %v8315_v52  ;;  %3143 = vmatprep.subr.bf16.mxu0 %v8317_v37  ;;  %v1542_v52 = vld [vmem:[#allocation12 + $0x300] sm:$0xff]  ;;  %v1533_v49 = vld [vmem:[#allocation12 + $0x2b8] sm:$0xff] }
 0x397   :  { %v1546_v37 = vld [vmem:[#allocation12 + $0x320] sm:$0xff] }
 0x398   :  { %v8374_v3 = vcombine.low %v1542_v52, %v1546_v37 }
 0x399   :  { %3101 = vmatpush1.bf16.msra.mxu1 %v8314_v18  ;;  %3144 = vmatpush1.bf16.msra.mxu0 %v8316_v20  ;;  %v8375_v18 = vcombine.high %v1542_v52, %v1546_v37  ;;  %v8377_v20 = vcombine.high %v1543_v40, %v1547_v5  ;;  %v1537_v52 = vld [vmem:[#allocation12 + $0x2d8] sm:$0xff]  ;;  %v8364_v5 = vcombine.low %v1529_v11, %v1533_v49 }
 0x39a   :  { %3102 = vmatprep.subr.bf16.mxu1 %v8323_v23  ;;  %3145 = vmatprep.subr.bf16.mxu0 %v8325_v10  ;;  %v1550_v23 = vld [vmem:[#allocation12 + $0x340] sm:$0xff]  ;;  %v1541_v37 = vld [vmem:[#allocation12 + $0x2f8] sm:$0xff] }
 0x39b   :  { %v1554_v10 = vld [vmem:[#allocation12 + $0x360] sm:$0xff] }
 0x39c   :  { %v8382_v9 = vcombine.low %v1550_v23, %v1554_v10 }
 0x39d   :  { %3103 = vmatpush1.bf16.msra.mxu1 %v8322_v56  ;;  %3146 = vmatpush1.bf16.msra.mxu0 %v8324_v13  ;;  %v8383_v56 = vcombine.high %v1550_v23, %v1554_v10  ;;  %v8385_v13 = vcombine.high %v1551_v26, %v1555_v53  ;;  %v1545_v23 = vld [vmem:[#allocation12 + $0x318] sm:$0xff]  ;;  %v8372_v53 = vcombine.low %v1537_v52, %v1541_v37 }
 0x39e   :  { %3104 = vmatprep.subr.bf16.mxu1 %v8331_v59  ;;  %3147 = vmatprep.subr.bf16.mxu0 %v8333_v6  ;;  %v1558_v59 = vld [vmem:[#allocation12 + $0x380] sm:$0xff]  ;;  %v1549_v10 = vld [vmem:[#allocation12 + $0x338] sm:$0xff] }
 0x39f   :  { %v1562_v6 = vld [vmem:[#allocation12 + $0x3a0] sm:$0xff] }
 0x3a0   :  { %v8390_v38 = vcombine.low %v1558_v59, %v1562_v6 }
 0x3a1   :  { %3105 = vmatpush1.bf16.msra.mxu1 %v8330_v22  ;;  %3148 = vmatpush1.bf16.msra.mxu0 %v8332_v32  ;;  %v8391_v22 = vcombine.high %v1558_v59, %v1562_v6  ;;  %v8393_v32 = vcombine.high %v1559_v7, %v1563_v8  ;;  %v1557_v59 = vld [vmem:[#allocation12 + $0x378] sm:$0xff]  ;;  %v8380_v7 = vcombine.low %v1545_v23, %v1549_v10 }
 0x3a2   :  { %3106 = vmatprep.subr.bf16.mxu1 %v8339_v30  ;;  %3149 = vmatprep.subr.bf16.mxu0 %v8341_v34  ;;  %v1566_v30 = vld [vmem:[#allocation12 + $0x3c0] sm:$0xff] }
 0x3a3   :  { %v1570_v34 = vld [vmem:[#allocation12 + $0x3e0] sm:$0xff] }
 0x3a4   :  { %v8398_v50 = vcombine.low %v1566_v30, %v1570_v34 }
 0x3a5   :  { %3107 = vmatpush1.bf16.msra.mxu1 %v8338_v39  ;;  %3150 = vmatpush1.bf16.msra.mxu0 %v8340_v44  ;;  %v8399_v39 = vcombine.high %v1566_v30, %v1570_v34  ;;  %v8401_v44 = vcombine.high %v1567_v60, %v1571_v35  ;;  %v1565_v30 = vld [vmem:[#allocation12 + $0x3b8] sm:$0xff] }
 0x3a6   :  { %3498 = vmatprep.subr.bf16.mxu1 %v8343_v43  ;;  %3541 = vmatprep.subr.bf16.mxu0 %v8345_v28  ;;  %v1512_v43 = vld [vmem:[#allocation12 + $0x210] sm:$0xff] }
 0x3a7   :  { %v1516_v28 = vld [vmem:[#allocation12 + $0x230] sm:$0xff] }
 0x3a8   :  { %3125 = vmatmul.mubr.bf16.vlgmr.msra.gmra.mrb[68].mxu1 %v10418_v31  ;;  %3168 = vmatmul.mubr.bf16.vlgmr.msra.gmra.mrb[52].mxu0 %v10418_v31  ;;  %v8360_v31 = vcombine.low %v1527_v12, %v1531_v63  ;;  %v8346_v12 = vcombine.low %v1512_v43, %v1516_v28  ;;  %v8348_v63 = vcombine.low %v1513_v46, %v1517_v47 }
 0x3a9   :  { %3499 = vmatpush1.bf16.msra.mxu1 %v8342_v45  ;;  %3542 = vmatpush1.bf16.msra.mxu0 %v8344_v48  ;;  %v8347_v45 = vcombine.high %v1512_v43, %v1516_v28  ;;  %v8349_v48 = vcombine.high %v1513_v46, %v1517_v47  ;;  %v1573_v43 = vld [vmem:[#allocation12 + $0x3f8] sm:$0xff] }
 0x3aa   :  { %3500 = vmatprep.subr.bf16.mxu1 %v8351_v51  ;;  %3543 = vmatprep.subr.bf16.mxu0 %v8353_v54  ;;  %v1520_v51 = vld [vmem:[#allocation12 + $0x250] sm:$0xff] }
 0x3ab   :  { %3530 = vmatprep.mubr.bf16.mxu1 %v10451_v24  ;;  %3573 = vmatprep.mubr.bf16.mxu0 %v10451_v24  ;;  %v1524_v54 = vld [vmem:[#allocation12 + $0x270] sm:$0xff] }
 0x3ac   :  { %v8354_v17 = vcombine.low %v1520_v51, %v1524_v54 }
 0x3ad   :  { %3501 = vmatpush1.bf16.msra.mxu1 %v8350_v2  ;;  %3544 = vmatpush1.bf16.msra.mxu0 %v8352_v33  ;;  %v8355_v2 = vcombine.high %v1520_v51, %v1524_v54  ;;  %v8357_v33 = vcombine.high %v1521_v29, %v1525_v57  ;;  %v3675_v51 = vld [vmem:[#allocation12 + $0x828] sm:$0xff] }
 0x3ae   :  { %3502 = vmatprep.subr.bf16.mxu1 %v8359_v58  ;;  %3545 = vmatprep.subr.bf16.mxu0 %v8361_v61  ;;  %v1528_v58 = vld [vmem:[#allocation12 + $0x290] sm:$0xff] }
 0x3af   :  { %v1532_v61 = vld [vmem:[#allocation12 + $0x2b0] sm:$0xff] }
 0x3b0   :  { %v8362_v40 = vcombine.low %v1528_v58, %v1532_v61 }
 0x3b1   :  { %3503 = vmatpush1.bf16.msra.mxu1 %v8358_v1  ;;  %3546 = vmatpush1.bf16.msra.mxu0 %v8360_v31  ;;  %v8363_v1 = vcombine.high %v1528_v58, %v1532_v61  ;;  %v8365_v31 = vcombine.high %v1529_v11, %v1533_v49  ;;  %v3683_v58 = vld [vmem:[#allocation12 + $0x868] sm:$0xff] }
 0x3b2   :  { %3504 = vmatprep.subr.bf16.mxu1 %v8367_v4  ;;  %3547 = vmatprep.subr.bf16.mxu0 %v8369_v15  ;;  %v1536_v4 = vld [vmem:[#allocation12 + $0x2d0] sm:$0xff] }
 0x3b3   :  { %v1540_v15 = vld [vmem:[#allocation12 + $0x2f0] sm:$0xff] }
 0x3b4   :  { %v8370_v26 = vcombine.low %v1536_v4, %v1540_v15 }
 0x3b5   :  { %3505 = vmatpush1.bf16.msra.mxu1 %v8366_v14  ;;  %3548 = vmatpush1.bf16.msra.mxu0 %v8368_v55  ;;  %v8371_v14 = vcombine.high %v1536_v4, %v1540_v15  ;;  %v8373_v55 = vcombine.high %v1537_v52, %v1541_v37  ;;  %v3691_v4 = vld [vmem:[#allocation12 + $0x8a8] sm:$0xff] }
 0x3b6   :  { %3506 = vmatprep.subr.bf16.mxu1 %v8375_v18  ;;  %3549 = vmatprep.subr.bf16.mxu0 %v8377_v20  ;;  %v1544_v18 = vld [vmem:[#allocation12 + $0x310] sm:$0xff] }
 0x3b7   :  { %v1548_v20 = vld [vmem:[#allocation12 + $0x330] sm:$0xff] }
 0x3b8   :  { %v8378_v6 = vcombine.low %v1544_v18, %v1548_v20 }
 0x3b9   :  { %3507 = vmatpush1.bf16.msra.mxu1 %v8374_v3  ;;  %3550 = vmatpush1.bf16.msra.mxu0 %v8376_v19  ;;  %v8379_v3 = vcombine.high %v1544_v18, %v1548_v20  ;;  %v1552_v19 = vld [vmem:[#allocation12 + $0x350] sm:$0xff]  ;;  %v3699_v18 = vld [vmem:[#allocation12 + $0x8e8] sm:$0xff] }
 0x3ba   :  { %3508 = vmatprep.subr.bf16.mxu1 %v8383_v56  ;;  %3551 = vmatprep.subr.bf16.mxu0 %v8385_v13  ;;  %v1556_v56 = vld [vmem:[#allocation12 + $0x370] sm:$0xff]  ;;  %v1553_v13 = vld [vmem:[#allocation12 + $0x358] sm:$0xff] }
 0x3bb   :  { %v8387_v8 = vcombine.high %v1552_v19, %v1556_v56  ;;  %v8386_v34 = vcombine.low %v1552_v19, %v1556_v56  ;;  %v8388_v60 = vcombine.low %v1553_v13, %v1557_v59  ;;  %v10479_v20 = vld [vmem:[#allocation3] sm:$0xff] }
 0x3bc   :  { %v3707_v19 = vld [vmem:[#allocation12 + $0x928] sm:$0xff] }
 0x3bd   :  { %3509 = vmatpush1.bf16.msra.mxu1 %v8382_v9  ;;  %3552 = vmatpush1.bf16.msra.mxu0 %v8384_v21  ;;  %v8389_v9 = vcombine.high %v1553_v13, %v1557_v59  ;;  %v1560_v21 = vld [vmem:[#allocation12 + $0x390] sm:$0xff] }
 0x3be   :  { %3510 = vmatprep.subr.bf16.mxu1 %v8391_v22  ;;  %3553 = vmatprep.subr.bf16.mxu0 %v8393_v32  ;;  %v1564_v22 = vld [vmem:[#allocation12 + $0x3b0] sm:$0xff]  ;;  %v1561_v32 = vld [vmem:[#allocation12 + $0x398] sm:$0xff] }
 0x3bf   :  { %v8395_v35 = vcombine.high %v1560_v21, %v1564_v22  ;;  %v8394_v28 = vcombine.low %v1560_v21, %v1564_v22  ;;  %v8396_v46 = vcombine.low %v1561_v32, %v1565_v30  ;;  %v3715_v21 = vld [vmem:[#allocation12 + $0x968] sm:$0xff] }
 0x3c1   :  { %3511 = vmatpush1.bf16.msra.mxu1 %v8390_v38  ;;  %3554 = vmatpush1.bf16.msra.mxu0 %v8392_v16  ;;  %v8397_v38 = vcombine.high %v1561_v32, %v1565_v30  ;;  %v1568_v16 = vld [vmem:[#allocation12 + $0x3d0] sm:$0xff] }
 0x3c2   :  { %3512 = vmatprep.subr.bf16.mxu1 %v8399_v39  ;;  %3555 = vmatprep.subr.bf16.mxu0 %v8401_v44  ;;  %v1572_v39 = vld [vmem:[#allocation12 + $0x3f0] sm:$0xff]  ;;  %v1569_v44 = vld [vmem:[#allocation12 + $0x3d8] sm:$0xff] }
 0x3c3   :  { %v8403_v47 = vcombine.high %v1568_v16, %v1572_v39  ;;  %v8402_v54 = vcombine.low %v1568_v16, %v1572_v39  ;;  %v8404_v29 = vcombine.low %v1569_v44, %v1573_v43  ;;  %v3723_v16 = vld [vmem:[#allocation12 + $0x9a8] sm:$0xff] }
 0x3c5   :  { %3513 = vmatpush1.bf16.msra.mxu1 %v8398_v50  ;;  %3556 = vmatpush1.bf16.msra.mxu0 %v8400_v62  ;;  %v8405_v50 = vcombine.high %v1569_v44, %v1573_v43  ;;  %v3670_v62 = vld [vmem:[#allocation12 + $0x800] sm:$0xff] }
 0x3c6   :  { %3584 = vmatprep.subr.bf16.mxu1 %v8347_v45  ;;  %3627 = vmatprep.subr.bf16.mxu0 %v8349_v48  ;;  %v3674_v45 = vld [vmem:[#allocation12 + $0x820] sm:$0xff]  ;;  %v3671_v48 = vld [vmem:[#allocation12 + $0x808] sm:$0xff] }
 0x3c7   :  { %v8407_v57 = vcombine.high %v3670_v62, %v3674_v45  ;;  %v8406_v61 = vcombine.low %v3670_v62, %v3674_v45  ;;  %v8408_v11 = vcombine.low %v3671_v48, %v3675_v51  ;;  %v3731_v62 = vld [vmem:[#allocation12 + $0x9e8] sm:$0xff] }
 0x3c8   :  { %3531 = vmatmul.mubr.bf16.vlgmr.msra.gmra.mrb[64].mxu1 %v10392_v27  ;;  %3574 = vmatmul.mubr.bf16.vlgmr.msra.gmra.mrb[48].mxu0 %v10392_v27 }
 0x3c9   :  { %3585 = vmatpush1.bf16.msra.mxu1 %v8346_v12  ;;  %3628 = vmatpush1.bf16.msra.mxu0 %v8348_v63  ;;  %v8409_v12 = vcombine.high %v3671_v48, %v3675_v51  ;;  %v3678_v63 = vld [vmem:[#allocation12 + $0x840] sm:$0xff] }
 0x3ca   :  { %3586 = vmatprep.subr.bf16.mxu1 %v8355_v2  ;;  %3629 = vmatprep.subr.bf16.mxu0 %v8357_v33  ;;  %v3682_v2 = vld [vmem:[#allocation12 + $0x860] sm:$0xff]  ;;  %v3679_v33 = vld [vmem:[#allocation12 + $0x848] sm:$0xff] }
 0x3cb   :  { %3616 = vmatprep.mubr.bf16.mxu1 %v10451_v24  ;;  %3659 = vmatprep.mubr.bf16.mxu0 %v10451_v24  ;;  %v8381_v24 = vcombine.high %v1545_v23, %v1549_v10  ;;  %v8415_v49 = vcombine.high %v3678_v63, %v3682_v2  ;;  %v8414_v15 = vcombine.low %v3678_v63, %v3682_v2  ;;  %v3677_v63 = vld [vmem:[#allocation12 + $0x838] sm:$0xff] }
 0x3cc   :  { %v8416_v52 = vcombine.low %v3679_v33, %v3683_v58 }
 0x3cd   :  { %3587 = vmatpush1.bf16.msra.mxu1 %v8354_v17  ;;  %3630 = vmatpush1.bf16.msra.mxu0 %v8356_v0  ;;  %v8417_v17 = vcombine.high %v3679_v33, %v3683_v58  ;;  %v3686_v0 = vld [vmem:[#allocation12 + $0x880] sm:$0xff] }
 0x3ce   :  { %3588 = vmatprep.subr.bf16.mxu1 %v8363_v1  ;;  %3631 = vmatprep.subr.bf16.mxu0 %v8365_v31  ;;  %v3690_v1 = vld [vmem:[#allocation12 + $0x8a0] sm:$0xff]  ;;  %v3687_v31 = vld [vmem:[#allocation12 + $0x888] sm:$0xff] }
 0x3cf   :  { %v8423_v37 = vcombine.high %v3686_v0, %v3690_v1  ;;  %v8424_v23 = vcombine.low %v3687_v31, %v3691_v4 }
 0x3d1   :  { %3589 = vmatpush1.bf16.msra.mxu1 %v8362_v40  ;;  %3632 = vmatpush1.bf16.msra.mxu0 %v8364_v5  ;;  %v8425_v40 = vcombine.high %v3687_v31, %v3691_v4  ;;  %v3694_v5 = vld [vmem:[#allocation12 + $0x8c0] sm:$0xff] }
 0x3d2   :  { %3590 = vmatprep.subr.bf16.mxu1 %v8371_v14  ;;  %3633 = vmatprep.subr.bf16.mxu0 %v8373_v55  ;;  %v3698_v14 = vld [vmem:[#allocation12 + $0x8e0] sm:$0xff]  ;;  %v3695_v55 = vld [vmem:[#allocation12 + $0x8c8] sm:$0xff] }
 0x3d3   :  { %v8431_v10 = vcombine.high %v3694_v5, %v3698_v14  ;;  %v8430_v56 = vcombine.low %v3694_v5, %v3698_v14  ;;  %v8432_v13 = vcombine.low %v3695_v55, %v3699_v18  ;;  %v3693_v5 = vld [vmem:[#allocation12 + $0x8b8] sm:$0xff] }
 0x3d5   :  { %3591 = vmatpush1.bf16.msra.mxu1 %v8370_v26  ;;  %3634 = vmatpush1.bf16.msra.mxu0 %v8372_v53  ;;  %v8433_v26 = vcombine.high %v3695_v55, %v3699_v18  ;;  %v3702_v53 = vld [vmem:[#allocation12 + $0x900] sm:$0xff] }
 0x3d6   :  { %3592 = vmatprep.subr.bf16.mxu1 %v8379_v3  ;;  %3635 = vmatprep.subr.bf16.mxu0 %v8381_v24  ;;  %v3706_v3 = vld [vmem:[#allocation12 + $0x920] sm:$0xff]  ;;  %v3703_v24 = vld [vmem:[#allocation12 + $0x908] sm:$0xff] }
 0x3d7   :  { %v8439_v59 = vcombine.high %v3702_v53, %v3706_v3  ;;  %v8438_v22 = vcombine.low %v3702_v53, %v3706_v3  ;;  %v8440_v32 = vcombine.low %v3703_v24, %v3707_v19  ;;  %v3701_v53 = vld [vmem:[#allocation12 + $0x8f8] sm:$0xff] }
 0x3d9   :  { %3593 = vmatpush1.bf16.msra.mxu1 %v8378_v6  ;;  %3636 = vmatpush1.bf16.msra.mxu0 %v8380_v7  ;;  %v8441_v6 = vcombine.high %v3703_v24, %v3707_v19  ;;  %v3710_v7 = vld [vmem:[#allocation12 + $0x940] sm:$0xff] }
 0x3da   :  { %3594 = vmatprep.subr.bf16.mxu1 %v8387_v8  ;;  %3637 = vmatprep.subr.bf16.mxu0 %v8389_v9  ;;  %v3714_v8 = vld [vmem:[#allocation12 + $0x960] sm:$0xff]  ;;  %v3711_v9 = vld [vmem:[#allocation12 + $0x948] sm:$0xff] }
 0x3db   :  { %v8447_v30 = vcombine.high %v3710_v7, %v3714_v8  ;;  %v8446_v39 = vcombine.low %v3710_v7, %v3714_v8  ;;  %v8448_v44 = vcombine.low %v3711_v9, %v3715_v21  ;;  %v3709_v7 = vld [vmem:[#allocation12 + $0x938] sm:$0xff] }
 0x3dd   :  { %3595 = vmatpush1.bf16.msra.mxu1 %v8386_v34  ;;  %3638 = vmatpush1.bf16.msra.mxu0 %v8388_v60  ;;  %v8449_v34 = vcombine.high %v3711_v9, %v3715_v21  ;;  %v3718_v60 = vld [vmem:[#allocation12 + $0x980] sm:$0xff] }
 0x3de   :  { %3596 = vmatprep.subr.bf16.mxu1 %v8395_v35  ;;  %3639 = vmatprep.subr.bf16.mxu0 %v8397_v38  ;;  %v3722_v35 = vld [vmem:[#allocation12 + $0x9a0] sm:$0xff]  ;;  %v3719_v38 = vld [vmem:[#allocation12 + $0x988] sm:$0xff] }
 0x3df   :  { %v8455_v43 = vcombine.high %v3718_v60, %v3722_v35  ;;  %v8454_v45 = vcombine.low %v3718_v60, %v3722_v35  ;;  %v8456_v48 = vcombine.low %v3719_v38, %v3723_v16  ;;  %v3717_v60 = vld [vmem:[#allocation12 + $0x978] sm:$0xff] }
 0x3e1   :  { %3597 = vmatpush1.bf16.msra.mxu1 %v8394_v28  ;;  %3640 = vmatpush1.bf16.msra.mxu0 %v8396_v46  ;;  %v8457_v28 = vcombine.high %v3719_v38, %v3723_v16  ;;  %v3726_v46 = vld [vmem:[#allocation12 + $0x9c0] sm:$0xff] }
 0x3e2   :  { %3598 = vmatprep.subr.bf16.mxu1 %v8403_v47  ;;  %3641 = vmatprep.subr.bf16.mxu0 %v8405_v50  ;;  %v3730_v47 = vld [vmem:[#allocation12 + $0x9e0] sm:$0xff]  ;;  %v3727_v50 = vld [vmem:[#allocation12 + $0x9c8] sm:$0xff] }
 0x3e3   :  { %v8463_v51 = vcombine.high %v3726_v46, %v3730_v47  ;;  %v8462_v2 = vcombine.low %v3726_v46, %v3730_v47  ;;  %v8464_v33 = vcombine.low %v3727_v50, %v3731_v62  ;;  %v3725_v46 = vld [vmem:[#allocation12 + $0x9b8] sm:$0xff] }
 0x3e5   :  { %3599 = vmatpush1.bf16.msra.mxu1 %v8402_v54  ;;  %3642 = vmatpush1.bf16.msra.mxu0 %v8404_v29  ;;  %v8465_v54 = vcombine.high %v3727_v50, %v3731_v62  ;;  %v3672_v29 = vld [vmem:[#allocation12 + $0x810] sm:$0xff] }
 0x3e6   :  { %4054 = vmatprep.subr.bf16.mxu1 %v8407_v57  ;;  %4097 = vmatprep.subr.bf16.mxu0 %v8409_v12  ;;  %v3676_v57 = vld [vmem:[#allocation12 + $0x830] sm:$0xff]  ;;  %v3673_v12 = vld [vmem:[#allocation12 + $0x818] sm:$0xff] }
 0x3e7   :  { %v8411_v58 = vcombine.high %v3672_v29, %v3676_v57  ;;  %v8412_v31 = vcombine.low %v3673_v12, %v3677_v63 }
 0x3e8   :  { %3617 = vmatmul.mubr.bf16.vlgmr.msra.gmra.mrb[68].mxu1 %v10392_v27  ;;  %3660 = vmatmul.mubr.bf16.vlgmr.msra.gmra.mrb[52].mxu0 %v10392_v27  ;;  %v8422_v27 = vcombine.low %v3686_v0, %v3690_v1  ;;  %v3685_v0 = vld [vmem:[#allocation12 + $0x878] sm:$0xff]  ;;  %v8410_v1 = vcombine.low %v3672_v29, %v3676_v57 }
 0x3e9   :  { %4055 = vmatpush1.bf16.msra.mxu1 %v8406_v61  ;;  %4098 = vmatpush1.bf16.msra.mxu0 %v8408_v11  ;;  %v8413_v61 = vcombine.high %v3673_v12, %v3677_v63  ;;  %v3680_v11 = vld [vmem:[#allocation12 + $0x850] sm:$0xff]  ;;  %v3733_v29 = vld [vmem:[#allocation12 + $0x9f8] sm:$0xff] }
 0x3ea   :  { %4056 = vmatprep.subr.bf16.mxu1 %v8415_v49  ;;  %4099 = vmatprep.subr.bf16.mxu0 %v8417_v17  ;;  %v3684_v49 = vld [vmem:[#allocation12 + $0x870] sm:$0xff]  ;;  %v3681_v17 = vld [vmem:[#allocation12 + $0x858] sm:$0xff] }
 0x3eb   :  { %4086 = vmatprep.mubr.bf16.mxu1 %v10479_v20  ;;  %4129 = vmatprep.mubr.bf16.mxu0 %v10479_v20  ;;  %v8419_v4 = vcombine.high %v3680_v11, %v3684_v49  ;;  %v8418_v14 = vcombine.low %v3680_v11, %v3684_v49  ;;  %v8420_v55 = vcombine.low %v3681_v17, %v3685_v0  ;;  %v4247_v11 = vld [vmem:[#allocation12 + $0xa28] sm:$0xff] }
 0x3ed   :  { %4057 = vmatpush1.bf16.msra.mxu1 %v8414_v15  ;;  %4100 = vmatpush1.bf16.msra.mxu0 %v8416_v52  ;;  %v8421_v15 = vcombine.high %v3681_v17, %v3685_v0  ;;  %v3688_v52 = vld [vmem:[#allocation12 + $0x890] sm:$0xff] }
 0x3ee   :  { %4058 = vmatprep.subr.bf16.mxu1 %v8423_v37  ;;  %4101 = vmatprep.subr.bf16.mxu0 %v8425_v40  ;;  %v3692_v37 = vld [vmem:[#allocation12 + $0x8b0] sm:$0xff]  ;;  %v3689_v40 = vld [vmem:[#allocation12 + $0x898] sm:$0xff] }
 0x3ef   :  { %v8427_v18 = vcombine.high %v3688_v52, %v3692_v37  ;;  %v8426_v3 = vcombine.low %v3688_v52, %v3692_v37  ;;  %v8428_v24 = vcombine.low %v3689_v40, %v3693_v5  ;;  %v4255_v52 = vld [vmem:[#allocation12 + $0xa68] sm:$0xff] }
 0x3f1   :  { %4059 = vmatpush1.bf16.msra.mxu1 %v8422_v27  ;;  %4102 = vmatpush1.bf16.msra.mxu0 %v8424_v23  ;;  %v8429_v27 = vcombine.high %v3689_v40, %v3693_v5  ;;  %v3696_v23 = vld [vmem:[#allocation12 + $0x8d0] sm:$0xff] }
 0x3f2   :  { %4060 = vmatprep.subr.bf16.mxu1 %v8431_v10  ;;  %4103 = vmatprep.subr.bf16.mxu0 %v8433_v26  ;;  %v3700_v10 = vld [vmem:[#allocation12 + $0x8f0] sm:$0xff]  ;;  %v3697_v26 = vld [vmem:[#allocation12 + $0x8d8] sm:$0xff] }
 0x3f3   :  { %v8435_v19 = vcombine.high %v3696_v23, %v3700_v10  ;;  %v8434_v8 = vcombine.low %v3696_v23, %v3700_v10  ;;  %v8436_v9 = vcombine.low %v3697_v26, %v3701_v53  ;;  %v4263_v23 = vld [vmem:[#allocation12 + $0xaa8] sm:$0xff] }
 0x3f5   :  { %4061 = vmatpush1.bf16.msra.mxu1 %v8430_v56  ;;  %4104 = vmatpush1.bf16.msra.mxu0 %v8432_v13  ;;  %v8437_v56 = vcombine.high %v3697_v26, %v3701_v53  ;;  %v3704_v13 = vld [vmem:[#allocation12 + $0x910] sm:$0xff] }
 0x3f6   :  { %4062 = vmatprep.subr.bf16.mxu1 %v8439_v59  ;;  %4105 = vmatprep.subr.bf16.mxu0 %v8441_v6  ;;  %v3708_v59 = vld [vmem:[#allocation12 + $0x930] sm:$0xff]  ;;  %v3705_v6 = vld [vmem:[#allocation12 + $0x918] sm:$0xff] }
 0x3f7   :  { %v8443_v21 = vcombine.high %v3704_v13, %v3708_v59  ;;  %v8442_v35 = vcombine.low %v3704_v13, %v3708_v59  ;;  %v8444_v38 = vcombine.low %v3705_v6, %v3709_v7  ;;  %v4271_v13 = vld [vmem:[#allocation12 + $0xae8] sm:$0xff] }
 0x3f9   :  { %4063 = vmatpush1.bf16.msra.mxu1 %v8438_v22  ;;  %4106 = vmatpush1.bf16.msra.mxu0 %v8440_v32  ;;  %v8445_v22 = vcombine.high %v3705_v6, %v3709_v7  ;;  %v3712_v32 = vld [vmem:[#allocation12 + $0x950] sm:$0xff] }
 0x3fa   :  { %4064 = vmatprep.subr.bf16.mxu1 %v8447_v30  ;;  %4107 = vmatprep.subr.bf16.mxu0 %v8449_v34  ;;  %v3716_v30 = vld [vmem:[#allocation12 + $0x970] sm:$0xff]  ;;  %v3713_v34 = vld [vmem:[#allocation12 + $0x958] sm:$0xff] }
 0x3fb   :  { %v8451_v16 = vcombine.high %v3712_v32, %v3716_v30  ;;  %v8450_v47 = vcombine.low %v3712_v32, %v3716_v30  ;;  %v8452_v50 = vcombine.low %v3713_v34, %v3717_v60 }
 0x3fd   :  { %4065 = vmatpush1.bf16.msra.mxu1 %v8446_v39  ;;  %4108 = vmatpush1.bf16.msra.mxu0 %v8448_v44  ;;  %v8453_v39 = vcombine.high %v3713_v34, %v3717_v60  ;;  %v3720_v44 = vld [vmem:[#allocation12 + $0x990] sm:$0xff] }
 0x3fe   :  { %4066 = vmatprep.subr.bf16.mxu1 %v8455_v43  ;;  %4109 = vmatprep.subr.bf16.mxu0 %v8457_v28  ;;  %v3724_v43 = vld [vmem:[#allocation12 + $0x9b0] sm:$0xff]  ;;  %v3721_v28 = vld [vmem:[#allocation12 + $0x998] sm:$0xff] }
 0x3ff   :  { %v8459_v62 = vcombine.high %v3720_v44, %v3724_v43  ;;  %v8458_v57 = vcombine.low %v3720_v44, %v3724_v43  ;;  %v8460_v12 = vcombine.low %v3721_v28, %v3725_v46 }
 0x401   :  { %4067 = vmatpush1.bf16.msra.mxu1 %v8454_v45  ;;  %4110 = vmatpush1.bf16.msra.mxu0 %v8456_v48  ;;  %v8461_v45 = vcombine.high %v3721_v28, %v3725_v46  ;;  %v3728_v48 = vld [vmem:[#allocation12 + $0x9d0] sm:$0xff] }
 0x402   :  { %4068 = vmatprep.subr.bf16.mxu1 %v8463_v51  ;;  %4111 = vmatprep.subr.bf16.mxu0 %v8465_v54  ;;  %v3732_v51 = vld [vmem:[#allocation12 + $0x9f0] sm:$0xff]  ;;  %v3729_v54 = vld [vmem:[#allocation12 + $0x9d8] sm:$0xff] }
 0x403   :  { %v8467_v63 = vcombine.high %v3728_v48, %v3732_v51  ;;  %v8466_v49 = vcombine.low %v3728_v48, %v3732_v51  ;;  %v8468_v17 = vcombine.low %v3729_v54, %v3733_v29 }
 0x405   :  { %4069 = vmatpush1.bf16.msra.mxu1 %v8462_v2  ;;  %4112 = vmatpush1.bf16.msra.mxu0 %v8464_v33  ;;  %v8469_v2 = vcombine.high %v3729_v54, %v3733_v29  ;;  %v4242_v33 = vld [vmem:[#allocation12 + $0xa00] sm:$0xff] }
 0x406   :  { %4140 = vmatprep.subr.bf16.mxu1 %v8411_v58  ;;  %4183 = vmatprep.subr.bf16.mxu0 %v8413_v61  ;;  %v4246_v58 = vld [vmem:[#allocation12 + $0xa20] sm:$0xff]  ;;  %v4243_v61 = vld [vmem:[#allocation12 + $0xa08] sm:$0xff] }
 0x407   :  { %v8471_v0 = vcombine.high %v4242_v33, %v4246_v58  ;;  %v8470_v37 = vcombine.low %v4242_v33, %v4246_v58  ;;  %v8472_v40 = vcombine.low %v4243_v61, %v4247_v11 }
 0x408   :  { %4087 = vmatmul.mubr.bf16.vlgmr.msra.gmra.mrb[64].mxu1 %v10426_v36  ;;  %4130 = vmatmul.mubr.bf16.vlgmr.msra.gmra.mrb[48].mxu0 %v10426_v36 }
 0x409   :  { %4141 = vmatpush1.bf16.msra.mxu1 %v8410_v1  ;;  %4184 = vmatpush1.bf16.msra.mxu0 %v8412_v31  ;;  %v8473_v1 = vcombine.high %v4243_v61, %v4247_v11  ;;  %v4250_v31 = vld [vmem:[#allocation12 + $0xa40] sm:$0xff] }
 0x40a   :  { %4142 = vmatprep.subr.bf16.mxu1 %v8419_v4  ;;  %4185 = vmatprep.subr.bf16.mxu0 %v8421_v15  ;;  %v4254_v4 = vld [vmem:[#allocation12 + $0xa60] sm:$0xff]  ;;  %v4251_v15 = vld [vmem:[#allocation12 + $0xa48] sm:$0xff] }
 0x40b   :  { %4172 = vmatprep.mubr.bf16.mxu1 %v10479_v20  ;;  %4215 = vmatprep.mubr.bf16.mxu0 %v10479_v20  ;;  %v8479_v5 = vcombine.high %v4250_v31, %v4254_v4  ;;  %v8478_v10 = vcombine.low %v4250_v31, %v4254_v4  ;;  %v8480_v26 = vcombine.low %v4251_v15, %v4255_v52 }
 0x40d   :  { %4143 = vmatpush1.bf16.msra.mxu1 %v8418_v14  ;;  %4186 = vmatpush1.bf16.msra.mxu0 %v8420_v55  ;;  %v8481_v14 = vcombine.high %v4251_v15, %v4255_v52  ;;  %v4258_v55 = vld [vmem:[#allocation12 + $0xa80] sm:$0xff] }
 0x40e   :  { %4144 = vmatprep.subr.bf16.mxu1 %v8427_v18  ;;  %4187 = vmatprep.subr.bf16.mxu0 %v8429_v27  ;;  %v4262_v18 = vld [vmem:[#allocation12 + $0xaa0] sm:$0xff]  ;;  %v4259_v27 = vld [vmem:[#allocation12 + $0xa88] sm:$0xff] }
 0x40f   :  { %v8487_v53 = vcombine.high %v4258_v55, %v4262_v18  ;;  %v8486_v59 = vcombine.low %v4258_v55, %v4262_v18 }
 0x411   :  { %4145 = vmatpush1.bf16.msra.mxu1 %v8426_v3  ;;  %4188 = vmatpush1.bf16.msra.mxu0 %v8428_v24  ;;  %v8489_v3 = vcombine.high %v4259_v27, %v4263_v23  ;;  %v4266_v24 = vld [vmem:[#allocation12 + $0xac0] sm:$0xff] }
 0x412   :  { %4146 = vmatprep.subr.bf16.mxu1 %v8435_v19  ;;  %4189 = vmatprep.subr.bf16.mxu0 %v8437_v56  ;;  %v4270_v19 = vld [vmem:[#allocation12 + $0xae0] sm:$0xff]  ;;  %v4267_v56 = vld [vmem:[#allocation12 + $0xac8] sm:$0xff] }
 0x413   :  { %v8495_v6 = vcombine.high %v4266_v24, %v4270_v19  ;;  %v8497_v7 = vcombine.high %v4267_v56, %v4271_v13  ;;  %v8494_v32 = vcombine.low %v4266_v24, %v4270_v19  ;;  %v8496_v30 = vcombine.low %v4267_v56, %v4271_v13 }
 0x415   :  { %4147 = vmatpush1.bf16.msra.mxu1 %v8434_v8  ;;  %4190 = vmatpush1.bf16.msra.mxu0 %v8436_v9  ;;  %v4274_v8 = vld [vmem:[#allocation12 + $0xb00] sm:$0xff] }
 0x416   :  { %4148 = vmatprep.subr.bf16.mxu1 %v8443_v21  ;;  %4191 = vmatprep.subr.bf16.mxu0 %v8445_v22  ;;  %v4278_v9 = vld [vmem:[#allocation12 + $0xb20] sm:$0xff]  ;;  %v4275_v21 = vld [vmem:[#allocation12 + $0xb08] sm:$0xff] }
 0x417   :  { %v4279_v22 = vld [vmem:[#allocation12 + $0xb28] sm:$0xff]  ;;  %v8503_v34 = vcombine.high %v4274_v8, %v4278_v9  ;;  %v8502_v44 = vcombine.low %v4274_v8, %v4278_v9 }
 0x418   :  { %v8505_v60 = vcombine.high %v4275_v21, %v4279_v22  ;;  %v8504_v43 = vcombine.low %v4275_v21, %v4279_v22 }
 0x419   :  { %4149 = vmatpush1.bf16.msra.mxu1 %v8442_v35  ;;  %4192 = vmatpush1.bf16.msra.mxu0 %v8444_v38  ;;  %v4282_v35 = vld [vmem:[#allocation12 + $0xb40] sm:$0xff] }
 0x41a   :  { %4150 = vmatprep.subr.bf16.mxu1 %v8451_v16  ;;  %4193 = vmatprep.subr.bf16.mxu0 %v8453_v39  ;;  %v4286_v38 = vld [vmem:[#allocation12 + $0xb60] sm:$0xff]  ;;  %v4283_v16 = vld [vmem:[#allocation12 + $0xb48] sm:$0xff] }
 0x41b   :  { %v4287_v39 = vld [vmem:[#allocation12 + $0xb68] sm:$0xff]  ;;  %v8511_v28 = vcombine.high %v4282_v35, %v4286_v38  ;;  %v8510_v48 = vcombine.low %v4282_v35, %v4286_v38 }
 0x41c   :  { %v8513_v46 = vcombine.high %v4283_v16, %v4287_v39  ;;  %v8512_v51 = vcombine.low %v4283_v16, %v4287_v39 }
 0x41d   :  { %4151 = vmatpush1.bf16.msra.mxu1 %v8450_v47  ;;  %4194 = vmatpush1.bf16.msra.mxu0 %v8452_v50  ;;  %v4290_v47 = vld [vmem:[#allocation12 + $0xb80] sm:$0xff] }
 0x41e   :  { %4152 = vmatprep.subr.bf16.mxu1 %v8459_v62  ;;  %4195 = vmatprep.subr.bf16.mxu0 %v8461_v45  ;;  %v4294_v50 = vld [vmem:[#allocation12 + $0xba0] sm:$0xff]  ;;  %v4291_v62 = vld [vmem:[#allocation12 + $0xb88] sm:$0xff] }
 0x41f   :  { %v4295_v45 = vld [vmem:[#allocation12 + $0xba8] sm:$0xff]  ;;  %v8519_v54 = vcombine.high %v4290_v47, %v4294_v50  ;;  %v8518_v33 = vcombine.low %v4290_v47, %v4294_v50 }
 0x420   :  { %v8521_v29 = vcombine.high %v4291_v62, %v4295_v45  ;;  %v8520_v58 = vcombine.low %v4291_v62, %v4295_v45 }
 0x421   :  { %4153 = vmatpush1.bf16.msra.mxu1 %v8458_v57  ;;  %4196 = vmatpush1.bf16.msra.mxu0 %v8460_v12  ;;  %v4298_v57 = vld [vmem:[#allocation12 + $0xbc0] sm:$0xff] }
 0x422   :  { %4154 = vmatprep.subr.bf16.mxu1 %v8467_v63  ;;  %4197 = vmatprep.subr.bf16.mxu0 %v8469_v2  ;;  %v4302_v12 = vld [vmem:[#allocation12 + $0xbe0] sm:$0xff]  ;;  %v4299_v63 = vld [vmem:[#allocation12 + $0xbc8] sm:$0xff] }
 0x423   :  { %v4303_v2 = vld [vmem:[#allocation12 + $0xbe8] sm:$0xff]  ;;  %v8527_v61 = vcombine.high %v4298_v57, %v4302_v12  ;;  %v8526_v31 = vcombine.low %v4298_v57, %v4302_v12 }
 0x424   :  { %v8529_v11 = vcombine.high %v4299_v63, %v4303_v2  ;;  %v8528_v4 = vcombine.low %v4299_v63, %v4303_v2 }
 0x425   :  { %4155 = vmatpush1.bf16.msra.mxu1 %v8466_v49  ;;  %4198 = vmatpush1.bf16.msra.mxu0 %v8468_v17  ;;  %v4244_v49 = vld [vmem:[#allocation12 + $0xa10] sm:$0xff] }
 0x426   :  { %4626 = vmatprep.subr.bf16.mxu1 %v8471_v0  ;;  %4669 = vmatprep.subr.bf16.mxu0 %v8473_v1  ;;  %v4248_v17 = vld [vmem:[#allocation12 + $0xa30] sm:$0xff]  ;;  %v4245_v0 = vld [vmem:[#allocation12 + $0xa18] sm:$0xff] }
 0x427   :  { %v4249_v1 = vld [vmem:[#allocation12 + $0xa38] sm:$0xff]  ;;  %v8475_v15 = vcombine.high %v4244_v49, %v4248_v17  ;;  %v8474_v55 = vcombine.low %v4244_v49, %v4248_v17 }
 0x428   :  { %4173 = vmatmul.mubr.bf16.vlgmr.msra.gmra.mrb[68].mxu1 %v10426_v36  ;;  %4216 = vmatmul.mubr.bf16.vlgmr.msra.gmra.mrb[52].mxu0 %v10426_v36  ;;  %v8488_v36 = vcombine.low %v4259_v27, %v4263_v23  ;;  %v8477_v52 = vcombine.high %v4245_v0, %v4249_v1  ;;  %v8476_v18 = vcombine.low %v4245_v0, %v4249_v1 }
 0x429   :  { %4627 = vmatpush1.bf16.msra.mxu1 %v8470_v37  ;;  %4670 = vmatpush1.bf16.msra.mxu0 %v8472_v40  ;;  %v4252_v37 = vld [vmem:[#allocation12 + $0xa50] sm:$0xff] }
 0x42a   :  { %4628 = vmatprep.subr.bf16.mxu1 %v8479_v5  ;;  %4671 = vmatprep.subr.bf16.mxu0 %v8481_v14  ;;  %v4256_v40 = vld [vmem:[#allocation12 + $0xa70] sm:$0xff]  ;;  %v4253_v5 = vld [vmem:[#allocation12 + $0xa58] sm:$0xff] }
 0x42b   :  { %4658 = vmatprep.mubr.bf16.mxu1 %v10479_v20  ;;  %4701 = vmatprep.mubr.bf16.mxu0 %v10479_v20  ;;  %v4257_v14 = vld [vmem:[#allocation12 + $0xa78] sm:$0xff]  ;;  %v8483_v27 = vcombine.high %v4252_v37, %v4256_v40  ;;  %v8482_v24 = vcombine.low %v4252_v37, %v4256_v40 }
 0x42c   :  { %v8485_v23 = vcombine.high %v4253_v5, %v4257_v14  ;;  %v8484_v19 = vcombine.low %v4253_v5, %v4257_v14 }
 0x42d   :  { %4629 = vmatpush1.bf16.msra.mxu1 %v8478_v10  ;;  %4672 = vmatpush1.bf16.msra.mxu0 %v8480_v26  ;;  %v4260_v10 = vld [vmem:[#allocation12 + $0xa90] sm:$0xff] }
 0x42e   :  { %4630 = vmatprep.subr.bf16.mxu1 %v8487_v53  ;;  %4673 = vmatprep.subr.bf16.mxu0 %v8489_v3  ;;  %v4264_v26 = vld [vmem:[#allocation12 + $0xab0] sm:$0xff]  ;;  %v4261_v53 = vld [vmem:[#allocation12 + $0xa98] sm:$0xff] }
 0x42f   :  { %v4265_v3 = vld [vmem:[#allocation12 + $0xab8] sm:$0xff]  ;;  %v8491_v56 = vcombine.high %v4260_v10, %v4264_v26  ;;  %v8490_v8 = vcombine.low %v4260_v10, %v4264_v26 }
 0x430   :  { %v8493_v13 = vcombine.high %v4261_v53, %v4265_v3  ;;  %v8492_v9 = vcombine.low %v4261_v53, %v4265_v3 }
 0x431   :  { %4631 = vmatpush1.bf16.msra.mxu1 %v8486_v59  ;;  %4674 = vmatpush1.bf16.msra.mxu0 %v8488_v36  ;;  %v4268_v59 = vld [vmem:[#allocation12 + $0xad0] sm:$0xff] }
 0x432   :  { %4632 = vmatprep.subr.bf16.mxu1 %v8495_v6  ;;  %4675 = vmatprep.subr.bf16.mxu0 %v8497_v7  ;;  %v4272_v36 = vld [vmem:[#allocation12 + $0xaf0] sm:$0xff]  ;;  %v4269_v6 = vld [vmem:[#allocation12 + $0xad8] sm:$0xff] }
 0x433   :  { %v4273_v7 = vld [vmem:[#allocation12 + $0xaf8] sm:$0xff]  ;;  %v8499_v21 = vcombine.high %v4268_v59, %v4272_v36  ;;  %v8498_v35 = vcombine.low %v4268_v59, %v4272_v36 }
 0x434   :  { %v8501_v22 = vcombine.high %v4269_v6, %v4273_v7  ;;  %v8500_v38 = vcombine.low %v4269_v6, %v4273_v7 }
 0x435   :  { %4633 = vmatpush1.bf16.msra.mxu1 %v8494_v32  ;;  %4676 = vmatpush1.bf16.msra.mxu0 %v8496_v30  ;;  %v4276_v32 = vld [vmem:[#allocation12 + $0xb10] sm:$0xff] }
 0x436   :  { %4634 = vmatprep.subr.bf16.mxu1 %v8503_v34  ;;  %4677 = vmatprep.subr.bf16.mxu0 %v8505_v60  ;;  %v4280_v30 = vld [vmem:[#allocation12 + $0xb30] sm:$0xff]  ;;  %v4277_v34 = vld [vmem:[#allocation12 + $0xb18] sm:$0xff] }
 0x437   :  { %v4281_v60 = vld [vmem:[#allocation12 + $0xb38] sm:$0xff]  ;;  %v8507_v16 = vcombine.high %v4276_v32, %v4280_v30  ;;  %v8506_v47 = vcombine.low %v4276_v32, %v4280_v30 }
 0x438   :  { %v8509_v39 = vcombine.high %v4277_v34, %v4281_v60  ;;  %v8508_v50 = vcombine.low %v4277_v34, %v4281_v60  ;;  %v4846_v60 = vld [vmem:[#allocation12 + $0xd00] sm:$0xff] }
 0x439   :  { %4635 = vmatpush1.bf16.msra.mxu1 %v8502_v44  ;;  %4678 = vmatpush1.bf16.msra.mxu0 %v8504_v43  ;;  %v4284_v44 = vld [vmem:[#allocation12 + $0xb50] sm:$0xff] }
 0x43a   :  { %4636 = vmatprep.subr.bf16.mxu1 %v8511_v28  ;;  %4679 = vmatprep.subr.bf16.mxu0 %v8513_v46  ;;  %v4288_v43 = vld [vmem:[#allocation12 + $0xb70] sm:$0xff]  ;;  %v4285_v28 = vld [vmem:[#allocation12 + $0xb58] sm:$0xff] }
 0x43b   :  { %v4289_v46 = vld [vmem:[#allocation12 + $0xb78] sm:$0xff]  ;;  %v8515_v62 = vcombine.high %v4284_v44, %v4288_v43  ;;  %v8514_v57 = vcombine.low %v4284_v44, %v4288_v43 }
 0x43c   :  { %v8517_v45 = vcombine.high %v4285_v28, %v4289_v46  ;;  %v8516_v12 = vcombine.low %v4285_v28, %v4289_v46  ;;  %v4854_v46 = vld [vmem:[#allocation12 + $0xd40] sm:$0xff] }
 0x43d   :  { %4637 = vmatpush1.bf16.msra.mxu1 %v8510_v48  ;;  %4680 = vmatpush1.bf16.msra.mxu0 %v8512_v51  ;;  %v4292_v48 = vld [vmem:[#allocation12 + $0xb90] sm:$0xff] }
 0x43e   :  { %4638 = vmatprep.subr.bf16.mxu1 %v8519_v54  ;;  %4681 = vmatprep.subr.bf16.mxu0 %v8521_v29  ;;  %v4296_v51 = vld [vmem:[#allocation12 + $0xbb0] sm:$0xff]  ;;  %v4293_v54 = vld [vmem:[#allocation12 + $0xb98] sm:$0xff] }
 0x43f   :  { %v4297_v29 = vld [vmem:[#allocation12 + $0xbb8] sm:$0xff]  ;;  %v8523_v63 = vcombine.high %v4292_v48, %v4296_v51  ;;  %v8522_v49 = vcombine.low %v4292_v48, %v4296_v51 }
 0x440   :  { %v8525_v2 = vcombine.high %v4293_v54, %v4297_v29  ;;  %v8524_v17 = vcombine.low %v4293_v54, %v4297_v29  ;;  %v4862_v29 = vld [vmem:[#allocation12 + $0xd80] sm:$0xff] }
 0x441   :  { %4639 = vmatpush1.bf16.msra.mxu1 %v8518_v33  ;;  %4682 = vmatpush1.bf16.msra.mxu0 %v8520_v58  ;;  %v4300_v33 = vld [vmem:[#allocation12 + $0xbd0] sm:$0xff] }
 0x442   :  { %4640 = vmatprep.subr.bf16.mxu1 %v8527_v61  ;;  %4683 = vmatprep.subr.bf16.mxu0 %v8529_v11  ;;  %v4304_v58 = vld [vmem:[#allocation12 + $0xbf0] sm:$0xff]  ;;  %v4301_v61 = vld [vmem:[#allocation12 + $0xbd8] sm:$0xff] }
 0x443   :  { %v4305_v11 = vld [vmem:[#allocation12 + $0xbf8] sm:$0xff]  ;;  %v8531_v0 = vcombine.high %v4300_v33, %v4304_v58  ;;  %v8530_v37 = vcombine.low %v4300_v33, %v4304_v58 }
 0x444   :  { %v8533_v1 = vcombine.high %v4301_v61, %v4305_v11  ;;  %v8532_v40 = vcombine.low %v4301_v61, %v4305_v11  ;;  %v4870_v11 = vld [vmem:[#allocation12 + $0xdc0] sm:$0xff] }
 0x445   :  { %4641 = vmatpush1.bf16.msra.mxu1 %v8526_v31  ;;  %4684 = vmatpush1.bf16.msra.mxu0 %v8528_v4  ;;  %v4814_v31 = vld [vmem:[#allocation12 + $0xc00] sm:$0xff] }
 0x446   :  { %4712 = vmatprep.subr.bf16.mxu1 %v8475_v15  ;;  %4755 = vmatprep.subr.bf16.mxu0 %v8477_v52  ;;  %v4818_v4 = vld [vmem:[#allocation12 + $0xc20] sm:$0xff]  ;;  %v4815_v15 = vld [vmem:[#allocation12 + $0xc08] sm:$0xff] }
 0x447   :  { %v4819_v52 = vld [vmem:[#allocation12 + $0xc28] sm:$0xff]  ;;  %v8535_v5 = vcombine.high %v4814_v31, %v4818_v4  ;;  %v8534_v10 = vcombine.low %v4814_v31, %v4818_v4 }
 0x448   :  { %4659 = vmatmul.mubr.bf16.vlgmr.msra.gmra.mrb[64].mxu1 %v10434_v42  ;;  %4702 = vmatmul.mubr.bf16.vlgmr.msra.gmra.mrb[48].mxu0 %v10434_v42  ;;  %v8537_v14 = vcombine.high %v4815_v15, %v4819_v52  ;;  %v8536_v26 = vcombine.low %v4815_v15, %v4819_v52  ;;  %v4816_v52 = vld [vmem:[#allocation12 + $0xc10] sm:$0xff] }
 0x449   :  { %4713 = vmatpush1.bf16.msra.mxu1 %v8474_v55  ;;  %4756 = vmatpush1.bf16.msra.mxu0 %v8476_v18  ;;  %v4822_v55 = vld [vmem:[#allocation12 + $0xc40] sm:$0xff] }
 0x44a   :  { %4714 = vmatprep.subr.bf16.mxu1 %v8483_v27  ;;  %4757 = vmatprep.subr.bf16.mxu0 %v8485_v23  ;;  %v4826_v18 = vld [vmem:[#allocation12 + $0xc60] sm:$0xff]  ;;  %v4823_v27 = vld [vmem:[#allocation12 + $0xc48] sm:$0xff] }
 0x44b   :  { %4744 = vmatprep.mubr.bf16.mxu1 %v10479_v20  ;;  %4787 = vmatprep.mubr.bf16.mxu0 %v10479_v20  ;;  %v4827_v23 = vld [vmem:[#allocation12 + $0xc68] sm:$0xff]  ;;  %v8543_v53 = vcombine.high %v4822_v55, %v4826_v18  ;;  %v8542_v59 = vcombine.low %v4822_v55, %v4826_v18 }
 0x44c   :  { %v8545_v3 = vcombine.high %v4823_v27, %v4827_v23  ;;  %v8544_v36 = vcombine.low %v4823_v27, %v4827_v23  ;;  %v4824_v23 = vld [vmem:[#allocation12 + $0xc50] sm:$0xff] }
 0x44d   :  { %4715 = vmatpush1.bf16.msra.mxu1 %v8482_v24  ;;  %4758 = vmatpush1.bf16.msra.mxu0 %v8484_v19  ;;  %v4830_v24 = vld [vmem:[#allocation12 + $0xc80] sm:$0xff] }
 0x44e   :  { %4716 = vmatprep.subr.bf16.mxu1 %v8491_v56  ;;  %4759 = vmatprep.subr.bf16.mxu0 %v8493_v13  ;;  %v4834_v19 = vld [vmem:[#allocation12 + $0xca0] sm:$0xff]  ;;  %v4831_v56 = vld [vmem:[#allocation12 + $0xc88] sm:$0xff] }
 0x44f   :  { %v4835_v13 = vld [vmem:[#allocation12 + $0xca8] sm:$0xff]  ;;  %v8551_v6 = vcombine.high %v4830_v24, %v4834_v19  ;;  %v8550_v32 = vcombine.low %v4830_v24, %v4834_v19 }
 0x450   :  { %v8553_v7 = vcombine.high %v4831_v56, %v4835_v13 }
 0x451   :  { %4717 = vmatpush1.bf16.msra.mxu1 %v8490_v8  ;;  %4760 = vmatpush1.bf16.msra.mxu0 %v8492_v9  ;;  %v4838_v8 = vld [vmem:[#allocation12 + $0xcc0] sm:$0xff] }
 0x452   :  { %4718 = vmatprep.subr.bf16.mxu1 %v8499_v21  ;;  %4761 = vmatprep.subr.bf16.mxu0 %v8501_v22  ;;  %v4842_v9 = vld [vmem:[#allocation12 + $0xce0] sm:$0xff]  ;;  %v4839_v21 = vld [vmem:[#allocation12 + $0xcc8] sm:$0xff] }
 0x453   :  { %v4843_v22 = vld [vmem:[#allocation12 + $0xce8] sm:$0xff]  ;;  %v8559_v30 = vcombine.high %v4838_v8, %v4842_v9 }
 0x454   :  { %v8561_v34 = vcombine.high %v4839_v21, %v4843_v22  ;;  %v8560_v44 = vcombine.low %v4839_v21, %v4843_v22  ;;  %v4840_v22 = vld [vmem:[#allocation12 + $0xcd0] sm:$0xff] }
 0x455   :  { %4719 = vmatpush1.bf16.msra.mxu1 %v8498_v35  ;;  %4762 = vmatpush1.bf16.msra.mxu0 %v8500_v38  ;;  %v4850_v35 = vld [vmem:[#allocation12 + $0xd20] sm:$0xff]  ;;  %v4847_v38 = vld [vmem:[#allocation12 + $0xd08] sm:$0xff] }
 0x456   :  { %4720 = vmatprep.subr.bf16.mxu1 %v8507_v16  ;;  %4763 = vmatprep.subr.bf16.mxu0 %v8509_v39  ;;  %v4851_v16 = vld [vmem:[#allocation12 + $0xd28] sm:$0xff]  ;;  %v8558_v39 = vcombine.low %v4838_v8, %v4842_v9  ;;  %v8567_v43 = vcombine.high %v4846_v60, %v4850_v35 }
 0x457   :  { %v8569_v28 = vcombine.high %v4847_v38, %v4851_v16  ;;  %v8568_v48 = vcombine.low %v4847_v38, %v4851_v16  ;;  %v4848_v16 = vld [vmem:[#allocation12 + $0xd10] sm:$0xff] }
 0x459   :  { %4721 = vmatpush1.bf16.msra.mxu1 %v8506_v47  ;;  %4764 = vmatpush1.bf16.msra.mxu0 %v8508_v50  ;;  %v4858_v47 = vld [vmem:[#allocation12 + $0xd60] sm:$0xff]  ;;  %v4855_v50 = vld [vmem:[#allocation12 + $0xd48] sm:$0xff] }
 0x45a   :  { %4722 = vmatprep.subr.bf16.mxu1 %v8515_v62  ;;  %4765 = vmatprep.subr.bf16.mxu0 %v8517_v45  ;;  %v4859_v62 = vld [vmem:[#allocation12 + $0xd68] sm:$0xff]  ;;  %v8566_v45 = vcombine.low %v4846_v60, %v4850_v35  ;;  %v8575_v51 = vcombine.high %v4854_v46, %v4858_v47 }
 0x45b   :  { %v8577_v54 = vcombine.high %v4855_v50, %v4859_v62  ;;  %v8576_v33 = vcombine.low %v4855_v50, %v4859_v62  ;;  %v4856_v50 = vld [vmem:[#allocation12 + $0xd50] sm:$0xff] }
 0x45c   :  { %v4860_v62 = vld [vmem:[#allocation12 + $0xd70] sm:$0xff] }
 0x45d   :  { %4723 = vmatpush1.bf16.msra.mxu1 %v8514_v57  ;;  %4766 = vmatpush1.bf16.msra.mxu0 %v8516_v12  ;;  %v4866_v57 = vld [vmem:[#allocation12 + $0xda0] sm:$0xff]  ;;  %v4863_v12 = vld [vmem:[#allocation12 + $0xd88] sm:$0xff] }
 0x45e   :  { %4724 = vmatprep.subr.bf16.mxu1 %v8523_v63  ;;  %4767 = vmatprep.subr.bf16.mxu0 %v8525_v2  ;;  %v4867_v63 = vld [vmem:[#allocation12 + $0xda8] sm:$0xff]  ;;  %v8574_v2 = vcombine.low %v4854_v46, %v4858_v47  ;;  %v8583_v58 = vcombine.high %v4862_v29, %v4866_v57 }
 0x45f   :  { %v8585_v61 = vcombine.high %v4863_v12, %v4867_v63  ;;  %v8584_v31 = vcombine.low %v4863_v12, %v4867_v63  ;;  %v4864_v12 = vld [vmem:[#allocation12 + $0xd90] sm:$0xff] }
 0x460   :  { %v4868_v63 = vld [vmem:[#allocation12 + $0xdb0] sm:$0xff] }
 0x461   :  { %4725 = vmatpush1.bf16.msra.mxu1 %v8522_v49  ;;  %4768 = vmatpush1.bf16.msra.mxu0 %v8524_v17  ;;  %v4874_v49 = vld [vmem:[#allocation12 + $0xde0] sm:$0xff]  ;;  %v4871_v17 = vld [vmem:[#allocation12 + $0xdc8] sm:$0xff] }
 0x462   :  { %4726 = vmatprep.subr.bf16.mxu1 %v8531_v0  ;;  %4769 = vmatprep.subr.bf16.mxu0 %v8533_v1  ;;  %v4875_v0 = vld [vmem:[#allocation12 + $0xde8] sm:$0xff]  ;;  %v8582_v1 = vcombine.low %v4862_v29, %v4866_v57  ;;  %v8591_v4 = vcombine.high %v4870_v11, %v4874_v49  ;;  %v8579_v29 = vcombine.high %v4856_v50, %v4860_v62 }
 0x463   :  { %v8593_v15 = vcombine.high %v4871_v17, %v4875_v0  ;;  %v8592_v55 = vcombine.low %v4871_v17, %v4875_v0  ;;  %v4872_v17 = vld [vmem:[#allocation12 + $0xdd0] sm:$0xff] }
 0x464   :  { %v4876_v0 = vld [vmem:[#allocation12 + $0xdf0] sm:$0xff] }
 0x465   :  { %4727 = vmatpush1.bf16.msra.mxu1 %v8530_v37  ;;  %4770 = vmatpush1.bf16.msra.mxu0 %v8532_v40  ;;  %v4820_v37 = vld [vmem:[#allocation12 + $0xc30] sm:$0xff]  ;;  %v4817_v40 = vld [vmem:[#allocation12 + $0xc18] sm:$0xff] }
 0x466   :  { %5198 = vmatprep.subr.bf16.mxu1 %v8535_v5  ;;  %5241 = vmatprep.subr.bf16.mxu0 %v8537_v14  ;;  %v4821_v5 = vld [vmem:[#allocation12 + $0xc38] sm:$0xff]  ;;  %v8590_v14 = vcombine.low %v4870_v11, %v4874_v49  ;;  %v8539_v18 = vcombine.high %v4816_v52, %v4820_v37  ;;  %v8587_v11 = vcombine.high %v4864_v12, %v4868_v63 }
 0x467   :  { %v8541_v27 = vcombine.high %v4817_v40, %v4821_v5  ;;  %v8540_v24 = vcombine.low %v4817_v40, %v4821_v5  ;;  %v5386_v40 = vld [vmem:[#allocation12 + $0xe00] sm:$0xff] }
 0x468   :  { %4745 = vmatmul.mubr.bf16.vlgmr.msra.gmra.mrb[68].mxu1 %v10434_v42  ;;  %4788 = vmatmul.mubr.bf16.vlgmr.msra.gmra.mrb[52].mxu0 %v10434_v42  ;;  %v8552_v42 = vcombine.low %v4831_v56, %v4835_v13  ;;  %v4832_v13 = vld [vmem:[#allocation12 + $0xc90] sm:$0xff]  ;;  %v5390_v5 = vld [vmem:[#allocation12 + $0xe20] sm:$0xff] }
 0x469   :  { %5199 = vmatpush1.bf16.msra.mxu1 %v8534_v10  ;;  %5242 = vmatpush1.bf16.msra.mxu0 %v8536_v26  ;;  %v4828_v10 = vld [vmem:[#allocation12 + $0xc70] sm:$0xff]  ;;  %v4825_v26 = vld [vmem:[#allocation12 + $0xc58] sm:$0xff] }
 0x46a   :  { %5200 = vmatprep.subr.bf16.mxu1 %v8543_v53  ;;  %5243 = vmatprep.subr.bf16.mxu0 %v8545_v3  ;;  %v4829_v53 = vld [vmem:[#allocation12 + $0xc78] sm:$0xff]  ;;  %v8538_v3 = vcombine.low %v4816_v52, %v4820_v37  ;;  %v8547_v19 = vcombine.high %v4824_v23, %v4828_v10  ;;  %v8595_v52 = vcombine.high %v4872_v17, %v4876_v0 }
 0x46b   :  { %5230 = vmatprep.mubr.bf16.mxu1 %v10479_v20  ;;  %5273 = vmatprep.mubr.bf16.mxu0 %v10479_v20  ;;  %v8549_v56 = vcombine.high %v4825_v26, %v4829_v53  ;;  %v8548_v8 = vcombine.low %v4825_v26, %v4829_v53  ;;  %v5394_v26 = vld [vmem:[#allocation12 + $0xe40] sm:$0xff] }
 0x46c   :  { %v5398_v53 = vld [vmem:[#allocation12 + $0xe60] sm:$0xff] }
 0x46d   :  { %5201 = vmatpush1.bf16.msra.mxu1 %v8542_v59  ;;  %5244 = vmatpush1.bf16.msra.mxu0 %v8544_v36  ;;  %v4836_v59 = vld [vmem:[#allocation12 + $0xcb0] sm:$0xff]  ;;  %v4833_v36 = vld [vmem:[#allocation12 + $0xc98] sm:$0xff] }
 0x46e   :  { %5202 = vmatprep.subr.bf16.mxu1 %v8551_v6  ;;  %5245 = vmatprep.subr.bf16.mxu0 %v8553_v7  ;;  %v4837_v6 = vld [vmem:[#allocation12 + $0xcb8] sm:$0xff]  ;;  %v8546_v7 = vcombine.low %v4824_v23, %v4828_v10  ;;  %v8555_v9 = vcombine.high %v4832_v13, %v4836_v59  ;;  %v8599_v23 = vcombine.high %v5386_v40, %v5390_v5 }
 0x46f   :  { %v8557_v21 = vcombine.high %v4833_v36, %v4837_v6  ;;  %v8556_v60 = vcombine.low %v4833_v36, %v4837_v6  ;;  %v5402_v36 = vld [vmem:[#allocation12 + $0xe80] sm:$0xff] }
 0x470   :  { %v5406_v6 = vld [vmem:[#allocation12 + $0xea0] sm:$0xff] }
 0x471   :  { %5203 = vmatpush1.bf16.msra.mxu1 %v8550_v32  ;;  %5246 = vmatpush1.bf16.msra.mxu0 %v8552_v42  ;;  %v4844_v32 = vld [vmem:[#allocation12 + $0xcf0] sm:$0xff]  ;;  %v4841_v42 = vld [vmem:[#allocation12 + $0xcd8] sm:$0xff] }
 0x472   :  { %5204 = vmatprep.subr.bf16.mxu1 %v8559_v30  ;;  %5247 = vmatprep.subr.bf16.mxu0 %v8561_v34  ;;  %v4845_v30 = vld [vmem:[#allocation12 + $0xcf8] sm:$0xff]  ;;  %v8554_v34 = vcombine.low %v4832_v13, %v4836_v59  ;;  %v8563_v35 = vcombine.high %v4840_v22, %v4844_v32  ;;  %v8607_v13 = vcombine.high %v5394_v26, %v5398_v53 }
 0x473   :  { %v8565_v38 = vcombine.high %v4841_v42, %v4845_v30  ;;  %v8564_v46 = vcombine.low %v4841_v42, %v4845_v30  ;;  %v5410_v42 = vld [vmem:[#allocation12 + $0xec0] sm:$0xff] }
 0x474   :  { %v5414_v30 = vld [vmem:[#allocation12 + $0xee0] sm:$0xff] }
 0x475   :  { %5205 = vmatpush1.bf16.msra.mxu1 %v8558_v39  ;;  %5248 = vmatpush1.bf16.msra.mxu0 %v8560_v44  ;;  %v4852_v39 = vld [vmem:[#allocation12 + $0xd30] sm:$0xff]  ;;  %v4849_v44 = vld [vmem:[#allocation12 + $0xd18] sm:$0xff] }
 0x476   :  { %5206 = vmatprep.subr.bf16.mxu1 %v8567_v43  ;;  %5249 = vmatprep.subr.bf16.mxu0 %v8569_v28  ;;  %v4853_v43 = vld [vmem:[#allocation12 + $0xd38] sm:$0xff]  ;;  %v8562_v28 = vcombine.low %v4840_v22, %v4844_v32  ;;  %v8571_v47 = vcombine.high %v4848_v16, %v4852_v39  ;;  %v8615_v22 = vcombine.high %v5402_v36, %v5406_v6 }
 0x479   :  { %5207 = vmatpush1.bf16.msra.mxu1 %v8566_v45  ;;  %5250 = vmatpush1.bf16.msra.mxu0 %v8568_v48  ;;  %v4857_v45 = vld [vmem:[#allocation12 + $0xd58] sm:$0xff] }
 0x47a   :  { %5208 = vmatprep.subr.bf16.mxu1 %v8575_v51  ;;  %5251 = vmatprep.subr.bf16.mxu0 %v8577_v54  ;;  %v4861_v48 = vld [vmem:[#allocation12 + $0xd78] sm:$0xff]  ;;  %v8570_v51 = vcombine.low %v4848_v16, %v4852_v39  ;;  %v8572_v54 = vcombine.low %v4849_v44, %v4853_v43  ;;  %v8623_v16 = vcombine.high %v5410_v42, %v5414_v30 }
 0x47b   :  { %v8581_v57 = vcombine.high %v4857_v45, %v4861_v48 }
 0x47d   :  { %5209 = vmatpush1.bf16.msra.mxu1 %v8574_v2  ;;  %5252 = vmatpush1.bf16.msra.mxu0 %v8576_v33  ;;  %v4865_v2 = vld [vmem:[#allocation12 + $0xd98] sm:$0xff] }
 0x47e   :  { %5210 = vmatprep.subr.bf16.mxu1 %v8583_v58  ;;  %5253 = vmatprep.subr.bf16.mxu0 %v8585_v61  ;;  %v4869_v33 = vld [vmem:[#allocation12 + $0xdb8] sm:$0xff]  ;;  %v8578_v58 = vcombine.low %v4856_v50, %v4860_v62  ;;  %v8580_v61 = vcombine.low %v4857_v45, %v4861_v48  ;;  %v5426_v45 = vld [vmem:[#allocation12 + $0xf40] sm:$0xff] }
 0x47f   :  { %v8589_v49 = vcombine.high %v4865_v2, %v4869_v33  ;;  %v5430_v48 = vld [vmem:[#allocation12 + $0xf60] sm:$0xff] }
 0x481   :  { %5211 = vmatpush1.bf16.msra.mxu1 %v8582_v1  ;;  %5254 = vmatpush1.bf16.msra.mxu0 %v8584_v31  ;;  %v4873_v1 = vld [vmem:[#allocation12 + $0xdd8] sm:$0xff] }
 0x482   :  { %5212 = vmatprep.subr.bf16.mxu1 %v8591_v4  ;;  %5255 = vmatprep.subr.bf16.mxu0 %v8593_v15  ;;  %v4877_v31 = vld [vmem:[#allocation12 + $0xdf8] sm:$0xff]  ;;  %v8586_v4 = vcombine.low %v4864_v12, %v4868_v63  ;;  %v8588_v15 = vcombine.low %v4865_v2, %v4869_v33  ;;  %v8639_v12 = vcombine.high %v5426_v45, %v5430_v48  ;;  %v5434_v2 = vld [vmem:[#allocation12 + $0xf80] sm:$0xff] }
 0x483   :  { %v8597_v37 = vcombine.high %v4873_v1, %v4877_v31  ;;  %v5438_v33 = vld [vmem:[#allocation12 + $0xfa0] sm:$0xff] }
 0x485   :  { %5213 = vmatpush1.bf16.msra.mxu1 %v8590_v14  ;;  %5256 = vmatpush1.bf16.msra.mxu0 %v8592_v55  ;;  %v5387_v14 = vld [vmem:[#allocation12 + $0xe08] sm:$0xff] }
 0x486   :  { %5284 = vmatprep.subr.bf16.mxu1 %v8539_v18  ;;  %5327 = vmatprep.subr.bf16.mxu0 %v8541_v27  ;;  %v5391_v55 = vld [vmem:[#allocation12 + $0xe28] sm:$0xff]  ;;  %v8594_v18 = vcombine.low %v4872_v17, %v4876_v0  ;;  %v8596_v27 = vcombine.low %v4873_v1, %v4877_v31  ;;  %v8647_v17 = vcombine.high %v5434_v2, %v5438_v33  ;;  %v5442_v1 = vld [vmem:[#allocation12 + $0xfc0] sm:$0xff] }
 0x487   :  { %v8601_v10 = vcombine.high %v5387_v14, %v5391_v55  ;;  %v5446_v31 = vld [vmem:[#allocation12 + $0xfe0] sm:$0xff] }
 0x488   :  { %5231 = vmatmul.mubr.bf16.vlgmr.msra.gmra.mrb[64].mxu1 %v10442_v41  ;;  %5274 = vmatmul.mubr.bf16.vlgmr.msra.gmra.mrb[48].mxu0 %v10442_v41 }
 0x489   :  { %5285 = vmatpush1.bf16.msra.mxu1 %v8538_v3  ;;  %5328 = vmatpush1.bf16.msra.mxu0 %v8540_v24  ;;  %v5395_v3 = vld [vmem:[#allocation12 + $0xe48] sm:$0xff] }
 0x48a   :  { %5286 = vmatprep.subr.bf16.mxu1 %v8547_v19  ;;  %5329 = vmatprep.subr.bf16.mxu0 %v8549_v56  ;;  %v5399_v24 = vld [vmem:[#allocation12 + $0xe68] sm:$0xff]  ;;  %v8598_v19 = vcombine.low %v5386_v40, %v5390_v5  ;;  %v8600_v56 = vcombine.low %v5387_v14, %v5391_v55  ;;  %v8655_v40 = vcombine.high %v5442_v1, %v5446_v31  ;;  %v5388_v14 = vld [vmem:[#allocation12 + $0xe10] sm:$0xff] }
 0x48b   :  { %5316 = vmatprep.mubr.bf16.mxu1 %v10479_v20  ;;  %5359 = vmatprep.mubr.bf16.mxu0 %v10479_v20  ;;  %v8573_v20 = vcombine.high %v4849_v44, %v4853_v43  ;;  %v8609_v59 = vcombine.high %v5395_v3, %v5399_v24  ;;  %v5418_v44 = vld [vmem:[#allocation12 + $0xf00] sm:$0xff]  ;;  %v5392_v55 = vld [vmem:[#allocation12 + $0xe30] sm:$0xff] }
 0x48c   :  { %v5422_v43 = vld [vmem:[#allocation12 + $0xf20] sm:$0xff] }
 0x48d   :  { %5287 = vmatpush1.bf16.msra.mxu1 %v8546_v7  ;;  %5330 = vmatpush1.bf16.msra.mxu0 %v8548_v8  ;;  %v5403_v7 = vld [vmem:[#allocation12 + $0xe88] sm:$0xff]  ;;  %v8631_v50 = vcombine.high %v5418_v44, %v5422_v43 }
 0x48e   :  { %5288 = vmatprep.subr.bf16.mxu1 %v8555_v9  ;;  %5331 = vmatprep.subr.bf16.mxu0 %v8557_v21  ;;  %v5407_v8 = vld [vmem:[#allocation12 + $0xea8] sm:$0xff]  ;;  %v8606_v9 = vcombine.low %v5394_v26, %v5398_v53  ;;  %v8608_v21 = vcombine.low %v5395_v3, %v5399_v24  ;;  %v8603_v26 = vcombine.high %v5388_v14, %v5392_v55  ;;  %v5396_v3 = vld [vmem:[#allocation12 + $0xe50] sm:$0xff] }
 0x48f   :  { %v8617_v32 = vcombine.high %v5403_v7, %v5407_v8  ;;  %v5400_v24 = vld [vmem:[#allocation12 + $0xe70] sm:$0xff] }
 0x491   :  { %5289 = vmatpush1.bf16.msra.mxu1 %v8554_v34  ;;  %5332 = vmatpush1.bf16.msra.mxu0 %v8556_v60  ;;  %v5411_v34 = vld [vmem:[#allocation12 + $0xec8] sm:$0xff] }
 0x492   :  { %5290 = vmatprep.subr.bf16.mxu1 %v8563_v35  ;;  %5333 = vmatprep.subr.bf16.mxu0 %v8565_v38  ;;  %v5415_v60 = vld [vmem:[#allocation12 + $0xee8] sm:$0xff]  ;;  %v8616_v38 = vcombine.low %v5403_v7, %v5407_v8  ;;  %v5404_v7 = vld [vmem:[#allocation12 + $0xe90] sm:$0xff] }
 0x493   :  { %v10505_v35 = vld [vmem:[#allocation3] sm:$0xff]  ;;  %v8625_v39 = vcombine.high %v5411_v34, %v5415_v60 }
 0x494   :  { %v5408_v8 = vld [vmem:[#allocation12 + $0xeb0] sm:$0xff] }
 0x495   :  { %5291 = vmatpush1.bf16.msra.mxu1 %v8562_v28  ;;  %5334 = vmatpush1.bf16.msra.mxu0 %v8564_v46  ;;  %v5419_v28 = vld [vmem:[#allocation12 + $0xf08] sm:$0xff] }
 0x496   :  { %5292 = vmatprep.subr.bf16.mxu1 %v8571_v47  ;;  %5335 = vmatprep.subr.bf16.mxu0 %v8573_v20  ;;  %v5423_v46 = vld [vmem:[#allocation12 + $0xf28] sm:$0xff]  ;;  %v8622_v47 = vcombine.low %v5410_v42, %v5414_v30  ;;  %v8624_v20 = vcombine.low %v5411_v34, %v5415_v60  ;;  %v8619_v42 = vcombine.high %v5404_v7, %v5408_v8  ;;  %v5412_v34 = vld [vmem:[#allocation12 + $0xed0] sm:$0xff] }
 0x497   :  { %v8633_v62 = vcombine.high %v5419_v28, %v5423_v46  ;;  %v5416_v60 = vld [vmem:[#allocation12 + $0xef0] sm:$0xff] }
 0x499   :  { %5293 = vmatpush1.bf16.msra.mxu1 %v8570_v51  ;;  %5336 = vmatpush1.bf16.msra.mxu0 %v8572_v54  ;;  %v5427_v51 = vld [vmem:[#allocation12 + $0xf48] sm:$0xff] }
 0x49a   :  { %5294 = vmatprep.subr.bf16.mxu1 %v8579_v29  ;;  %5337 = vmatprep.subr.bf16.mxu0 %v8581_v57  ;;  %v5431_v54 = vld [vmem:[#allocation12 + $0xf68] sm:$0xff]  ;;  %v8630_v29 = vcombine.low %v5418_v44, %v5422_v43  ;;  %v8632_v57 = vcombine.low %v5419_v28, %v5423_v46  ;;  %v8627_v44 = vcombine.high %v5412_v34, %v5416_v60  ;;  %v5420_v28 = vld [vmem:[#allocation12 + $0xf10] sm:$0xff] }
 0x49b   :  { %v8641_v63 = vcombine.high %v5427_v51, %v5431_v54  ;;  %v5424_v46 = vld [vmem:[#allocation12 + $0xf30] sm:$0xff] }
 0x49d   :  { %5295 = vmatpush1.bf16.msra.mxu1 %v8578_v58  ;;  %5338 = vmatpush1.bf16.msra.mxu0 %v8580_v61  ;;  %v5435_v58 = vld [vmem:[#allocation12 + $0xf88] sm:$0xff] }
 0x49e   :  { %5296 = vmatprep.subr.bf16.mxu1 %v8587_v11  ;;  %5339 = vmatprep.subr.bf16.mxu0 %v8589_v49  ;;  %v5439_v61 = vld [vmem:[#allocation12 + $0xfa8] sm:$0xff]  ;;  %v8638_v11 = vcombine.low %v5426_v45, %v5430_v48  ;;  %v8640_v49 = vcombine.low %v5427_v51, %v5431_v54  ;;  %v8635_v45 = vcombine.high %v5420_v28, %v5424_v46  ;;  %v5428_v48 = vld [vmem:[#allocation12 + $0xf50] sm:$0xff]  ;;  %v5429_v54 = vld [vmem:[#allocation12 + $0xf58] sm:$0xff] }
 0x49f   :  { %v8649_v0 = vcombine.high %v5435_v58, %v5439_v61  ;;  %v5432_v51 = vld [vmem:[#allocation12 + $0xf70] sm:$0xff] }
 0x4a1   :  { %5297 = vmatpush1.bf16.msra.mxu1 %v8586_v4  ;;  %5340 = vmatpush1.bf16.msra.mxu0 %v8588_v15  ;;  %v5443_v4 = vld [vmem:[#allocation12 + $0xfc8] sm:$0xff] }
 0x4a2   :  { %5298 = vmatprep.subr.bf16.mxu1 %v8595_v52  ;;  %5341 = vmatprep.subr.bf16.mxu0 %v8597_v37  ;;  %v5447_v15 = vld [vmem:[#allocation12 + $0xfe8] sm:$0xff]  ;;  %v8646_v52 = vcombine.low %v5434_v2, %v5438_v33  ;;  %v8648_v37 = vcombine.low %v5435_v58, %v5439_v61  ;;  %v5436_v33 = vld [vmem:[#allocation12 + $0xf90] sm:$0xff]  ;;  %v5437_v61 = vld [vmem:[#allocation12 + $0xf98] sm:$0xff] }
 0x4a3   :  { %v8657_v5 = vcombine.high %v5443_v4, %v5447_v15  ;;  %v5440_v58 = vld [vmem:[#allocation12 + $0xfb0] sm:$0xff] }
 0x4a5   :  { %5299 = vmatpush1.bf16.msra.mxu1 %v8594_v18  ;;  %5342 = vmatpush1.bf16.msra.mxu0 %v8596_v27  ;;  %v5389_v18 = vld [vmem:[#allocation12 + $0xe18] sm:$0xff] }
 0x4a6   :  { %5770 = vmatprep.subr.bf16.mxu1 %v8599_v23  ;;  %5813 = vmatprep.subr.bf16.mxu0 %v8601_v10  ;;  %v5393_v27 = vld [vmem:[#allocation12 + $0xe38] sm:$0xff]  ;;  %v8654_v23 = vcombine.low %v5442_v1, %v5446_v31  ;;  %v8656_v10 = vcombine.low %v5443_v4, %v5447_v15  ;;  %v5444_v31 = vld [vmem:[#allocation12 + $0xfd0] sm:$0xff] }
 0x4a7   :  { %v8605_v53 = vcombine.high %v5389_v18, %v5393_v27  ;;  %v5448_v4 = vld [vmem:[#allocation12 + $0xff0] sm:$0xff]  ;;  %v5445_v15 = vld [vmem:[#allocation12 + $0xfd8] sm:$0xff] }
 0x4a8   :  { %5317 = vmatmul.mubr.bf16.vlgmr.msra.gmra.mrb[68].mxu1 %v10442_v41  ;;  %5360 = vmatmul.mubr.bf16.vlgmr.msra.gmra.mrb[52].mxu0 %v10442_v41  ;;  %v8614_v41 = vcombine.low %v5402_v36, %v5406_v6  ;;  %v8611_v36 = vcombine.high %v5396_v3, %v5400_v24 }
 0x4a9   :  { %5771 = vmatpush1.bf16.msra.mxu1 %v8598_v19  ;;  %5814 = vmatpush1.bf16.msra.mxu0 %v8600_v56  ;;  %v5397_v19 = vld [vmem:[#allocation12 + $0xe58] sm:$0xff] }
 0x4aa   :  { %5772 = vmatprep.subr.bf16.mxu1 %v8607_v13  ;;  %5815 = vmatprep.subr.bf16.mxu0 %v8609_v59  ;;  %v5401_v56 = vld [vmem:[#allocation12 + $0xe78] sm:$0xff]  ;;  %v8602_v13 = vcombine.low %v5388_v14, %v5392_v55  ;;  %v8604_v59 = vcombine.low %v5389_v18, %v5393_v27  ;;  %v8658_v55 = vcombine.low %v5444_v31, %v5448_v4 }
 0x4ab   :  { %5802 = vmatprep.mubr.bf16.mxu1 %v10505_v35  ;;  %5845 = vmatprep.mubr.bf16.mxu0 %v10505_v35  ;;  %v8613_v6 = vcombine.high %v5397_v19, %v5401_v56  ;;  %v9262_v27 = vld [vmem:[#allocation15 + $0x4] ss:$16 sps:$4 sm:$0xff]  }
 0x4ad   :  { %5773 = vmatpush1.bf16.msra.mxu1 %v8606_v9  ;;  %5816 = vmatpush1.bf16.msra.mxu0 %v8608_v21  ;;  %v5405_v9 = vld [vmem:[#allocation12 + $0xe98] sm:$0xff] }
 0x4ae   :  { %5774 = vmatprep.subr.bf16.mxu1 %v8615_v22  ;;  %5817 = vmatprep.subr.bf16.mxu0 %v8617_v32  ;;  %v5409_v21 = vld [vmem:[#allocation12 + $0xeb8] sm:$0xff]  ;;  %v8610_v22 = vcombine.low %v5396_v3, %v5400_v24  ;;  %v8612_v32 = vcombine.low %v5397_v19, %v5401_v56  ;;  %v9271_v3 = vld [vmem:[#allocation15 + $0x2c] ss:$16 sps:$4 sm:$0xff]   ;;  %v9269_v19 = vld [vmem:[#allocation15 + $0x28] ss:$16 sps:$4 sm:$0xff]  }
 0x4af   :  { %v8621_v30 = vcombine.high %v5405_v9, %v5409_v21  ;;  %v9266_v24 = vld [vmem:[#allocation15 + $0x20] ss:$16 sps:$4 sm:$0xff]   ;;  %v9274_v56 = vld [vmem:[#allocation15 + $0x44] ss:$16 sps:$4 sm:$0xff]  }
 0x4b1   :  { %5775 = vmatpush1.bf16.msra.mxu1 %v8614_v41  ;;  %5818 = vmatpush1.bf16.msra.mxu0 %v8616_v38  ;;  %v5413_v41 = vld [vmem:[#allocation12 + $0xed8] sm:$0xff] }
 0x4b2   :  { %5776 = vmatprep.subr.bf16.mxu1 %v8623_v16  ;;  %5819 = vmatprep.subr.bf16.mxu0 %v8625_v39  ;;  %v5417_v38 = vld [vmem:[#allocation12 + $0xef8] sm:$0xff]  ;;  %v8618_v16 = vcombine.low %v5404_v7, %v5408_v8  ;;  %v8620_v39 = vcombine.low %v5405_v9, %v5409_v21  ;;  %v9283_v7 = vld [vmem:[#allocation15 + $0x6c] ss:$16 sps:$4 sm:$0xff]  }
 0x4b3   :  { %v8629_v43 = vcombine.high %v5413_v41, %v5417_v38  ;;  %v9278_v8 = vld [vmem:[#allocation15 + $0x60] ss:$16 sps:$4 sm:$0xff]   ;;  %v9286_v9 = vld [vmem:[#allocation15 + $0x84] ss:$16 sps:$4 sm:$0xff]   ;;  %v9289_v21 = vld [vmem:[#allocation15 + $0x8c] ss:$16 sps:$4 sm:$0xff]  }
 0x4b5   :  { %5777 = vmatpush1.bf16.msra.mxu1 %v8622_v47  ;;  %5820 = vmatpush1.bf16.msra.mxu0 %v8624_v20  ;;  %v5421_v47 = vld [vmem:[#allocation12 + $0xf18] sm:$0xff] }
 0x4b6   :  { %5778 = vmatprep.subr.bf16.mxu1 %v8631_v50  ;;  %5821 = vmatprep.subr.bf16.mxu0 %v8633_v62  ;;  %v5425_v20 = vld [vmem:[#allocation12 + $0xf38] sm:$0xff]  ;;  %v8626_v50 = vcombine.low %v5412_v34, %v5416_v60  ;;  %v8628_v62 = vcombine.low %v5413_v41, %v5417_v38  ;;  %v9293_v60 = vld [vmem:[#allocation15 + $0xa8] ss:$16 sps:$4 sm:$0xff]   ;;  %v9301_v38 = vld [vmem:[#allocation15 + $0xcc] ss:$16 sps:$4 sm:$0xff]  }
 0x4b7   :  { %v9290_v34 = vld [vmem:[#allocation15 + $0xa0] ss:$16 sps:$4 sm:$0xff]   ;;  %v9298_v41 = vld [vmem:[#allocation15 + $0xc4] ss:$16 sps:$4 sm:$0xff]  }
 0x4b9   :  { %5779 = vmatpush1.bf16.msra.mxu1 %v8630_v29  ;;  %5822 = vmatpush1.bf16.msra.mxu0 %v8632_v57  ;;  %v5433_v29 = vld [vmem:[#allocation12 + $0xf78] sm:$0xff]  ;;  %v8634_v57 = vcombine.low %v5420_v28, %v5424_v46  ;;  %v9305_v46 = vld [vmem:[#allocation15 + $0xe8] ss:$16 sps:$4 sm:$0xff]  }
 0x4ba   :  { %5780 = vmatprep.subr.bf16.mxu1 %v8639_v12  ;;  %5823 = vmatprep.subr.bf16.mxu0 %v8641_v63  ;;  %v8636_v12 = vcombine.low %v5421_v47, %v5425_v20  ;;  %v8643_v63 = vcombine.high %v5428_v48, %v5432_v51  ;;  %v8645_v2 = vcombine.high %v5429_v54, %v5433_v29  ;;  %v9302_v28 = vld [vmem:[#allocation15 + $0xe0] ss:$16 sps:$4 sm:$0xff]  }
 0x4bd   :  { %5781 = vmatpush1.bf16.msra.mxu1 %v8638_v11  ;;  %5824 = vmatpush1.bf16.msra.mxu0 %v8640_v49  ;;  %v5441_v11 = vld [vmem:[#allocation12 + $0xfb8] sm:$0xff]  ;;  %v8642_v49 = vcombine.low %v5428_v48, %v5432_v51  ;;  %v9317_v51 = vld [vmem:[#allocation15 + $0x128] ss:$16 sps:$4 sm:$0xff]  }
 0x4be   :  { %5782 = vmatprep.subr.bf16.mxu1 %v8647_v17  ;;  %5825 = vmatprep.subr.bf16.mxu0 %v8649_v0  ;;  %v8644_v17 = vcombine.low %v5429_v54, %v5433_v29  ;;  %v8651_v0 = vcombine.high %v5436_v33, %v5440_v58  ;;  %v8653_v1 = vcombine.high %v5437_v61, %v5441_v11  ;;  %v9314_v48 = vld [vmem:[#allocation15 + $0x120] ss:$16 sps:$4 sm:$0xff]   ;;  %v9322_v54 = vld [vmem:[#allocation15 + $0x144] ss:$16 sps:$4 sm:$0xff]   ;;  %v9325_v29 = vld [vmem:[#allocation15 + $0x14c] ss:$16 sps:$4 sm:$0xff]  }
 0x4c1   :  { %5783 = vmatpush1.bf16.msra.mxu1 %v8646_v52  ;;  %5826 = vmatpush1.bf16.msra.mxu0 %v8648_v37  ;;  %v5449_v52 = vld [vmem:[#allocation12 + $0xff8] sm:$0xff]  ;;  %v8650_v37 = vcombine.low %v5436_v33, %v5440_v58  ;;  %v9329_v58 = vld [vmem:[#allocation15 + $0x168] ss:$16 sps:$4 sm:$0xff]  }
 0x4c2   :  { %5784 = vmatprep.subr.bf16.mxu1 %v8655_v40  ;;  %5827 = vmatprep.subr.bf16.mxu0 %v8657_v5  ;;  %v8652_v40 = vcombine.low %v5437_v61, %v5441_v11  ;;  %v8659_v5 = vcombine.high %v5444_v31, %v5448_v4  ;;  %v8661_v14 = vcombine.high %v5445_v15, %v5449_v52  ;;  %v9326_v33 = vld [vmem:[#allocation15 + $0x160] ss:$16 sps:$4 sm:$0xff]   ;;  %v9334_v61 = vld [vmem:[#allocation15 + $0x184] ss:$16 sps:$4 sm:$0xff]   ;;  %v9337_v11 = vld [vmem:[#allocation15 + $0x18c] ss:$16 sps:$4 sm:$0xff]  }
 0x4c3   :  { %v8660_v18 = vcombine.low %v5445_v15, %v5449_v52  ;;  %v9338_v31 = vld [vmem:[#allocation15 + $0x1a0] ss:$16 sps:$4 sm:$0xff]   ;;  %v9341_v4 = vld [vmem:[#allocation15 + $0x1a8] ss:$16 sps:$4 sm:$0xff]   ;;  %v9346_v15 = vld [vmem:[#allocation15 + $0x1c4] ss:$16 sps:$4 sm:$0xff]  }
 0x4c4   :  { %v9349_v52 = vld [vmem:[#allocation15 + $0x1cc] ss:$16 sps:$4 sm:$0xff]  }
 0x4c5   :  { %5785 = vmatpush1.bf16.msra.mxu1 %v8654_v23  ;;  %5828 = vmatpush1.bf16.msra.mxu0 %v8656_v10  ;;  %v9265_v23 = vld [vmem:[#allocation15 + $0xc] ss:$16 sps:$4 sm:$0xff]   ;;  %v9260_v10 = vld [vmem:[#allocation15] ss:$16 sps:$4 sm:$0xff]  }
 0x4c6   :  { %5856 = vmatprep.subr.bf16.mxu1 %v8603_v26  ;;  %5899 = vmatprep.subr.bf16.mxu0 %v8605_v53  ;;  %v9263_v26 = vld [vmem:[#allocation15 + $0x8] ss:$16 sps:$4 sm:$0xff]   ;;  %v9268_v53 = vld [vmem:[#allocation15 + $0x24] ss:$16 sps:$4 sm:$0xff]  }
 0x4c8   :  { %5803 = vmatmul.mubr.bf16.vlgmr.msra.gmra.mrb[64].mxu1 %v10455_v25  ;;  %5846 = vmatmul.mubr.bf16.vlgmr.msra.gmra.mrb[48].mxu0 %v10455_v25 }
 0x4c9   :  { %5857 = vmatpush1.bf16.msra.mxu1 %v8602_v13  ;;  %5900 = vmatpush1.bf16.msra.mxu0 %v8604_v59  ;;  %v9277_v13 = vld [vmem:[#allocation15 + $0x4c] ss:$16 sps:$4 sm:$0xff]   ;;  %v9272_v59 = vld [vmem:[#allocation15 + $0x40] ss:$16 sps:$4 sm:$0xff]  }
 0x4ca   :  { %5858 = vmatprep.subr.bf16.mxu1 %v8611_v36  ;;  %5901 = vmatprep.subr.bf16.mxu0 %v8613_v6  ;;  %v9275_v36 = vld [vmem:[#allocation15 + $0x48] ss:$16 sps:$4 sm:$0xff]   ;;  %v9280_v6 = vld [vmem:[#allocation15 + $0x64] ss:$16 sps:$4 sm:$0xff]  }
 0x4cb   :  { %5888 = vmatprep.mubr.bf16.mxu1 %v10505_v35  ;;  %5931 = vmatprep.mubr.bf16.mxu0 %v10505_v35  ;;  %v8637_v35 = vcombine.high %v5421_v47, %v5425_v20  ;;  %v9310_v47 = vld [vmem:[#allocation15 + $0x104] ss:$16 sps:$4 sm:$0xff]   ;;  %v9313_v20 = vld [vmem:[#allocation15 + $0x10c] ss:$16 sps:$4 sm:$0xff]  }
 0x4cd   :  { %5859 = vmatpush1.bf16.msra.mxu1 %v8610_v22  ;;  %5902 = vmatpush1.bf16.msra.mxu0 %v8612_v32  ;;  %v9284_v22 = vld [vmem:[#allocation15 + $0x80] ss:$16 sps:$4 sm:$0xff]   ;;  %v9287_v32 = vld [vmem:[#allocation15 + $0x88] ss:$16 sps:$4 sm:$0xff]  }
 0x4ce   :  { %5860 = vmatprep.subr.bf16.mxu1 %v8619_v42  ;;  %5903 = vmatprep.subr.bf16.mxu0 %v8621_v30  ;;  %v9292_v42 = vld [vmem:[#allocation15 + $0xa4] ss:$16 sps:$4 sm:$0xff]   ;;  %v9295_v30 = vld [vmem:[#allocation15 + $0xac] ss:$16 sps:$4 sm:$0xff]  }
 0x4d1   :  { %5861 = vmatpush1.bf16.msra.mxu1 %v8618_v16  ;;  %5904 = vmatpush1.bf16.msra.mxu0 %v8620_v39  ;;  %v9296_v16 = vld [vmem:[#allocation15 + $0xc0] ss:$16 sps:$4 sm:$0xff]   ;;  %v9299_v39 = vld [vmem:[#allocation15 + $0xc8] ss:$16 sps:$4 sm:$0xff]  }
 0x4d2   :  { %5862 = vmatprep.subr.bf16.mxu1 %v8627_v44  ;;  %5905 = vmatprep.subr.bf16.mxu0 %v8629_v43  ;;  %v9304_v44 = vld [vmem:[#allocation15 + $0xe4] ss:$16 sps:$4 sm:$0xff]   ;;  %v9307_v43 = vld [vmem:[#allocation15 + $0xec] ss:$16 sps:$4 sm:$0xff]  }
 0x4d5   :  { %5863 = vmatpush1.bf16.msra.mxu1 %v8626_v50  ;;  %5906 = vmatpush1.bf16.msra.mxu0 %v8628_v62  ;;  %v9308_v50 = vld [vmem:[#allocation15 + $0x100] ss:$16 sps:$4 sm:$0xff]   ;;  %v9311_v62 = vld [vmem:[#allocation15 + $0x108] ss:$16 sps:$4 sm:$0xff]  }
 0x4d6   :  { %5864 = vmatprep.subr.bf16.mxu1 %v8635_v45  ;;  %5907 = vmatprep.subr.bf16.mxu0 %v8637_v35  ;;  %v9316_v45 = vld [vmem:[#allocation15 + $0x124] ss:$16 sps:$4 sm:$0xff]   ;;  %v9319_v35 = vld [vmem:[#allocation15 + $0x12c] ss:$16 sps:$4 sm:$0xff]  }
 0x4d9   :  { %5865 = vmatpush1.bf16.msra.mxu1 %v8634_v57  ;;  %5908 = vmatpush1.bf16.msra.mxu0 %v8636_v12  ;;  %v9320_v57 = vld [vmem:[#allocation15 + $0x140] ss:$16 sps:$4 sm:$0xff]   ;;  %v9323_v12 = vld [vmem:[#allocation15 + $0x148] ss:$16 sps:$4 sm:$0xff]  }
 0x4da   :  { %5866 = vmatprep.subr.bf16.mxu1 %v8643_v63  ;;  %5909 = vmatprep.subr.bf16.mxu0 %v8645_v2  ;;  %v9328_v63 = vld [vmem:[#allocation15 + $0x164] ss:$16 sps:$4 sm:$0xff]   ;;  %v9331_v2 = vld [vmem:[#allocation15 + $0x16c] ss:$16 sps:$4 sm:$0xff]  }
 0x4dd   :  { %5867 = vmatpush1.bf16.msra.mxu1 %v8642_v49  ;;  %5910 = vmatpush1.bf16.msra.mxu0 %v8644_v17  ;;  %v9332_v49 = vld [vmem:[#allocation15 + $0x180] ss:$16 sps:$4 sm:$0xff]   ;;  %v9335_v17 = vld [vmem:[#allocation15 + $0x188] ss:$16 sps:$4 sm:$0xff]  }
 0x4de   :  { %5868 = vmatprep.subr.bf16.mxu1 %v8651_v0  ;;  %5911 = vmatprep.subr.bf16.mxu0 %v8653_v1  ;;  %v9340_v0 = vld [vmem:[#allocation15 + $0x1a4] ss:$16 sps:$4 sm:$0xff]   ;;  %v9343_v1 = vld [vmem:[#allocation15 + $0x1ac] ss:$16 sps:$4 sm:$0xff]  }
 0x4e1   :  { %5869 = vmatpush1.bf16.msra.mxu1 %v8650_v37  ;;  %5912 = vmatpush1.bf16.msra.mxu0 %v8652_v40  ;;  %v9344_v37 = vld [vmem:[#allocation15 + $0x1c0] ss:$16 sps:$4 sm:$0xff]   ;;  %v9347_v40 = vld [vmem:[#allocation15 + $0x1c8] ss:$16 sps:$4 sm:$0xff]  }
 0x4e2   :  { %5870 = vmatprep.subr.bf16.mxu1 %v8659_v5  ;;  %5913 = vmatprep.subr.bf16.mxu0 %v8661_v14  ;;  %v9352_v5 = vld [vmem:[#allocation15 + $0x1e4] ss:$16 sps:$4 sm:$0xff]   ;;  %v9355_v14 = vld [vmem:[#allocation15 + $0x1ec] ss:$16 sps:$4 sm:$0xff]  }
 0x4e5   :  { %5871 = vmatpush1.bf16.msra.mxu1 %v8658_v55  ;;  %5914 = vmatpush1.bf16.msra.mxu0 %v8660_v18  ;;  %v9350_v55 = vld [vmem:[#allocation15 + $0x1e0] ss:$16 sps:$4 sm:$0xff]   ;;  %v9353_v18 = vld [vmem:[#allocation15 + $0x1e8] ss:$16 sps:$4 sm:$0xff]  }
 0x4e6   :  { %7614 = vmatprep.subr.bf16.mxu1 %v9262_v27  ;;  %7786 = vmatprep.subr.bf16.mxu0 %v9265_v23  ;;  %v9358_v27 = vld [vmem:[#allocation15 + $0x204] ss:$16 sps:$4 sm:$0xff]   ;;  %v9361_v23 = vld [vmem:[#allocation15 + $0x20c] ss:$16 sps:$4 sm:$0xff]  }
 0x4e8   :  { %5889 = vmatmul.mubr.bf16.vlgmr.msra.gmra.mrb[68].mxu1 %v10455_v25  ;;  %5932 = vmatmul.mubr.bf16.vlgmr.msra.gmra.mrb[52].mxu0 %v10455_v25  ;;  %v9281_v25 = vld [vmem:[#allocation15 + $0x68] ss:$16 sps:$4 sm:$0xff]  }
 0x4e9   :  { %7615 = vmatpush1.bf16.msra.mxu1 %v9260_v10  ;;  %7787 = vmatpush1.bf16.msra.mxu0 %v9263_v26  ;;  %v5976_v10 = vlaneseq }
 0x4ea   :  { %7616 = vmatprep.subr.bf16.mxu1 %v9268_v53  ;;  %7788 = vmatprep.subr.bf16.mxu0 %v9271_v3 }
 0x4eb   :  { %v5977_v26 = vshrl.u32 %v5976_v10, 7  ;;  %v9383_v10 = vld [vmem:[#allocation15 + $0x288] ss:$16 sps:$4 sm:$0xff]  }
 0x4ed   :  { %7617 = vmatpush1.bf16.msra.mxu1 %v9266_v24  ;;  %7789 = vmatpush1.bf16.msra.mxu0 %v9269_v19  ;;  %v5994_v53 = vsub.s32 4, %v5977_v26  ;;  %v6002_v3 = vsub.s32 6, %v5977_v26  ;;  %v5974_v24 = vld [vmem:[#allocation13] sm:$0xff]  ;;  %v5998_v19 = vsub.s32 5, %v5977_v26 }
 0x4ee   :  { %7618 = vmatprep.subr.bf16.mxu1 %v9274_v56  ;;  %7790 = vmatprep.subr.bf16.mxu0 %v9277_v13  ;;  %v6006_v56 = vsub.s32 7, %v5977_v26 }
 0x4ef   :  { %v10515_v13 = vrot.slane %v5974_v24, %v5994_v53  ;;  %v9391_v53 = vld [vmem:[#allocation15 + $0x2ac] ss:$16 sps:$4 sm:$0xff]  }
 0x4f1   :  { %7619 = vmatpush1.bf16.msra.mxu1 %v9272_v59  ;;  %7791 = vmatpush1.bf16.msra.mxu0 %v9275_v36  ;;  %v10517_v59 = vrot.slane %v5974_v24, %v6002_v3  ;;  %v10519_v36 = vrot.slane %v5974_v24, %v5998_v19  ;;  %v9386_v3 = vld [vmem:[#allocation15 + $0x2a0] ss:$16 sps:$4 sm:$0xff]   ;;  %v9394_v19 = vld [vmem:[#allocation15 + $0x2c4] ss:$16 sps:$4 sm:$0xff]  }
 0x4f2   :  { %7620 = vmatprep.subr.bf16.mxu1 %v9280_v6  ;;  %7792 = vmatprep.subr.bf16.mxu0 %v9283_v7  ;;  %v10521_v6 = vrot.slane %v5974_v24, %v6006_v56  ;;  %v10523_v7 = vsub.s32 0, %v5977_v26  ;;  %v9397_v56 = vld [vmem:[#allocation15 + $0x2cc] ss:$16 sps:$4 sm:$0xff]  }
 0x4f5   :  { %7621 = vmatpush1.bf16.msra.mxu1 %v9278_v8  ;;  %7793 = vmatpush1.bf16.msra.mxu0 %v9281_v25  ;;  %v10525_v8 = vsub.s32 2, %v5977_v26  ;;  %v10527_v25 = vsub.s32 1, %v5977_v26 }
 0x4f6   :  { %7622 = vmatprep.subr.bf16.mxu1 %v9286_v9  ;;  %7794 = vmatprep.subr.bf16.mxu0 %v9289_v21  ;;  %v10529_v9 = vsub.s32 3, %v5977_v26  ;;  %v5979_v21 = vrot.slane %v5974_v24, %v10523_v7  ;;  %v9388_v26 = vld [vmem:[#allocation15 + $0x2a4] ss:$16 sps:$4 sm:$0xff]  }
 0x4f9   :  { %7623 = vmatpush1.bf16.msra.mxu1 %v9284_v22  ;;  %7795 = vmatpush1.bf16.msra.mxu0 %v9287_v32  ;;  %v5987_v22 = vrot.slane %v5974_v24, %v10525_v8  ;;  %v5983_v32 = vrot.slane %v5974_v24, %v10527_v25 }
 0x4fa   :  { %7624 = vmatprep.subr.bf16.mxu1 %v9292_v42  ;;  %7796 = vmatprep.subr.bf16.mxu0 %v9295_v30  ;;  %v5991_v42 = vrot.slane %v5974_v24, %v10529_v9  ;;  %v9389_v24 = vld [vmem:[#allocation15 + $0x2a8] ss:$16 sps:$4 sm:$0xff]  }
 0x4fd   :  { %7625 = vmatpush1.bf16.msra.mxu1 %v9290_v34  ;;  %7797 = vmatpush1.bf16.msra.mxu0 %v9293_v60 }
 0x4fe   :  { %7626 = vmatprep.subr.bf16.mxu1 %v9298_v41  ;;  %7798 = vmatprep.subr.bf16.mxu0 %v9301_v38 }
 0x501   :  { %7627 = vmatpush1.bf16.msra.mxu1 %v9296_v16  ;;  %7799 = vmatpush1.bf16.msra.mxu0 %v9299_v39 }
 0x502   :  { %7628 = vmatprep.subr.bf16.mxu1 %v9304_v44  ;;  %7800 = vmatprep.subr.bf16.mxu0 %v9307_v43 }
 0x505   :  { %7629 = vmatpush1.bf16.msra.mxu1 %v9302_v28  ;;  %7801 = vmatpush1.bf16.msra.mxu0 %v9305_v46 }
 0x506   :  { %7630 = vmatprep.subr.bf16.mxu1 %v9310_v47  ;;  %7802 = vmatprep.subr.bf16.mxu0 %v9313_v20 }
 0x509   :  { %7631 = vmatpush1.bf16.msra.mxu1 %v9308_v50  ;;  %7803 = vmatpush1.bf16.msra.mxu0 %v9311_v62 }
 0x50a   :  { %7632 = vmatprep.subr.bf16.mxu1 %v9316_v45  ;;  %7804 = vmatprep.subr.bf16.mxu0 %v9319_v35 }
 0x50d   :  { %7633 = vmatpush1.bf16.msra.mxu1 %v9314_v48  ;;  %7805 = vmatpush1.bf16.msra.mxu0 %v9317_v51 }
 0x50e   :  { %7634 = vmatprep.subr.bf16.mxu1 %v9322_v54  ;;  %7806 = vmatprep.subr.bf16.mxu0 %v9325_v29 }
 0x511   :  { %7635 = vmatpush1.bf16.msra.mxu1 %v9320_v57  ;;  %7807 = vmatpush1.bf16.msra.mxu0 %v9323_v12 }
 0x512   :  { %7636 = vmatprep.subr.bf16.mxu1 %v9328_v63  ;;  %7808 = vmatprep.subr.bf16.mxu0 %v9331_v2 }
 0x515   :  { %7637 = vmatpush1.bf16.msra.mxu1 %v9326_v33  ;;  %7809 = vmatpush1.bf16.msra.mxu0 %v9329_v58 }
 0x516   :  { %7638 = vmatprep.subr.bf16.mxu1 %v9334_v61  ;;  %7810 = vmatprep.subr.bf16.mxu0 %v9337_v11  ;;  %v9356_v11 = vld [vmem:[#allocation15 + $0x200] ss:$16 sps:$4 sm:$0xff]  }
 0x519   :  { %7639 = vmatpush1.bf16.msra.mxu1 %v9332_v49  ;;  %7811 = vmatpush1.bf16.msra.mxu0 %v9335_v17  ;;  %v9359_v49 = vld [vmem:[#allocation15 + $0x208] ss:$16 sps:$4 sm:$0xff]   ;;  %v9364_v17 = vld [vmem:[#allocation15 + $0x224] ss:$16 sps:$4 sm:$0xff]  }
 0x51a   :  { %7640 = vmatprep.subr.bf16.mxu1 %v9340_v0  ;;  %7812 = vmatprep.subr.bf16.mxu0 %v9343_v1  ;;  %v9367_v0 = vld [vmem:[#allocation15 + $0x22c] ss:$16 sps:$4 sm:$0xff]   ;;  %v9362_v1 = vld [vmem:[#allocation15 + $0x220] ss:$16 sps:$4 sm:$0xff]  }
 0x51d   :  { %7641 = vmatpush1.bf16.msra.mxu1 %v9338_v31  ;;  %7813 = vmatpush1.bf16.msra.mxu0 %v9341_v4  ;;  %v9365_v31 = vld [vmem:[#allocation15 + $0x228] ss:$16 sps:$4 sm:$0xff]   ;;  %v9370_v4 = vld [vmem:[#allocation15 + $0x244] ss:$16 sps:$4 sm:$0xff]  }
 0x51e   :  { %7642 = vmatprep.subr.bf16.mxu1 %v9346_v15  ;;  %7814 = vmatprep.subr.bf16.mxu0 %v9349_v52  ;;  %v9373_v15 = vld [vmem:[#allocation15 + $0x24c] ss:$16 sps:$4 sm:$0xff]   ;;  %v9368_v52 = vld [vmem:[#allocation15 + $0x240] ss:$16 sps:$4 sm:$0xff]  }
 0x521   :  { %7643 = vmatpush1.bf16.msra.mxu1 %v9344_v37  ;;  %7815 = vmatpush1.bf16.msra.mxu0 %v9347_v40  ;;  %v9371_v37 = vld [vmem:[#allocation15 + $0x248] ss:$16 sps:$4 sm:$0xff]   ;;  %v9376_v40 = vld [vmem:[#allocation15 + $0x264] ss:$16 sps:$4 sm:$0xff]  }
 0x522   :  { %7644 = vmatprep.subr.bf16.mxu1 %v9352_v5  ;;  %7816 = vmatprep.subr.bf16.mxu0 %v9355_v14  ;;  %v9379_v5 = vld [vmem:[#allocation15 + $0x26c] ss:$16 sps:$4 sm:$0xff]   ;;  %v9374_v14 = vld [vmem:[#allocation15 + $0x260] ss:$16 sps:$4 sm:$0xff]  }
 0x525   :  { %7645 = vmatpush1.bf16.msra.mxu1 %v9350_v55  ;;  %7817 = vmatpush1.bf16.msra.mxu0 %v9353_v18  ;;  %v9377_v55 = vld [vmem:[#allocation15 + $0x268] ss:$16 sps:$4 sm:$0xff]   ;;  %v9382_v18 = vld [vmem:[#allocation15 + $0x284] ss:$16 sps:$4 sm:$0xff]  }
 0x526   :  { %7657 = vmatprep.subr.bf16.mxu1 %v9358_v27  ;;  %7829 = vmatprep.subr.bf16.mxu0 %v9361_v23  ;;  %v9385_v27 = vld [vmem:[#allocation15 + $0x28c] ss:$16 sps:$4 sm:$0xff]   ;;  %v9380_v23 = vld [vmem:[#allocation15 + $0x280] ss:$16 sps:$4 sm:$0xff]  }
 0x59b   :  { %v5804_v30 = vpop.f32.mrb[64].mxu1  ;;  %v5847_v34 = vpop.f32.mrb[48].mxu0 }
 0x59c   :  { %v6016_v60 = vadd.f32 %v5979_v21, %v5804_v30  ;;  %v6018_v41 = vadd.f32 %v5987_v22, %v5847_v34  ;;  %v5806_v38 = vpop.f32.mrb[65].mxu1  ;;  %v5849_v16 = vpop.f32.mrb[49].mxu0 }
 0x59d   :  { %v6017_v39 = vadd.f32 %v5983_v32, %v5806_v38  ;;  %v6019_v44 = vadd.f32 %v5991_v42, %v5849_v16  ;;  %v5808_v43 = vpop.f32.mrb[66].mxu1  ;;  %v5851_v28 = vpop.f32.mrb[50].mxu0  ;;  %v9400_v38 = vld [vmem:[#allocation15 + $0x2e4] ss:$16 sps:$4 sm:$0xff]   ;;  %v9403_v16 = vld [vmem:[#allocation15 + $0x2ec] ss:$16 sps:$4 sm:$0xff]  }
 0x59e   :  { %v6024_v46 = vadd.f32 %v5979_v21, %v5808_v43  ;;  %v6026_v47 = vadd.f32 %v5987_v22, %v5851_v28  ;;  %v5810_v20 = vpop.f32.mrb[67].mxu1  ;;  %v5853_v50 = vpop.f32.mrb[51].mxu0  ;;  %v6032_v35 = vmax.f32 %v6016_v60, 0.0  ;;  %v6034_v48 = vmax.f32 %v6018_v41, 0.0 }
 0x59f   :  { %v6025_v62 = vadd.f32 %v5983_v32, %v5810_v20  ;;  %v6027_v45 = vadd.f32 %v5991_v42, %v5853_v50  ;;  %v6033_v29 = vmax.f32 %v6017_v39, 0.0  ;;  %v6035_v57 = vmax.f32 %v6019_v44, 0.0  ;;  %v9392_v32 = vld [vmem:[#allocation15 + $0x2c0] ss:$16 sps:$4 sm:$0xff]   ;;  %v9395_v42 = vld [vmem:[#allocation15 + $0x2c8] ss:$16 sps:$4 sm:$0xff]  }
 0x5a0   :  { %v6040_v51 = vmax.f32 %v6024_v46, 0.0  ;;  %v6042_v54 = vmax.f32 %v6026_v47, 0.0 }
 0x5a1   :  { %v6041_v12 = vmax.f32 %v6025_v62, 0.0  ;;  %v6043_v63 = vmax.f32 %v6027_v45, 0.0 }
 0x5a2   :  { %v6048_v2 = vpack.c.bf16 %v6040_v51, %v6032_v35  ;;  %v10535_v33 = vpack.c.bf16 %v6042_v54, %v6034_v48  ;;  %v9398_v35 = vld [vmem:[#allocation15 + $0x2e0] ss:$16 sps:$4 sm:$0xff]   ;;  %v9401_v48 = vld [vmem:[#allocation15 + $0x2e8] ss:$16 sps:$4 sm:$0xff]   ;;  %v9406_v51 = vld [vmem:[#allocation15 + $0x304] ss:$16 sps:$4 sm:$0xff]  }
 0x5a3   :  { %v6049_v58 = vpack.c.bf16 %v6041_v12, %v6033_v29  ;;  %v6051_v61 = vpack.c.bf16 %v6043_v63, %v6035_v57 }
 0x5a5   :  { %7646 = vmatprep.mubr.bf16.mxu1 %v6049_v58  ;;  %7818 = vmatprep.mubr.bf16.mxu0 %v6049_v58 }
 0x5a6   :  { %7647 = vmatmul.mubr.bf16.vlgmr.msra.gmra.mrb[72].mxu1 %v6048_v2  ;;  %7819 = vmatmul.mubr.bf16.vlgmr.msra.gmra.mrb[56].mxu0 %v6048_v2 }
 0x5a7   :  { %7658 = vmatpush1.bf16.msra.mxu1 %v9356_v11  ;;  %7830 = vmatpush1.bf16.msra.mxu0 %v9359_v49  ;;  %v9404_v49 = vld [vmem:[#allocation15 + $0x300] ss:$16 sps:$4 sm:$0xff]  }
 0x5a8   :  { %7689 = vmatprep.mubr.bf16.mxu1 %v6051_v61  ;;  %7861 = vmatprep.mubr.bf16.mxu0 %v6051_v61 }
 0x5a9   :  { %7659 = vmatprep.subr.bf16.mxu1 %v9364_v17  ;;  %7831 = vmatprep.subr.bf16.mxu0 %v9367_v0  ;;  %v9407_v17 = vld [vmem:[#allocation15 + $0x308] ss:$16 sps:$4 sm:$0xff]   ;;  %v9412_v0 = vld [vmem:[#allocation15 + $0x324] ss:$16 sps:$4 sm:$0xff]  }
 0x5ab   :  { %7660 = vmatpush1.bf16.msra.mxu1 %v9362_v1  ;;  %7832 = vmatpush1.bf16.msra.mxu0 %v9365_v31  ;;  %v9415_v1 = vld [vmem:[#allocation15 + $0x32c] ss:$16 sps:$4 sm:$0xff]   ;;  %v9410_v31 = vld [vmem:[#allocation15 + $0x320] ss:$16 sps:$4 sm:$0xff]  }
 0x5ac   :  { %7661 = vmatprep.subr.bf16.mxu1 %v9370_v4  ;;  %7833 = vmatprep.subr.bf16.mxu0 %v9373_v15  ;;  %v9413_v4 = vld [vmem:[#allocation15 + $0x328] ss:$16 sps:$4 sm:$0xff]   ;;  %v9418_v15 = vld [vmem:[#allocation15 + $0x344] ss:$16 sps:$4 sm:$0xff]  }
 0x5af   :  { %7662 = vmatpush1.bf16.msra.mxu1 %v9368_v52  ;;  %7834 = vmatpush1.bf16.msra.mxu0 %v9371_v37  ;;  %v9421_v52 = vld [vmem:[#allocation15 + $0x34c] ss:$16 sps:$4 sm:$0xff]   ;;  %v9416_v37 = vld [vmem:[#allocation15 + $0x340] ss:$16 sps:$4 sm:$0xff]  }
 0x5b0   :  { %7663 = vmatprep.subr.bf16.mxu1 %v9376_v40  ;;  %7835 = vmatprep.subr.bf16.mxu0 %v9379_v5  ;;  %v9419_v40 = vld [vmem:[#allocation15 + $0x348] ss:$16 sps:$4 sm:$0xff]   ;;  %v9424_v5 = vld [vmem:[#allocation15 + $0x364] ss:$16 sps:$4 sm:$0xff]  }
 0x5b3   :  { %7664 = vmatpush1.bf16.msra.mxu1 %v9374_v14  ;;  %7836 = vmatpush1.bf16.msra.mxu0 %v9377_v55  ;;  %v9427_v14 = vld [vmem:[#allocation15 + $0x36c] ss:$16 sps:$4 sm:$0xff]   ;;  %v9422_v55 = vld [vmem:[#allocation15 + $0x360] ss:$16 sps:$4 sm:$0xff]  }
 0x5b4   :  { %7665 = vmatprep.subr.bf16.mxu1 %v9382_v18  ;;  %7837 = vmatprep.subr.bf16.mxu0 %v9385_v27  ;;  %v9425_v18 = vld [vmem:[#allocation15 + $0x368] ss:$16 sps:$4 sm:$0xff]   ;;  %v9430_v27 = vld [vmem:[#allocation15 + $0x384] ss:$16 sps:$4 sm:$0xff]  }
 0x5b7   :  { %7666 = vmatpush1.bf16.msra.mxu1 %v9380_v23  ;;  %7838 = vmatpush1.bf16.msra.mxu0 %v9383_v10  ;;  %v9433_v23 = vld [vmem:[#allocation15 + $0x38c] ss:$16 sps:$4 sm:$0xff]   ;;  %v9428_v10 = vld [vmem:[#allocation15 + $0x380] ss:$16 sps:$4 sm:$0xff]  }
 0x5b8   :  { %7667 = vmatprep.subr.bf16.mxu1 %v9388_v26  ;;  %7839 = vmatprep.subr.bf16.mxu0 %v9391_v53  ;;  %v9431_v26 = vld [vmem:[#allocation15 + $0x388] ss:$16 sps:$4 sm:$0xff]   ;;  %v9436_v53 = vld [vmem:[#allocation15 + $0x3a4] ss:$16 sps:$4 sm:$0xff]  }
 0x5bb   :  { %7668 = vmatpush1.bf16.msra.mxu1 %v9386_v3  ;;  %7840 = vmatpush1.bf16.msra.mxu0 %v9389_v24  ;;  %v5890_v21 = vpop.f32.mrb[68].mxu1  ;;  %v5933_v22 = vpop.f32.mrb[52].mxu0  ;;  %v9439_v3 = vld [vmem:[#allocation15 + $0x3ac] ss:$16 sps:$4 sm:$0xff]   ;;  %v9434_v24 = vld [vmem:[#allocation15 + $0x3a0] ss:$16 sps:$4 sm:$0xff]  }
 0x5bc   :  { %v6020_v30 = vadd.f32 %v10515_v13, %v5890_v21  ;;  %v6022_v34 = vadd.f32 %v10517_v59, %v5933_v22  ;;  %v5892_v60 = vpop.f32.mrb[69].mxu1  ;;  %v5935_v41 = vpop.f32.mrb[53].mxu0  ;;  %7669 = vmatprep.subr.bf16.mxu1 %v9394_v19  ;;  %7841 = vmatprep.subr.bf16.mxu0 %v9397_v56  ;;  %v9437_v19 = vld [vmem:[#allocation15 + $0x3a8] ss:$16 sps:$4 sm:$0xff]   ;;  %v9442_v56 = vld [vmem:[#allocation15 + $0x3c4] ss:$16 sps:$4 sm:$0xff]  }
 0x5bd   :  { %v6021_v39 = vadd.f32 %v10519_v36, %v5892_v60  ;;  %v6023_v44 = vadd.f32 %v10521_v6, %v5935_v41  ;;  %v5894_v43 = vpop.f32.mrb[70].mxu1  ;;  %v5937_v28 = vpop.f32.mrb[54].mxu0  ;;  %v9445_v21 = vld [vmem:[#allocation15 + $0x3cc] ss:$16 sps:$4 sm:$0xff]   ;;  %v9440_v22 = vld [vmem:[#allocation15 + $0x3c0] ss:$16 sps:$4 sm:$0xff]  }
 0x5be   :  { %v6028_v46 = vadd.f32 %v10515_v13, %v5894_v43  ;;  %v6030_v47 = vadd.f32 %v10517_v59, %v5937_v28  ;;  %v5896_v20 = vpop.f32.mrb[71].mxu1  ;;  %v5939_v50 = vpop.f32.mrb[55].mxu0  ;;  %v6036_v54 = vmax.f32 %v6020_v30, 0.0  ;;  %v6038_v29 = vmax.f32 %v6022_v34, 0.0  ;;  %v9409_v13 = vld [vmem:[#allocation15 + $0x30c] ss:$16 sps:$4 sm:$0xff]  }
 0x5bf   :  { %v6029_v62 = vadd.f32 %v10519_v36, %v5896_v20  ;;  %v6031_v45 = vadd.f32 %v10521_v6, %v5939_v50  ;;  %7670 = vmatpush1.bf16.msra.mxu1 %v9392_v32  ;;  %7842 = vmatpush1.bf16.msra.mxu0 %v9395_v42  ;;  %v6037_v63 = vmax.f32 %v6021_v39, 0.0  ;;  %v6039_v59 = vmax.f32 %v6023_v44, 0.0  ;;  %v9443_v32 = vld [vmem:[#allocation15 + $0x3c8] ss:$16 sps:$4 sm:$0xff]   ;;  %v9448_v42 = vld [vmem:[#allocation15 + $0x3e4] ss:$16 sps:$4 sm:$0xff]  }
 0x5c0   :  { %v6044_v57 = vmax.f32 %v6028_v46, 0.0  ;;  %v6046_v12 = vmax.f32 %v6030_v47, 0.0  ;;  %7671 = vmatprep.subr.bf16.mxu1 %v9400_v38  ;;  %7843 = vmatprep.subr.bf16.mxu0 %v9403_v16  ;;  %v9451_v30 = vld [vmem:[#allocation15 + $0x3ec] ss:$16 sps:$4 sm:$0xff]   ;;  %v9446_v34 = vld [vmem:[#allocation15 + $0x3e0] ss:$16 sps:$4 sm:$0xff]  }
 0x5c1   :  { %v6045_v2 = vmax.f32 %v6029_v62, 0.0  ;;  %v6047_v58 = vmax.f32 %v6031_v45, 0.0  ;;  %v9449_v60 = vld [vmem:[#allocation15 + $0x3e8] ss:$16 sps:$4 sm:$0xff]   ;;  %v9454_v41 = vld [vmem:[#allocation15 + $0x404] ss:$16 sps:$4 sm:$0xff]  }
 0x5c2   :  { %v10545_v61 = vpack.c.bf16 %v6044_v57, %v6036_v54  ;;  %v10547_v36 = vpack.c.bf16 %v6046_v12, %v6038_v29  ;;  %v9457_v38 = vld [vmem:[#allocation15 + $0x40c] ss:$16 sps:$4 sm:$0xff]   ;;  %v9452_v16 = vld [vmem:[#allocation15 + $0x400] ss:$16 sps:$4 sm:$0xff]   ;;  %v9455_v39 = vld [vmem:[#allocation15 + $0x408] ss:$16 sps:$4 sm:$0xff]  }
 0x5c3   :  { %v10549_v6 = vpack.c.bf16 %v6045_v2, %v6037_v63  ;;  %v10551_v11 = vpack.c.bf16 %v6047_v58, %v6039_v59  ;;  %7672 = vmatpush1.bf16.msra.mxu1 %v9398_v35  ;;  %7844 = vmatpush1.bf16.msra.mxu0 %v9401_v48  ;;  %v9460_v44 = vld [vmem:[#allocation15 + $0x424] ss:$16 sps:$4 sm:$0xff]   ;;  %v9463_v43 = vld [vmem:[#allocation15 + $0x42c] ss:$16 sps:$4 sm:$0xff]   ;;  %v9458_v28 = vld [vmem:[#allocation15 + $0x420] ss:$16 sps:$4 sm:$0xff]  }
 0x5c4   :  { %7673 = vmatprep.subr.bf16.mxu1 %v9406_v51  ;;  %7845 = vmatprep.subr.bf16.mxu0 %v9409_v13  ;;  %v9461_v46 = vld [vmem:[#allocation15 + $0x428] ss:$16 sps:$4 sm:$0xff]   ;;  %v9466_v47 = vld [vmem:[#allocation15 + $0x444] ss:$16 sps:$4 sm:$0xff]   ;;  %v9469_v20 = vld [vmem:[#allocation15 + $0x44c] ss:$16 sps:$4 sm:$0xff]  }
 0x5c5   :  { %v9464_v50 = vld [vmem:[#allocation15 + $0x440] ss:$16 sps:$4 sm:$0xff]   ;;  %v9467_v62 = vld [vmem:[#allocation15 + $0x448] ss:$16 sps:$4 sm:$0xff]   ;;  %v9472_v45 = vld [vmem:[#allocation15 + $0x464] ss:$16 sps:$4 sm:$0xff]  }
 0x5c6   :  { %v9470_v35 = vld [vmem:[#allocation15 + $0x460] ss:$16 sps:$4 sm:$0xff]   ;;  %v9473_v48 = vld [vmem:[#allocation15 + $0x468] ss:$16 sps:$4 sm:$0xff]   ;;  %v9478_v51 = vld [vmem:[#allocation15 + $0x484] ss:$16 sps:$4 sm:$0xff]  }
 0x5c7   :  { %7674 = vmatpush1.bf16.msra.mxu1 %v9404_v49  ;;  %7846 = vmatpush1.bf16.msra.mxu0 %v9407_v17  ;;  %v9481_v54 = vld [vmem:[#allocation15 + $0x48c] ss:$16 sps:$4 sm:$0xff]   ;;  %v9476_v29 = vld [vmem:[#allocation15 + $0x480] ss:$16 sps:$4 sm:$0xff]   ;;  %v9479_v57 = vld [vmem:[#allocation15 + $0x488] ss:$16 sps:$4 sm:$0xff]  }
 0x5c8   :  { %7675 = vmatprep.subr.bf16.mxu1 %v9412_v0  ;;  %7847 = vmatprep.subr.bf16.mxu0 %v9415_v1  ;;  %v9484_v12 = vld [vmem:[#allocation15 + $0x4a4] ss:$16 sps:$4 sm:$0xff]   ;;  %v9487_v13 = vld [vmem:[#allocation15 + $0x4ac] ss:$16 sps:$4 sm:$0xff]   ;;  %v9482_v63 = vld [vmem:[#allocation15 + $0x4a0] ss:$16 sps:$4 sm:$0xff]  }
 0x5c9   :  { %v9485_v59 = vld [vmem:[#allocation15 + $0x4a8] ss:$16 sps:$4 sm:$0xff]   ;;  %v9490_v2 = vld [vmem:[#allocation15 + $0x4c4] ss:$16 sps:$4 sm:$0xff]   ;;  %v9493_v58 = vld [vmem:[#allocation15 + $0x4cc] ss:$16 sps:$4 sm:$0xff]  }
 0x5ca   :  { %v9491_v49 = vld [vmem:[#allocation15 + $0x4c8] ss:$16 sps:$4 sm:$0xff]   ;;  %v9496_v17 = vld [vmem:[#allocation15 + $0x4e4] ss:$16 sps:$4 sm:$0xff]   ;;  %v9499_v0 = vld [vmem:[#allocation15 + $0x4ec] ss:$16 sps:$4 sm:$0xff]  }
 0x5cb   :  { %7676 = vmatpush1.bf16.msra.mxu1 %v9410_v31  ;;  %7848 = vmatpush1.bf16.msra.mxu0 %v9413_v4  ;;  %v9494_v1 = vld [vmem:[#allocation15 + $0x4e0] ss:$16 sps:$4 sm:$0xff]   ;;  %v9497_v31 = vld [vmem:[#allocation15 + $0x4e8] ss:$16 sps:$4 sm:$0xff]   ;;  %v9502_v4 = vld [vmem:[#allocation15 + $0x504] ss:$16 sps:$4 sm:$0xff]  }
 0x5cc   :  { %7677 = vmatprep.subr.bf16.mxu1 %v9418_v15  ;;  %7849 = vmatprep.subr.bf16.mxu0 %v9421_v52  ;;  %v9505_v15 = vld [vmem:[#allocation15 + $0x50c] ss:$16 sps:$4 sm:$0xff]   ;;  %v9500_v52 = vld [vmem:[#allocation15 + $0x500] ss:$16 sps:$4 sm:$0xff]  }
 0x5cf   :  { %7678 = vmatpush1.bf16.msra.mxu1 %v9416_v37  ;;  %7850 = vmatpush1.bf16.msra.mxu0 %v9419_v40  ;;  %v9503_v37 = vld [vmem:[#allocation15 + $0x508] ss:$16 sps:$4 sm:$0xff]   ;;  %v9508_v40 = vld [vmem:[#allocation15 + $0x524] ss:$16 sps:$4 sm:$0xff]  }
 0x5d0   :  { %7679 = vmatprep.subr.bf16.mxu1 %v9424_v5  ;;  %7851 = vmatprep.subr.bf16.mxu0 %v9427_v14  ;;  %v9511_v5 = vld [vmem:[#allocation15 + $0x52c] ss:$16 sps:$4 sm:$0xff]   ;;  %v9506_v14 = vld [vmem:[#allocation15 + $0x520] ss:$16 sps:$4 sm:$0xff]  }
 0x5d3   :  { %7680 = vmatpush1.bf16.msra.mxu1 %v9422_v55  ;;  %7852 = vmatpush1.bf16.msra.mxu0 %v9425_v18  ;;  %v9509_v55 = vld [vmem:[#allocation15 + $0x528] ss:$16 sps:$4 sm:$0xff]   ;;  %v9514_v18 = vld [vmem:[#allocation15 + $0x544] ss:$16 sps:$4 sm:$0xff]  }
 0x5d4   :  { %7681 = vmatprep.subr.bf16.mxu1 %v9430_v27  ;;  %7853 = vmatprep.subr.bf16.mxu0 %v9433_v23  ;;  %v9517_v27 = vld [vmem:[#allocation15 + $0x54c] ss:$16 sps:$4 sm:$0xff]   ;;  %v9512_v23 = vld [vmem:[#allocation15 + $0x540] ss:$16 sps:$4 sm:$0xff]  }
 0x5d7   :  { %7682 = vmatpush1.bf16.msra.mxu1 %v9428_v10  ;;  %7854 = vmatpush1.bf16.msra.mxu0 %v9431_v26  ;;  %v9515_v10 = vld [vmem:[#allocation15 + $0x548] ss:$16 sps:$4 sm:$0xff]   ;;  %v9520_v26 = vld [vmem:[#allocation15 + $0x564] ss:$16 sps:$4 sm:$0xff]  }
 0x5d8   :  { %7683 = vmatprep.subr.bf16.mxu1 %v9436_v53  ;;  %7855 = vmatprep.subr.bf16.mxu0 %v9439_v3  ;;  %v9523_v53 = vld [vmem:[#allocation15 + $0x56c] ss:$16 sps:$4 sm:$0xff]   ;;  %v9518_v3 = vld [vmem:[#allocation15 + $0x560] ss:$16 sps:$4 sm:$0xff]  }
 0x5db   :  { %7684 = vmatpush1.bf16.msra.mxu1 %v9434_v24  ;;  %7856 = vmatpush1.bf16.msra.mxu0 %v9437_v19  ;;  %v9521_v24 = vld [vmem:[#allocation15 + $0x568] ss:$16 sps:$4 sm:$0xff]   ;;  %v9526_v19 = vld [vmem:[#allocation15 + $0x584] ss:$16 sps:$4 sm:$0xff]  }
 0x5dc   :  { %7685 = vmatprep.subr.bf16.mxu1 %v9442_v56  ;;  %7857 = vmatprep.subr.bf16.mxu0 %v9445_v21  ;;  %v9529_v56 = vld [vmem:[#allocation15 + $0x58c] ss:$16 sps:$4 sm:$0xff]   ;;  %v9524_v21 = vld [vmem:[#allocation15 + $0x580] ss:$16 sps:$4 sm:$0xff]  }
 0x5df   :  { %7686 = vmatpush1.bf16.msra.mxu1 %v9440_v22  ;;  %7858 = vmatpush1.bf16.msra.mxu0 %v9443_v32  ;;  %v9527_v22 = vld [vmem:[#allocation15 + $0x588] ss:$16 sps:$4 sm:$0xff]   ;;  %v9532_v32 = vld [vmem:[#allocation15 + $0x5a4] ss:$16 sps:$4 sm:$0xff]  }
 0x5e0   :  { %7687 = vmatprep.subr.bf16.mxu1 %v9448_v42  ;;  %7859 = vmatprep.subr.bf16.mxu0 %v9451_v30  ;;  %v9535_v42 = vld [vmem:[#allocation15 + $0x5ac] ss:$16 sps:$4 sm:$0xff]   ;;  %v9530_v30 = vld [vmem:[#allocation15 + $0x5a0] ss:$16 sps:$4 sm:$0xff]  }
 0x5e3   :  { %7688 = vmatpush1.bf16.msra.mxu1 %v9446_v34  ;;  %7860 = vmatpush1.bf16.msra.mxu0 %v9449_v60  ;;  %v9533_v34 = vld [vmem:[#allocation15 + $0x5a8] ss:$16 sps:$4 sm:$0xff]   ;;  %v9538_v60 = vld [vmem:[#allocation15 + $0x5c4] ss:$16 sps:$4 sm:$0xff]  }
 0x5e4   :  { %7700 = vmatprep.subr.bf16.mxu1 %v9454_v41  ;;  %7872 = vmatprep.subr.bf16.mxu0 %v9457_v38  ;;  %v9541_v41 = vld [vmem:[#allocation15 + $0x5cc] ss:$16 sps:$4 sm:$0xff]   ;;  %v9536_v38 = vld [vmem:[#allocation15 + $0x5c0] ss:$16 sps:$4 sm:$0xff]  }
 0x5e6   :  { %7690 = vmatmul.mubr.bf16.vlgmr.msra.gmra.mrb[72].mxu1 %v10535_v33  ;;  %7862 = vmatmul.mubr.bf16.vlgmr.msra.gmra.mrb[56].mxu0 %v10535_v33  ;;  %v9475_v33 = vld [vmem:[#allocation15 + $0x46c] ss:$16 sps:$4 sm:$0xff]  }
 0x5e7   :  { %7701 = vmatpush1.bf16.msra.mxu1 %v9452_v16  ;;  %7732 = vmatprep.mubr.bf16.mxu1 %v10549_v6  ;;  %v9539_v16 = vld [vmem:[#allocation15 + $0x5c8] ss:$16 sps:$4 sm:$0xff]  }
 0x5e8   :  { %7873 = vmatpush1.bf16.msra.mxu0 %v9455_v39  ;;  %7904 = vmatprep.mubr.bf16.mxu0 %v10549_v6  ;;  %v9488_v6 = vld [vmem:[#allocation15 + $0x4c0] ss:$16 sps:$4 sm:$0xff]   ;;  %v9544_v39 = vld [vmem:[#allocation15 + $0x5e4] ss:$16 sps:$4 sm:$0xff]  }
 0x5e9   :  { %7702 = vmatprep.subr.bf16.mxu1 %v9460_v44  ;;  %7874 = vmatprep.subr.bf16.mxu0 %v9463_v43  ;;  %v9547_v44 = vld [vmem:[#allocation15 + $0x5ec] ss:$16 sps:$4 sm:$0xff]   ;;  %v9542_v43 = vld [vmem:[#allocation15 + $0x5e0] ss:$16 sps:$4 sm:$0xff]  }
 0x5eb   :  { %7703 = vmatpush1.bf16.msra.mxu1 %v9458_v28  ;;  %v9545_v28 = vld [vmem:[#allocation15 + $0x5e8] ss:$16 sps:$4 sm:$0xff]  }
 0x5ec   :  { %7875 = vmatpush1.bf16.msra.mxu0 %v9461_v46  ;;  %7704 = vmatprep.subr.bf16.mxu1 %v9466_v47  ;;  %v9550_v46 = vld [vmem:[#allocation15 + $0x604] ss:$16 sps:$4 sm:$0xff]   ;;  %v9553_v47 = vld [vmem:[#allocation15 + $0x60c] ss:$16 sps:$4 sm:$0xff]  }
 0x5ed   :  { %7876 = vmatprep.subr.bf16.mxu0 %v9469_v20  ;;  %v9548_v20 = vld [vmem:[#allocation15 + $0x600] ss:$16 sps:$4 sm:$0xff]  }
 0x5ef   :  { %7705 = vmatpush1.bf16.msra.mxu1 %v9464_v50  ;;  %v9551_v50 = vld [vmem:[#allocation15 + $0x608] ss:$16 sps:$4 sm:$0xff]  }
 0x5f0   :  { %7877 = vmatpush1.bf16.msra.mxu0 %v9467_v62  ;;  %7706 = vmatprep.subr.bf16.mxu1 %v9472_v45  ;;  %v9556_v62 = vld [vmem:[#allocation15 + $0x624] ss:$16 sps:$4 sm:$0xff]   ;;  %v9559_v45 = vld [vmem:[#allocation15 + $0x62c] ss:$16 sps:$4 sm:$0xff]  }
 0x5f1   :  { %7878 = vmatprep.subr.bf16.mxu0 %v9475_v33  ;;  %v9554_v33 = vld [vmem:[#allocation15 + $0x620] ss:$16 sps:$4 sm:$0xff]  }
 0x5f3   :  { %7707 = vmatpush1.bf16.msra.mxu1 %v9470_v35  ;;  %v9557_v35 = vld [vmem:[#allocation15 + $0x628] ss:$16 sps:$4 sm:$0xff]  }
 0x5f4   :  { %7879 = vmatpush1.bf16.msra.mxu0 %v9473_v48  ;;  %7708 = vmatprep.subr.bf16.mxu1 %v9478_v51  ;;  %v9562_v48 = vld [vmem:[#allocation15 + $0x644] ss:$16 sps:$4 sm:$0xff]   ;;  %v9565_v51 = vld [vmem:[#allocation15 + $0x64c] ss:$16 sps:$4 sm:$0xff]  }
 0x5f5   :  { %7880 = vmatprep.subr.bf16.mxu0 %v9481_v54  ;;  %v9560_v54 = vld [vmem:[#allocation15 + $0x640] ss:$16 sps:$4 sm:$0xff]  }
 0x5f7   :  { %7709 = vmatpush1.bf16.msra.mxu1 %v9476_v29  ;;  %v9563_v29 = vld [vmem:[#allocation15 + $0x648] ss:$16 sps:$4 sm:$0xff]  }
 0x5f8   :  { %7881 = vmatpush1.bf16.msra.mxu0 %v9479_v57  ;;  %7710 = vmatprep.subr.bf16.mxu1 %v9484_v12  ;;  %v9568_v57 = vld [vmem:[#allocation15 + $0x664] ss:$16 sps:$4 sm:$0xff]   ;;  %v9566_v12 = vld [vmem:[#allocation15 + $0x660] ss:$16 sps:$4 sm:$0xff]  }
 0x5f9   :  { %7882 = vmatprep.subr.bf16.mxu0 %v9487_v13  ;;  %v9569_v13 = vld [vmem:[#allocation15 + $0x668] ss:$16 sps:$4 sm:$0xff]  }
 0x5fb   :  { %7711 = vmatpush1.bf16.msra.mxu1 %v9482_v63  ;;  %v9574_v63 = vld [vmem:[#allocation15 + $0x684] ss:$16 sps:$4 sm:$0xff]  }
 0x5fc   :  { %7883 = vmatpush1.bf16.msra.mxu0 %v9485_v59  ;;  %7712 = vmatprep.subr.bf16.mxu1 %v9490_v2  ;;  %v9577_v59 = vld [vmem:[#allocation15 + $0x68c] ss:$16 sps:$4 sm:$0xff]   ;;  %v9575_v2 = vld [vmem:[#allocation15 + $0x688] ss:$16 sps:$4 sm:$0xff]  }
 0x5fd   :  { %7884 = vmatprep.subr.bf16.mxu0 %v9493_v58  ;;  %v9580_v58 = vld [vmem:[#allocation15 + $0x6a4] ss:$16 sps:$4 sm:$0xff]  }
 0x5ff   :  { %7713 = vmatpush1.bf16.msra.mxu1 %v9488_v6  ;;  %v9583_v6 = vld [vmem:[#allocation15 + $0x6ac] ss:$16 sps:$4 sm:$0xff]  }
 0x600   :  { %7885 = vmatpush1.bf16.msra.mxu0 %v9491_v49  ;;  %7714 = vmatprep.subr.bf16.mxu1 %v9496_v17  ;;  %v9578_v49 = vld [vmem:[#allocation15 + $0x6a0] ss:$16 sps:$4 sm:$0xff]   ;;  %v9581_v17 = vld [vmem:[#allocation15 + $0x6a8] ss:$16 sps:$4 sm:$0xff]  }
 0x601   :  { %7886 = vmatprep.subr.bf16.mxu0 %v9499_v0  ;;  %v9586_v0 = vld [vmem:[#allocation15 + $0x6c4] ss:$16 sps:$4 sm:$0xff]  }
 0x603   :  { %7715 = vmatpush1.bf16.msra.mxu1 %v9494_v1  ;;  %v9589_v1 = vld [vmem:[#allocation15 + $0x6cc] ss:$16 sps:$4 sm:$0xff]  }
 0x604   :  { %7887 = vmatpush1.bf16.msra.mxu0 %v9497_v31  ;;  %7716 = vmatprep.subr.bf16.mxu1 %v9502_v4  ;;  %v9584_v31 = vld [vmem:[#allocation15 + $0x6c0] ss:$16 sps:$4 sm:$0xff]   ;;  %v9587_v4 = vld [vmem:[#allocation15 + $0x6c8] ss:$16 sps:$4 sm:$0xff]  }
 0x605   :  { %7888 = vmatprep.subr.bf16.mxu0 %v9505_v15  ;;  %v9592_v15 = vld [vmem:[#allocation15 + $0x6e4] ss:$16 sps:$4 sm:$0xff]  }
 0x607   :  { %7717 = vmatpush1.bf16.msra.mxu1 %v9500_v52  ;;  %v9595_v52 = vld [vmem:[#allocation15 + $0x6ec] ss:$16 sps:$4 sm:$0xff]  }
 0x608   :  { %7889 = vmatpush1.bf16.msra.mxu0 %v9503_v37  ;;  %7718 = vmatprep.subr.bf16.mxu1 %v9508_v40  ;;  %v9590_v37 = vld [vmem:[#allocation15 + $0x6e0] ss:$16 sps:$4 sm:$0xff]   ;;  %v9593_v40 = vld [vmem:[#allocation15 + $0x6e8] ss:$16 sps:$4 sm:$0xff]  }
 0x609   :  { %7890 = vmatprep.subr.bf16.mxu0 %v9511_v5  ;;  %v9598_v5 = vld [vmem:[#allocation15 + $0x704] ss:$16 sps:$4 sm:$0xff]  }
 0x60b   :  { %7719 = vmatpush1.bf16.msra.mxu1 %v9506_v14  ;;  %v9601_v14 = vld [vmem:[#allocation15 + $0x70c] ss:$16 sps:$4 sm:$0xff]  }
 0x60c   :  { %7891 = vmatpush1.bf16.msra.mxu0 %v9509_v55  ;;  %7720 = vmatprep.subr.bf16.mxu1 %v9514_v18  ;;  %v9596_v55 = vld [vmem:[#allocation15 + $0x700] ss:$16 sps:$4 sm:$0xff]   ;;  %v9599_v18 = vld [vmem:[#allocation15 + $0x708] ss:$16 sps:$4 sm:$0xff]  }
 0x60d   :  { %7892 = vmatprep.subr.bf16.mxu0 %v9517_v27  ;;  %v9604_v27 = vld [vmem:[#allocation15 + $0x724] ss:$16 sps:$4 sm:$0xff]  }
 0x60f   :  { %7721 = vmatpush1.bf16.msra.mxu1 %v9512_v23  ;;  %v9607_v23 = vld [vmem:[#allocation15 + $0x72c] ss:$16 sps:$4 sm:$0xff]  }
 0x610   :  { %7893 = vmatpush1.bf16.msra.mxu0 %v9515_v10  ;;  %7722 = vmatprep.subr.bf16.mxu1 %v9520_v26  ;;  %v9602_v10 = vld [vmem:[#allocation15 + $0x720] ss:$16 sps:$4 sm:$0xff]   ;;  %v9605_v26 = vld [vmem:[#allocation15 + $0x728] ss:$16 sps:$4 sm:$0xff]  }
 0x611   :  { %7894 = vmatprep.subr.bf16.mxu0 %v9523_v53  ;;  %v9610_v53 = vld [vmem:[#allocation15 + $0x744] ss:$16 sps:$4 sm:$0xff]  }
 0x613   :  { %7723 = vmatpush1.bf16.msra.mxu1 %v9518_v3  ;;  %v9613_v3 = vld [vmem:[#allocation15 + $0x74c] ss:$16 sps:$4 sm:$0xff]  }
 0x614   :  { %7895 = vmatpush1.bf16.msra.mxu0 %v9521_v24  ;;  %7724 = vmatprep.subr.bf16.mxu1 %v9526_v19  ;;  %v9608_v24 = vld [vmem:[#allocation15 + $0x740] ss:$16 sps:$4 sm:$0xff]   ;;  %v9611_v19 = vld [vmem:[#allocation15 + $0x748] ss:$16 sps:$4 sm:$0xff]  }
 0x615   :  { %7896 = vmatprep.subr.bf16.mxu0 %v9529_v56  ;;  %v9616_v56 = vld [vmem:[#allocation15 + $0x764] ss:$16 sps:$4 sm:$0xff]  }
 0x617   :  { %7725 = vmatpush1.bf16.msra.mxu1 %v9524_v21  ;;  %v9619_v21 = vld [vmem:[#allocation15 + $0x76c] ss:$16 sps:$4 sm:$0xff]  }
 0x618   :  { %7897 = vmatpush1.bf16.msra.mxu0 %v9527_v22  ;;  %7726 = vmatprep.subr.bf16.mxu1 %v9532_v32  ;;  %v9614_v22 = vld [vmem:[#allocation15 + $0x760] ss:$16 sps:$4 sm:$0xff]   ;;  %v9617_v32 = vld [vmem:[#allocation15 + $0x768] ss:$16 sps:$4 sm:$0xff]  }
 0x619   :  { %7898 = vmatprep.subr.bf16.mxu0 %v9535_v42  ;;  %v9622_v42 = vld [vmem:[#allocation15 + $0x784] ss:$16 sps:$4 sm:$0xff]  }
 0x61b   :  { %7727 = vmatpush1.bf16.msra.mxu1 %v9530_v30  ;;  %v9625_v30 = vld [vmem:[#allocation15 + $0x78c] ss:$16 sps:$4 sm:$0xff]  }
 0x61c   :  { %7899 = vmatpush1.bf16.msra.mxu0 %v9533_v34  ;;  %7728 = vmatprep.subr.bf16.mxu1 %v9538_v60  ;;  %v9620_v34 = vld [vmem:[#allocation15 + $0x780] ss:$16 sps:$4 sm:$0xff]   ;;  %v9623_v60 = vld [vmem:[#allocation15 + $0x788] ss:$16 sps:$4 sm:$0xff]  }
 0x61d   :  { %7900 = vmatprep.subr.bf16.mxu0 %v9541_v41  ;;  %v9628_v41 = vld [vmem:[#allocation15 + $0x7a4] ss:$16 sps:$4 sm:$0xff]  }
 0x61f   :  { %7729 = vmatpush1.bf16.msra.mxu1 %v9536_v38  ;;  %v9631_v38 = vld [vmem:[#allocation15 + $0x7ac] ss:$16 sps:$4 sm:$0xff]  }
 0x620   :  { %7901 = vmatpush1.bf16.msra.mxu0 %v9539_v16  ;;  %7730 = vmatprep.subr.bf16.mxu1 %v9544_v39  ;;  %v9626_v16 = vld [vmem:[#allocation15 + $0x7a0] ss:$16 sps:$4 sm:$0xff]   ;;  %v9629_v39 = vld [vmem:[#allocation15 + $0x7a8] ss:$16 sps:$4 sm:$0xff]  }
 0x621   :  { %7902 = vmatprep.subr.bf16.mxu0 %v9547_v44  ;;  %v9634_v44 = vld [vmem:[#allocation15 + $0x7c4] ss:$16 sps:$4 sm:$0xff]  }
 0x623   :  { %7731 = vmatpush1.bf16.msra.mxu1 %v9542_v43  ;;  %v9637_v43 = vld [vmem:[#allocation15 + $0x7cc] ss:$16 sps:$4 sm:$0xff]  }
 0x624   :  { %7903 = vmatpush1.bf16.msra.mxu0 %v9545_v28  ;;  %7743 = vmatprep.subr.bf16.mxu1 %v9550_v46  ;;  %v9632_v28 = vld [vmem:[#allocation15 + $0x7c0] ss:$16 sps:$4 sm:$0xff]   ;;  %v9635_v46 = vld [vmem:[#allocation15 + $0x7c8] ss:$16 sps:$4 sm:$0xff]  }
 0x625   :  { %7915 = vmatprep.subr.bf16.mxu0 %v9553_v47  ;;  %v9640_v47 = vld [vmem:[#allocation15 + $0x7e4] ss:$16 sps:$4 sm:$0xff]  }
 0x626   :  { %7733 = vmatmul.mubr.bf16.vlgmr.msra.gmra.mrb[72].mxu1 %v10545_v61 }
 0x627   :  { %7905 = vmatmul.mubr.bf16.vlgmr.msra.gmra.mrb[56].mxu0 %v10545_v61  ;;  %7744 = vmatpush1.bf16.msra.mxu1 %v9548_v20  ;;  %v9571_v61 = vld [vmem:[#allocation15 + $0x66c] ss:$16 sps:$4 sm:$0xff]  }
 0x628   :  { %7775 = vmatprep.mubr.bf16.mxu1 %v10551_v11  ;;  %7916 = vmatpush1.bf16.msra.mxu0 %v9551_v50  ;;  %v9643_v20 = vld [vmem:[#allocation15 + $0x7ec] ss:$16 sps:$4 sm:$0xff]   ;;  %v9638_v50 = vld [vmem:[#allocation15 + $0x7e0] ss:$16 sps:$4 sm:$0xff]  }
 0x629   :  { %7947 = vmatprep.mubr.bf16.mxu0 %v10551_v11  ;;  %7745 = vmatprep.subr.bf16.mxu1 %v9556_v62  ;;  %v9572_v11 = vld [vmem:[#allocation15 + $0x680] ss:$16 sps:$4 sm:$0xff]   ;;  %v9641_v62 = vld [vmem:[#allocation15 + $0x7e8] ss:$16 sps:$4 sm:$0xff]  }
 0x62a   :  { %7917 = vmatprep.subr.bf16.mxu0 %v9559_v45  ;;  %v6312_v45 = vld [vmem:[#allocation16] sm:$0xf] }
 0x62b   :  { %7746 = vmatpush1.bf16.msra.mxu1 %v9554_v33  ;;  %v6317_v33 = vrot.slane %v6312_v45, %v10523_v7 }
 0x62c   :  { %7918 = vmatpush1.bf16.msra.mxu0 %v9557_v35  ;;  %7747 = vmatprep.subr.bf16.mxu1 %v9562_v48  ;;  %v7974_v35 = vld [vmem:[#allocation18] sm:$0xf]  ;;  %v6325_v48 = vrot.slane %v6312_v45, %v10525_v8 }
 0x62d   :  { %7919 = vmatprep.subr.bf16.mxu0 %v9565_v51  ;;  %v6321_v51 = vrot.slane %v6312_v45, %v10527_v25 }
 0x62f   :  { %7748 = vmatpush1.bf16.msra.mxu1 %v9560_v54  ;;  %v6329_v54 = vrot.slane %v6312_v45, %v10529_v9 }
 0x630   :  { %7920 = vmatpush1.bf16.msra.mxu0 %v9563_v29  ;;  %7749 = vmatprep.subr.bf16.mxu1 %v9568_v57 }
 0x631   :  { %7921 = vmatprep.subr.bf16.mxu0 %v9571_v61  ;;  %v7979_v61 = vrot.slane %v7974_v35, %v10523_v7 }
 0x633   :  { %7750 = vmatpush1.bf16.msra.mxu1 %v9566_v12 }
 0x634   :  { %7922 = vmatpush1.bf16.msra.mxu0 %v9569_v13  ;;  %7751 = vmatprep.subr.bf16.mxu1 %v9574_v63 }
 0x635   :  { %7923 = vmatprep.subr.bf16.mxu0 %v9577_v59 }
 0x637   :  { %7752 = vmatpush1.bf16.msra.mxu1 %v9572_v11 }
 0x638   :  { %7924 = vmatpush1.bf16.msra.mxu0 %v9575_v2  ;;  %7753 = vmatprep.subr.bf16.mxu1 %v9580_v58 }
 0x639   :  { %7925 = vmatprep.subr.bf16.mxu0 %v9583_v6  ;;  %v7987_v6 = vrot.slane %v7974_v35, %v10525_v8 }
 0x63b   :  { %7754 = vmatpush1.bf16.msra.mxu1 %v9578_v49 }
 0x63c   :  { %7926 = vmatpush1.bf16.msra.mxu0 %v9581_v17  ;;  %7755 = vmatprep.subr.bf16.mxu1 %v9586_v0 }
 0x63d   :  { %7927 = vmatprep.subr.bf16.mxu0 %v9589_v1 }
 0x63f   :  { %7756 = vmatpush1.bf16.msra.mxu1 %v9584_v31 }
 0x640   :  { %7928 = vmatpush1.bf16.msra.mxu0 %v9587_v4  ;;  %7757 = vmatprep.subr.bf16.mxu1 %v9592_v15 }
 0x641   :  { %7929 = vmatprep.subr.bf16.mxu0 %v9595_v52 }
 0x643   :  { %7758 = vmatpush1.bf16.msra.mxu1 %v9590_v37 }
 0x644   :  { %7930 = vmatpush1.bf16.msra.mxu0 %v9593_v40  ;;  %7759 = vmatprep.subr.bf16.mxu1 %v9598_v5 }
 0x645   :  { %7931 = vmatprep.subr.bf16.mxu0 %v9601_v14 }
 0x647   :  { %7760 = vmatpush1.bf16.msra.mxu1 %v9596_v55 }
 0x648   :  { %7932 = vmatpush1.bf16.msra.mxu0 %v9599_v18  ;;  %7761 = vmatprep.subr.bf16.mxu1 %v9604_v27  ;;  %v7991_v18 = vrot.slane %v7974_v35, %v10529_v9 }
 0x649   :  { %7933 = vmatprep.subr.bf16.mxu0 %v9607_v23 }
 0x64b   :  { %7762 = vmatpush1.bf16.msra.mxu1 %v9602_v10 }
 0x64c   :  { %7934 = vmatpush1.bf16.msra.mxu0 %v9605_v26  ;;  %7763 = vmatprep.subr.bf16.mxu1 %v9610_v53 }
 0x64d   :  { %7935 = vmatprep.subr.bf16.mxu0 %v9613_v3 }
 0x64f   :  { %7764 = vmatpush1.bf16.msra.mxu1 %v9608_v24 }
 0x650   :  { %7936 = vmatpush1.bf16.msra.mxu0 %v9611_v19  ;;  %7765 = vmatprep.subr.bf16.mxu1 %v9616_v56 }
 0x651   :  { %7937 = vmatprep.subr.bf16.mxu0 %v9619_v21 }
 0x653   :  { %7766 = vmatpush1.bf16.msra.mxu1 %v9614_v22 }
 0x654   :  { %7938 = vmatpush1.bf16.msra.mxu0 %v9617_v32  ;;  %7767 = vmatprep.subr.bf16.mxu1 %v9622_v42  ;;  %v8918_v42 = vld [vmem:[#allocation4] ss:$0 sm:$0xff] }
 0x655   :  { %7939 = vmatprep.subr.bf16.mxu0 %v9625_v30 }
 0x657   :  { %7768 = vmatpush1.bf16.msra.mxu1 %v9620_v34 }
 0x658   :  { %7940 = vmatpush1.bf16.msra.mxu0 %v9623_v60  ;;  %7769 = vmatprep.subr.bf16.mxu1 %v9628_v41 }
 0x659   :  { %7941 = vmatprep.subr.bf16.mxu0 %v9631_v38 }
 0x65b   :  { %7770 = vmatpush1.bf16.msra.mxu1 %v9626_v16 }
 0x65c   :  { %7942 = vmatpush1.bf16.msra.mxu0 %v9629_v39  ;;  %7771 = vmatprep.subr.bf16.mxu1 %v9634_v44 }
 0x65d   :  { %7943 = vmatprep.subr.bf16.mxu0 %v9637_v43 }
 0x65f   :  { %7772 = vmatpush1.bf16.msra.mxu1 %v9632_v28 }
 0x660   :  { %7944 = vmatpush1.bf16.msra.mxu0 %v9635_v46  ;;  %7773 = vmatprep.subr.bf16.mxu1 %v9640_v47 }
 0x661   :  { %7945 = vmatprep.subr.bf16.mxu0 %v9643_v20 }
 0x663   :  { %7774 = vmatpush1.bf16.msra.mxu1 %v9638_v50 }
 0x664   :  { %7946 = vmatpush1.bf16.msra.mxu0 %v9641_v62 }
 0x666   :  { %7776 = vmatmul.mubr.bf16.vlgmr.msra.gmra.mrb[72].mxu1 %v10547_v36 }
 0x667   :  { %7948 = vmatmul.mubr.bf16.vlgmr.msra.gmra.mrb[56].mxu0 %v10547_v36  ;;  %v7983_v36 = vrot.slane %v7974_v35, %v10527_v25 }
 0x739   :  { %v7777_v29 = vpop.f32.mrb[72].mxu1 }
 0x73a   :  { %v9018_v57 = vadd.f32 %v7777_v29, %v6317_v33  ;;  %v7949_v12 = vpop.f32.mrb[56].mxu0  ;;  %v7779_v13 = vpop.f32.mrb[73].mxu1 }
 0x73b   :  { %v9022_v63 = vadd.f32 %v7949_v12, %v6325_v48  ;;  %v9019_v59 = vadd.f32 %v7779_v13, %v6321_v51  ;;  %v7951_v11 = vpop.f32.mrb[57].mxu0  ;;  %v7781_v2 = vpop.f32.mrb[74].mxu1 }
 0x73c   :  { %v7958_v58 = vmax.f32 %v9018_v57, 0.0  ;;  %v9023_v49 = vadd.f32 %v7951_v11, %v6329_v54  ;;  %v9020_v17 = vadd.f32 %v7781_v2, %v6317_v33  ;;  %v7953_v0 = vpop.f32.mrb[58].mxu0  ;;  %v7783_v1 = vpop.f32.mrb[75].mxu1 }
 0x73d   :  { %v7960_v31 = vmax.f32 %v9022_v63, 0.0  ;;  %v7959_v4 = vmax.f32 %v9019_v59, 0.0  ;;  %v9024_v15 = vadd.f32 %v7953_v0, %v6325_v48  ;;  %v9021_v52 = vadd.f32 %v7783_v1, %v6321_v51  ;;  %v7955_v7 = vpop.f32.mrb[59].mxu0 }
 0x73e   :  { %7966 = vst [vmem:[%s10613_s12] sm:$0xff] %v7958_v58  ;;  %v7996_v37 = vmul.f32 %v7979_v61, %v7958_v58  ;;  %v7961_v25 = vmax.f32 %v9023_v49, 0.0  ;;  %v7962_v40 = vmax.f32 %v9020_v17, 0.0  ;;  %v9025_v5 = vadd.f32 %v7955_v7, %v6329_v54 }
 0x73f   :  { %7968 = vst [vmem:[%s10613_s12 + $0x10] sm:$0xff] %v7960_v31  ;;  %7967 = vst [vmem:[%s10613_s12 + $0x8] sm:$0xff] %v7959_v4  ;;  %v7997_v8 = vmul.f32 %v7983_v36, %v7959_v4  ;;  %v7964_v14 = vmax.f32 %v9024_v15, 0.0  ;;  %v7963_v55 = vmax.f32 %v9021_v52, 0.0  ;;  %v7998_v10 = vmul.f32 %v7987_v6, %v7960_v31 }
 0x740   :  { %7969 = vst [vmem:[%s10613_s12 + $0x18] sm:$0xff] %v7961_v25  ;;  %7970 = vst [vmem:[%s10613_s12 + $0x20] sm:$0xff] %v7962_v40  ;;  %v8000_v27 = vmul.f32 %v7979_v61, %v7962_v40  ;;  %v7965_v23 = vmax.f32 %v9025_v5, 0.0  ;;  %v7999_v24 = vmul.f32 %v7991_v18, %v7961_v25 }
 0x741   :  { %7972 = vst [vmem:[%s10613_s12 + $0x30] sm:$0xff] %v7964_v14  ;;  %7971 = vst [vmem:[%s10613_s12 + $0x28] sm:$0xff] %v7963_v55  ;;  %v8001_v9 = vmul.f32 %v7983_v36, %v7963_v55  ;;  %v8004_v26 = vadd.f32 %v7997_v8, %v7996_v37  ;;  %v8002_v53 = vmul.f32 %v7987_v6, %v7964_v14 }
 0x742   :  { %7973 = vst [vmem:[%s10613_s12 + $0x38] sm:$0xff] %v7965_v23  ;;  %v8003_v56 = vmul.f32 %v7991_v18, %v7965_v23 }
 0x743   :  { %v8009_v3 = vadd.f32 %v8001_v9, %v8000_v27  ;;  %v8005_v19 = vadd.f32 %v8004_v26, %v7998_v10 }
 0x745   :  { %v8006_v21 = vadd.f32 %v8005_v19, %v7999_v24  ;;  %v8010_v22 = vadd.f32 %v8009_v3, %v8002_v53 }
 0x747   :  { %8007 = vadd.xlane.f32.xlu0 %v8006_v21  ;;  %v8011_v32 = vadd.f32 %v8010_v22, %v8003_v56 }
 0x74b   :  { %8012 = vadd.xlane.f32.xlu0 %v8011_v32 }
 0x7d4   :  { %v8008_v30 = vpop.xlane.xlu0 %8007 }
 0x7d5   :  { %v8021_v34 = vadd.f32 %v8918_v42, %v8008_v30 }
 0x7d7   :  { %8024 = vst.msk [vmem:[%s10612_s11] sm:$0xff] %vm8023_vm4, %v8021_v34 }
 0x7d8   :  { %v8013_v60 = vpop.xlane.xlu0 %8012 }
 0x7d9   :  { %v8022_v41 = vadd.f32 %v8918_v42, %v8013_v60 }
 0x7db   :  { %8025 = vst.msk [vmem:[%s10612_s11 + $0x8] sm:$0xff] %vm8023_vm4, %v8022_v41 }
 0x7dc   :  { %8034 = vsyncpa [#allocation6], 1 }
 0x7dd   :  { %8035 = vsyncpa [#allocation8], 1 }
 0x7de   :  { %8036 = vsyncpa [#allocation11], 1 }
 0x7df   :  { %8037 = vsyncpa [#allocation14], 1 }
 0x7e0   :  { %8038 = vsyncpa [#allocation17], 1 }

</bundles_post_ra>
